<compile_context>
chip_gen: v7x
topology: tpu7x:2x2x1
jax: 0.10.0
libtpu: 0.0.40
codegen_flags: <defaults>
</compile_context>

<pallas_src>
import functools

import jax
import jax.numpy as jnp
from jax import lax
from jax.experimental import pallas as pl
from jax.experimental.pallas import tpu as pltpu

_LANE = 128


def _round_up(x, m):
    return (x + m - 1) // m * m


def _pick_tile(dim, cap):
    """Largest multiple of 128 that divides `dim` (dim % 128 == 0) and is <= cap."""
    best = _LANE
    t = _LANE
    while t <= min(dim, cap):
        if dim % t == 0:
            best = t
        t += _LANE
    return best


def _select_node_tile(n):
    # 512-node tiles amortize the ~0.35 us per-grid-step overhead (needed to
    # approach the HBM roofline, especially on v7x); 256 bounds the quadratic
    # adjacency padding waste for small graphs and keeps >= 2 dst tiles
    # (megacore split on v7x) for modest N.
    return 512 if n >= 1536 else 256


def _vmem_limit_bytes(tile_nodes):
    # 32 MiB covers the 256-node tiling on every generation; 48 MiB for 512+
    # tiles leaves headroom on v5e/v6e (128 MiB physical) and stays safely
    # below v7x's 64 MiB physical VMEM.
    return (48 if tile_nodes >= 512 else 32) * 1024 * 1024


# ----------------- kernel 1: fused (BN + relu) -> feature matmul -------------
def _matmul_kernel(*refs, fuse_bn, act):
    if fuse_bn:
        x_ref, w_ref, mean_ref, rstd_ref, gamma_ref, beta_ref, o_ref, acc_ref = refs
    else:
        x_ref, w_ref, o_ref, acc_ref = refs

    k = pl.program_id(2)  # program_id only at kernel top level (interpret-safe)

    @pl.when(k == 0)
    def _():
        acc_ref[...] = jnp.zeros_like(acc_ref)

    x = x_ref[...]
    if fuse_bn:
        # previous layer's BatchNorm apply (+ optional relu), fused as prologue
        x = (x - mean_ref[...]) * rstd_ref[...] * gamma_ref[...] + beta_ref[...]
        if act:
            x = jnp.maximum(x, 0.0)
    # bf16 x bf16 -> f32 accumulate: single-pass MXU, explicit precision so an
    # ambient jax_default_matmul_precision cannot multiply MXU passes.
    acc_ref[...] += jnp.dot(x.astype(jnp.bfloat16), w_ref[...],
                            preferred_element_type=jnp.float32,
                            precision=lax.Precision.DEFAULT)

    @pl.when(k == pl.num_programs(2) - 1)
    def _():
        o_ref[...] = acc_ref[...].astype(o_ref.dtype)


def _feature_matmul(x, w, bn, *, tile_m, vmem_limit):
    """H_all = act(BN(x)) @ w  (prologue optional), emitted in bf16."""
    M, K = x.shape
    _, N = w.shape
    tm = tile_m
    tn = _pick_tile(N, 512)
    tk = _pick_tile(K, 512)
    assert M % tm == 0 and N % tn == 0 and K % tk == 0

    fuse_bn = bn is not None
    if fuse_bn:
        mean, rstd, gamma, beta, act = bn
        extra_args = [mean, rstd, gamma, beta]
        vec = pl.BlockSpec((1, tk), lambda i, j, k: (0, k))
        extra_specs = [vec, vec, vec, vec]
    else:
        act = False
        extra_args, extra_specs = [], []

    kernel = functools.partial(_matmul_kernel, fuse_bn=fuse_bn, act=act)
    return pl.pallas_call(
        kernel,
        out_shape=jax.ShapeDtypeStruct((M, N), jnp.bfloat16),
        grid=(M // tm, N // tn, K // tk),
        in_specs=[pl.BlockSpec((tm, tk), lambda i, j, k: (i, k)),
                  pl.BlockSpec((tk, tn), lambda i, j, k: (k, j))] + extra_specs,
        out_specs=pl.BlockSpec((tm, tn), lambda i, j, k: (i, j)),
        scratch_shapes=[pltpu.VMEM((tm, tn), jnp.float32)],
        compiler_params=pltpu.CompilerParams(
            dimension_semantics=("parallel", "parallel", "arbitrary"),
            vmem_limit_bytes=vmem_limit),
    )(x, w, *extra_args)


# --------------------- kernel 2: relation-summed aggregation ----------------
def _aggregate_kernel(a_ref, hmsg_ref, hloop_ref, norm_ref, bias_ref, mask_ref,
                      node_ref, stats_ref, acc_ref):
    # All program_id reads hoisted to kernel top level (nested program_id
    # inside pl.when bodies does not lower in interpret mode).
    r = pl.program_id(1)
    s = pl.program_id(2)
    is_first = jnp.logical_and(r == 0, s == 0)
    is_last = jnp.logical_and(r == pl.num_programs(1) - 1,
                              s == pl.num_programs(2) - 1)

    @pl.when(is_first)
    def _():
        acc_ref[...] = jnp.zeros_like(acc_ref)

    # message passing for (relation r, src tile s):
    #   A[r, d_tile, s_tile] @ (X @ W_r)[s_tile]     (bf16 x bf16 -> f32 acc)
    acc_ref[...] += jnp.dot(a_ref[...], hmsg_ref[...],
                            preferred_element_type=jnp.float32,
                            precision=lax.Precision.DEFAULT)

    @pl.when(is_last)
    def _():
        # apply_func (ft * norm), then bias, then the self-loop message; mask
        # padded dst rows so they never pollute the BatchNorm statistics (and
        # stay harmless as inputs of the next layer).
        node = (acc_ref[...] * norm_ref[...] + bias_ref[...]
                + hloop_ref[...].astype(jnp.float32)) * mask_ref[...]
        node_ref[...] = node
        # per-dst-tile partial BatchNorm statistics (two-pass BN, megacore-safe:
        # each dst tile writes only its own stats block).
        ssum = jnp.sum(node, axis=0, keepdims=True)
        ssq = jnp.sum(node * node, axis=0, keepdims=True)
        pad = jnp.zeros((6, node.shape[1]), jnp.float32)
        stats_ref[...] = jnp.concatenate([ssum, ssq, pad], axis=0)


def _aggregate(adj, h_all, norm, bias, rowmask, *, out_p, tile_d, tile_s,
               vmem_limit):
    R, Np, _ = adj.shape
    n_d = Np // tile_d
    n_s = Np // tile_s

    node_pre, stats = pl.pallas_call(
        _aggregate_kernel,
        out_shape=(jax.ShapeDtypeStruct((Np, out_p), jnp.float32),
                   jax.ShapeDtypeStruct((n_d, 8, out_p), jnp.float32)),
        grid=(n_d, R, n_s),
        in_specs=[
            # adjacency tile A[r, d_tile, s_tile] (bf16, relation axis squeezed)
            # perf knob (sweep on HW): pipeline_mode=pl.Buffered(3)
            pl.BlockSpec((None, tile_d, tile_s), lambda d, r, s: (r, d, s)),
            # per-relation message block (X @ W_r)[s_tile] (column chunk r, bf16)
            pl.BlockSpec((tile_s, out_p), lambda d, r, s: (s, r)),
            # self-loop message block (X @ W_loop)[d_tile] (column chunk R, bf16)
            pl.BlockSpec((tile_d, out_p), lambda d, r, s: (d, R)),
            pl.BlockSpec((tile_d, 1), lambda d, r, s: (d, 0)),   # norm (per dst)
            pl.BlockSpec((1, out_p), lambda d, r, s: (0, 0)),    # bias
            pl.BlockSpec((tile_d, 1), lambda d, r, s: (d, 0)),   # row validity mask
        ],
        out_specs=(
            pl.BlockSpec((tile_d, out_p), lambda d, r, s: (d, 0)),      # pre-BN repr
            pl.BlockSpec((None, 8, out_p), lambda d, r, s: (d, 0, 0)),  # sum / sumsq
        ),
        scratch_shapes=[pltpu.VMEM((tile_d, out_p), jnp.float32)],
        compiler_params=pltpu.CompilerParams(
            dimension_semantics=("parallel", "arbitrary", "arbitrary"),
            vmem_limit_bytes=vmem_limit),
    )(adj, h_all, h_all, norm, bias, rowmask)
    return node_pre, stats


# ------------------ kernel 3: standalone BatchNorm + relu --------------------
# Only used for the final layer; intermediate layers get BN fused into the next
# layer's feature matmul (saves one full Np x Out_p f32 HBM round trip each).
def _bn_act_kernel(x_ref, mean_ref, rstd_ref, gamma_ref, beta_ref, o_ref, *, act):
    y = (x_ref[...] - mean_ref[...]) * rstd_ref[...] * gamma_ref[...] + beta_ref[...]
    if act:
        y = jnp.maximum(y, 0.0)
    o_ref[...] = y


def _bn_act(node, mean, rstd, gamma, beta, *, activation, tile_d, vmem_limit):
    Np, out_p = node.shape
    vec = pl.BlockSpec((1, out_p), lambda d: (0, 0))
    return pl.pallas_call(
        functools.partial(_bn_act_kernel, act=activation),
        out_shape=jax.ShapeDtypeStruct((Np, out_p), jnp.float32),
        grid=(Np // tile_d,),
        in_specs=[pl.BlockSpec((tile_d, out_p), lambda d: (d, 0)),
                  vec, vec, vec, vec],
        out_specs=pl.BlockSpec((tile_d, out_p), lambda d: (d, 0)),
        compiler_params=pltpu.CompilerParams(
            dimension_semantics=("parallel",),
            vmem_limit_bytes=vmem_limit),
    )(node, mean, rstd, gamma, beta)


# ------------------------------- layer wrapper -------------------------------
def rgcn_layer(h, adj_p, norm_p, rowmask_p, bn_in, p, *, activation, n_real,
               tile_nodes, vmem_limit, eps):
    """One RGCNLayer on padded inputs.  Returns (node_pre, pending_bn) where
    pending_bn = (mean, rstd, gamma, beta, act) is applied lazily — either
    fused into the next layer's feature matmul or by the final _bn_act."""
    Np, In_p = h.shape
    R = adj_p.shape[0]
    In, Out = p['w_loop'].shape
    Out_p = _round_up(Out, _LANE)

    # Base decomposition W_r = sum_b w_rel[r,b] * w_bases[b] (as in get_message),
    # then fuse all relation weights and the self-loop weight into a single
    # lane-dense (In_p, (R+1)*Out_p) bf16 matrix: chunk r = W_r, chunk R = W_loop.
    if p.get('w_bases') is not None:
        w_rel_full = jnp.einsum('rb,bio->rio', p['w_rel'], p['w_bases'],
                                precision=lax.Precision.HIGHEST)
    else:
        w_rel_full = p['w_rel']
    w_all = jnp.concatenate([w_rel_full, p['w_loop'][None]], axis=0)  # (R+1, In, Out)
    w_all = jnp.pad(w_all, ((0, 0), (0, In_p - In), (0, Out_p - Out)))
    w_all = jnp.transpose(w_all, (1, 0, 2)).reshape(In_p, (R + 1) * Out_p)
    w_all = w_all.astype(jnp.bfloat16)

    bias_p = jnp.pad(p['bias'], ((0, 0), (0, Out_p - Out)))
    gamma_p = jnp.pad(p['gamma'], ((0, 0), (0, Out_p - Out)))
    beta_p = jnp.pad(p['beta'], ((0, 0), (0, Out_p - Out)))

    # 1) one bf16 MXU matmul for every message type (incl. self-loop), with the
    #    previous layer's BN + relu fused in as a prologue.
    h_all = _feature_matmul(h, w_all, bn_in, tile_m=tile_nodes,
                            vmem_limit=vmem_limit)

    # 2) relation-summed message passing + norm / bias / self-loop + row mask,
    #    with per-dst-tile BatchNorm partial sums (two-pass BN across tiles).
    node_pre, stats = _aggregate(adj_p, h_all, norm_p, bias_p, rowmask_p,
                                 out_p=Out_p, tile_d=tile_nodes,
                                 tile_s=tile_nodes, vmem_limit=vmem_limit)

    # 3) BatchNorm1d batch statistics (training mode, biased variance) from the
    #    per-tile partials (tiny O(Out) bookkeeping).  E[x^2]-mean^2 can cancel
    #    when |mean| >> std; the max(., 0) guard keeps rsqrt well defined.
    total = jnp.sum(stats[:, 0, :], axis=0, keepdims=True)       # (1, Out_p)
    total_sq = jnp.sum(stats[:, 1, :], axis=0, keepdims=True)
    mean = total / n_real
    var = jnp.maximum(total_sq / n_real - mean * mean, 0.0)
    rstd = lax.rsqrt(var + eps)
    return node_pre, (mean, rstd, gamma_p, beta_p, activation)


def rgcn_forward(x, adj_p, norm_p, rowmask_p, params, *, n_real, tile_nodes,
                 eps=1e-5):
    """Full RGCN forward on preprocessed graph tensors (see preprocess_graph)."""
    Np = adj_p.shape[1]
    N, In = x.shape
    In_p = _round_up(In, _LANE)
    vmem_limit = _vmem_limit_bytes(tile_nodes)

    h = jnp.pad(x, ((0, Np - N), (0, In_p - In)))
    bn_state = None
    for idx, p in enumerate(params):
        h, bn_state = rgcn_layer(h, adj_p, norm_p, rowmask_p, bn_state, p,
                                 activation=(idx != 0),   # first layer: None
                                 n_real=n_real, tile_nodes=tile_nodes,
                                 vmem_limit=vmem_limit, eps=eps)

    # final layer's BN + activation has no next matmul to fuse into
    mean, rstd, gamma_p, beta_p, act = bn_state
    h = _bn_act(h, mean, rstd, gamma_p, beta_p, activation=act,
                tile_d=tile_nodes, vmem_limit=vmem_limit)

    out_size = params[-1]['w_loop'].shape[1]
    return h[:n_real, :out_size]


def preprocess_graph(adj, norm, *, tile_nodes):
    """One-time graph preprocessing, hoisted OUT of the jitted forward:
    pad nodes to the tile size, cast adjacency to bf16 (exact for integer edge
    multiplicities <= 256), and build the padded-row validity mask.
    TODO(synk): optionally pre-fold norm into A (needs f32 A or re-validation)."""
    R, N, _ = adj.shape
    Np = _round_up(N, tile_nodes)
    max_count = float(jnp.max(adj))
    assert max_count <= 256.0, "edge multiplicity too large for exact bf16 adjacency"
    adj_p = jnp.pad(adj, ((0, 0), (0, Np - N), (0, Np - N))).astype(jnp.bfloat16)
    norm_p = jnp.pad(norm, ((0, Np - N), (0, 0)))
    rowmask = (jnp.arange(Np) < N).astype(jnp.float32).reshape(Np, 1)
    return adj_p, norm_p, rowmask


# ------------------------------ parameters / ref ------------------------------
def xavier_uniform(key, shape, fan_in, fan_out, gain):
    a = gain * jnp.sqrt(6.0 / (fan_in + fan_out))
    return jax.random.uniform(key, shape, jnp.float32, -a, a)


def make_rgcn_params(key, input_size, hidden_size, output_size,
                     rel_num, base_num, layer_num):
    """Deterministic parameter init mirroring RGCN.__init__ shapes."""
    gain = jnp.sqrt(2.0)  # calculate_gain('relu')
    sizes = []
    for idx in range(layer_num):
        if idx == 0:
            sizes.append((input_size, hidden_size))
        elif idx == layer_num - 1:
            sizes.append((hidden_size, output_size))
        else:
            sizes.append((hidden_size, hidden_size))
    params = []
    for (i_sz, o_sz) in sizes:
        key, k1, k2, k3 = jax.random.split(key, 4)
        w_loop = xavier_uniform(k1, (i_sz, o_sz), i_sz, o_sz, gain)
        w_bases = xavier_uniform(k2, (base_num, i_sz, o_sz),
                                 i_sz * o_sz, base_num * o_sz, gain)
        w_rel = xavier_uniform(k3, (rel_num, base_num), base_num, rel_num, gain)
        params.append(dict(
            w_loop=w_loop, w_bases=w_bases, w_rel=w_rel,
            bias=jnp.zeros((1, o_sz), jnp.float32),    # zeros_(w_bias)
            gamma=jnp.ones((1, o_sz), jnp.float32),    # BatchNorm1d weight
            beta=jnp.zeros((1, o_sz), jnp.float32),    # BatchNorm1d bias
        ))
    return params


def rgcn_forward_ref(x, adj, norm, params, eps=1e-5):
    """Pure-JAX float32 reference (HIGHEST precision matmuls) for verification."""
    hp = lax.Precision.HIGHEST
    for idx, p in enumerate(params):
        if p.get('w_bases') is not None:
            w_rel_full = jnp.einsum('rb,bio->rio', p['w_rel'], p['w_bases'],
                                    precision=hp)
        else:
            w_rel_full = p['w_rel']
        loop_msg = jnp.dot(x, p['w_loop'], precision=hp)
        msgs = jnp.einsum('rds,si,rio->do', adj, x, w_rel_full, precision=hp)
        node = msgs * norm + p['bias'] + loop_msg
        mean = jnp.mean(node, axis=0, keepdims=True)
        var = jnp.mean((node - mean) ** 2, axis=0, keepdims=True)
        node = (node - mean) * lax.rsqrt(var + eps) * p['gamma'] + p['beta']
        if idx != 0:
            node = jnp.maximum(node, 0.0)
        x = node
    return x


if __name__ == "__main__":
    # Small synthetic config (args.gnn_layer_num=3, args.base_num=2, args.dropout=0.0).
    # N=600 pads to 768 = 3 node tiles of 256, exercising real dst/src tiling,
    # padded-row masking and the two-pass BatchNorm reduction.
    N = 600
    input_size = 16
    hidden_size = 32
    output_size = 24
    rel_num = 3
    base_num = 2
    layer_num = 3
    E = 2400

    key = jax.random.PRNGKey(0)
    key, kx, ks, kd, kr, kp = jax.random.split(key, 6)

    # node features (graph.ndata['ft'])
    x = jax.random.normal(kx, (N, input_size), jnp.float32)

    # random edge list -> dense per-relation adjacency A[r, dst, src]
    src = jax.random.randint(ks, (E,), 0, N)
    dst = jax.random.randint(kd, (E,), 0, N)
    rel = jax.random.randint(kr, (E,), 0, rel_num)
    adj = jnp.zeros((rel_num, N, N), jnp.float32).at[rel, dst, src].add(1.0)

    # norm = 1 / in-degree (graph.ndata['norm'])
    in_deg = jnp.sum(adj, axis=(0, 2))
    norm = (1.0 / jnp.maximum(in_deg, 1.0)).reshape(N, 1)

    params = make_rgcn_params(kp, input_size, hidden_size, output_size,
                              rel_num, base_num, layer_num)

    # one-time graph preprocessing, outside the jitted forward
    tile_nodes = _select_node_tile(N)
    adj_p, norm_p, rowmask_p = preprocess_graph(adj, norm, tile_nodes=tile_nodes)

    fwd = jax.jit(functools.partial(rgcn_forward, n_real=N, tile_nodes=tile_nodes))
    out = fwd(x, adj_p, norm_p, rowmask_p, params)
    out = jax.block_until_ready(out)

    ref = rgcn_forward_ref(x, adj, norm, params)
    assert out.shape == (N, output_size)
    # bf16 MXU operands (weights / messages) trade ~1e-2-level absolute error for
    # single-pass MXU throughput; compare against the f32 reference accordingly.
    rel_err = float(jnp.linalg.norm(out - ref) / jnp.linalg.norm(ref))
    abs_err = float(jnp.max(jnp.abs(out - ref)))
    assert rel_err < 5e-2 and abs_err < 2e-1, (rel_err, abs_err)

    print("KERNEL_OK")
</pallas_src>

<mosaic_0001>
module attributes {stable_mosaic.version = 11 : i64} {
  func.func @_matmul_kernel(%arg0: i32, %arg1: i32, %arg2: i32, %arg3: memref<256x128xf32, #tpu.memory_space<vmem>>, %arg4: memref<128x512xbf16, #tpu.memory_space<vmem>>, %arg5: memref<256x512xbf16, #tpu.memory_space<vmem>>, %arg6: memref<256x512xf32, #tpu.memory_space<vmem>>) attributes {dimension_semantics = [#tpu.dimension_semantics<parallel>, #tpu.dimension_semantics<parallel>, #tpu.dimension_semantics<arbitrary>], iteration_bounds = array<i64: 3, 1, 1>, scalar_prefetch = 0 : i64, scratch_operands = 1 : i64, tpu.core_type = #tpu.core_type<tc>, window_params = [{transform_indices = @transform_0, window_bounds = array<i64: 256, 128>}, {transform_indices = @transform_1, window_bounds = array<i64: 128, 512>}, {transform_indices = @transform_2, window_bounds = array<i64: 256, 512>}]} {
    %c0_i32 = arith.constant 0 : i32
    %0 = arith.cmpi eq, %arg2, %c0_i32 : i32
    %1 = arith.extui %0 : i1 to i32
    %c0_i32_0 = arith.constant 0 : i32
    %2 = arith.cmpi ne, %1, %c0_i32_0 : i32
    scf.if %2 {
      %cst_10 = arith.constant 0.000000e+00 : f32
      %13 = vector.broadcast %cst_10 : f32 to vector<256x512xf32>
      %c0_11 = arith.constant 0 : index
      %c0_12 = arith.constant 0 : index
      %14 = vector.load %arg6[%c0_11, %c0_12] : memref<256x512xf32, #tpu.memory_space<vmem>>, vector<256x512xf32>
      tpu.vector_store %arg6[%c0_11, %c0_12], %13 {strides = array<i32>} : memref<256x512xf32, #tpu.memory_space<vmem>>, vector<256x512xf32>,
    } else {
    }
    %c0 = arith.constant 0 : index
    %c0_1 = arith.constant 0 : index
    %3 = vector.load %arg3[%c0, %c0_1] : memref<256x128xf32, #tpu.memory_space<vmem>>, vector<256x128xf32>
    %c0_2 = arith.constant 0 : index
    %c0_3 = arith.constant 0 : index
    %4 = vector.load %arg6[%c0_2, %c0_3] : memref<256x512xf32, #tpu.memory_space<vmem>>, vector<256x512xf32>
    %5 = arith.truncf %3 : vector<256x128xf32> to vector<256x128xbf16>
    %c0_4 = arith.constant 0 : index
    %c0_5 = arith.constant 0 : index
    %6 = vector.load %arg4[%c0_4, %c0_5] : memref<128x512xbf16, #tpu.memory_space<vmem>>, vector<128x512xbf16>
    %cst = arith.constant dense<0.000000e+00> : vector<256x512xf32>
    %7 = tpu.matmul %5, %6, %cst {dimension_numbers = #tpu.dot_dimension_numbers<[1], [0], [0], [1], [0, 0, 1, 1], [], []>} : vector<256x128xbf16>, vector<128x512xbf16>, vector<256x512xf32> -> vector<256x512xf32>
    %8 = arith.addf %4, %7 : vector<256x512xf32>
    %c0_6 = arith.constant 0 : index
    %c0_7 = arith.constant 0 : index
    %9 = vector.load %arg6[%c0_6, %c0_7] : memref<256x512xf32, #tpu.memory_space<vmem>>, vector<256x512xf32>
    tpu.vector_store %arg6[%c0_6, %c0_7], %8 {strides = array<i32>} : memref<256x512xf32, #tpu.memory_space<vmem>>, vector<256x512xf32>,
    %c0_i32_8 = arith.constant 0 : i32
    %10 = arith.cmpi eq, %arg2, %c0_i32_8 : i32
    %11 = arith.extui %10 : i1 to i32
    %c0_i32_9 = arith.constant 0 : i32
    %12 = arith.cmpi ne, %11, %c0_i32_9 : i32
    scf.if %12 {
      %c0_10 = arith.constant 0 : index
      %c0_11 = arith.constant 0 : index
      %13 = vector.load %arg6[%c0_10, %c0_11] : memref<256x512xf32, #tpu.memory_space<vmem>>, vector<256x512xf32>
      %14 = arith.truncf %13 : vector<256x512xf32> to vector<256x512xbf16>
      %c0_12 = arith.constant 0 : index
      %c0_13 = arith.constant 0 : index
      %15 = vector.load %arg5[%c0_12, %c0_13] : memref<256x512xbf16, #tpu.memory_space<vmem>>, vector<256x512xbf16>
      tpu.vector_store %arg5[%c0_12, %c0_13], %14 {strides = array<i32>} : memref<256x512xbf16, #tpu.memory_space<vmem>>, vector<256x512xbf16>,
    } else {
    }
    return
  }
  func.func @transform_0(%arg0: i32, %arg1: i32, %arg2: i32) -> (i32, i32) {
    %c0_i32 = arith.constant 0 : i32
    return %arg0, %arg2 : i32, i32
  }
  func.func @transform_1(%arg0: i32, %arg1: i32, %arg2: i32) -> (i32, i32) {
    %c0_i32 = arith.constant 0 : i32
    return %arg2, %arg1 : i32, i32
  }
  func.func @transform_2(%arg0: i32, %arg1: i32, %arg2: i32) -> (i32, i32) {
    %c0_i32 = arith.constant 0 : i32
    return %arg0, %arg1 : i32, i32
  }
}

module attributes {stable_mosaic.version = 11 : i64} {
  func.func @_aggregate_kernel(%arg0: i32, %arg1: i32, %arg2: i32, %arg3: memref<1x256x256xbf16, #tpu.memory_space<vmem>>, %arg4: memref<256x128xbf16, #tpu.memory_space<vmem>>, %arg5: memref<256x128xbf16, #tpu.memory_space<vmem>>, %arg6: memref<256x1xf32, #tpu.memory_space<vmem>>, %arg7: memref<1x128xf32, #tpu.memory_space<vmem>>, %arg8: memref<256x1xf32, #tpu.memory_space<vmem>>, %arg9: memref<256x128xf32, #tpu.memory_space<vmem>>, %arg10: memref<1x8x128xf32, #tpu.memory_space<vmem>>, %arg11: memref<256x128xf32, #tpu.memory_space<vmem>>) attributes {dimension_semantics = [#tpu.dimension_semantics<parallel>, #tpu.dimension_semantics<arbitrary>, #tpu.dimension_semantics<arbitrary>], iteration_bounds = array<i64: 3, 3, 3>, scalar_prefetch = 0 : i64, scratch_operands = 1 : i64, tpu.core_type = #tpu.core_type<tc>, window_params = [{transform_indices = @transform_0, window_bounds = array<i64: 1, 256, 256>}, {transform_indices = @transform_1, window_bounds = array<i64: 256, 128>}, {transform_indices = @transform_2, window_bounds = array<i64: 256, 128>}, {transform_indices = @transform_3, window_bounds = array<i64: 256, 1>}, {pipeline_mode = #tpu.pipeline_mode<synchronous>, transform_indices = @transform_4, window_bounds = array<i64: 1, 128>}, {transform_indices = @transform_5, window_bounds = array<i64: 256, 1>}, {transform_indices = @transform_6, window_bounds = array<i64: 256, 128>}, {transform_indices = @transform_7, window_bounds = array<i64: 1, 8, 128>}]} {
    %c0_i32 = arith.constant 0 : i32
    %0 = arith.cmpi eq, %arg1, %c0_i32 : i32
    %c0_i32_0 = arith.constant 0 : i32
    %1 = arith.cmpi eq, %arg2, %c0_i32_0 : i32
    %2 = arith.andi %0, %1 : i1
    %c2_i32 = arith.constant 2 : i32
    %3 = arith.cmpi eq, %arg1, %c2_i32 : i32
    %c2_i32_1 = arith.constant 2 : i32
    %4 = arith.cmpi eq, %arg2, %c2_i32_1 : i32
    %5 = arith.andi %3, %4 : i1
    %6 = arith.extui %2 : i1 to i32
    %c0_i32_2 = arith.constant 0 : i32
    %7 = arith.cmpi ne, %6, %c0_i32_2 : i32
    scf.if %7 {
      %cst_12 = arith.constant 0.000000e+00 : f32
      %17 = vector.broadcast %cst_12 : f32 to vector<256x128xf32>
      %c0_13 = arith.constant 0 : index
      %c0_14 = arith.constant 0 : index
      %18 = vector.load %arg11[%c0_13, %c0_14] : memref<256x128xf32, #tpu.memory_space<vmem>>, vector<256x128xf32>
      tpu.vector_store %arg11[%c0_13, %c0_14], %17 {strides = array<i32>} : memref<256x128xf32, #tpu.memory_space<vmem>>, vector<256x128xf32>,
    } else {
    }
    %c0 = arith.constant 0 : index
    %c0_3 = arith.constant 0 : index
    %8 = vector.load %arg11[%c0, %c0_3] : memref<256x128xf32, #tpu.memory_space<vmem>>, vector<256x128xf32>
    %c0_4 = arith.constant 0 : index
    %c0_5 = arith.constant 0 : index
    %c0_6 = arith.constant 0 : index
    %9 = vector.load %arg3[%c0_4, %c0_5, %c0_6] : memref<1x256x256xbf16, #tpu.memory_space<vmem>>, vector<1x256x256xbf16>
    %10 = vector.shape_cast %9 : vector<1x256x256xbf16> to vector<256x256xbf16>
    %c0_7 = arith.constant 0 : index
    %c0_8 = arith.constant 0 : index
    %11 = vector.load %arg4[%c0_7, %c0_8] : memref<256x128xbf16, #tpu.memory_space<vmem>>, vector<256x128xbf16>
    %cst = arith.constant dense<0.000000e+00> : vector<256x128xf32>
    %12 = tpu.matmul %10, %11, %cst {dimension_numbers = #tpu.dot_dimension_numbers<[1], [0], [0], [1], [0, 0, 1, 1], [], []>} : vector<256x256xbf16>, vector<256x128xbf16>, vector<256x128xf32> -> vector<256x128xf32>
    %13 = arith.addf %8, %12 : vector<256x128xf32>
    %c0_9 = arith.constant 0 : index
    %c0_10 = arith.constant 0 : index
    %14 = vector.load %arg11[%c0_9, %c0_10] : memref<256x128xf32, #tpu.memory_space<vmem>>, vector<256x128xf32>
    tpu.vector_store %arg11[%c0_9, %c0_10], %13 {strides = array<i32>} : memref<256x128xf32, #tpu.memory_space<vmem>>, vector<256x128xf32>,
    %15 = arith.extui %5 : i1 to i32
    %c0_i32_11 = arith.constant 0 : i32
    %16 = arith.cmpi ne, %15, %c0_i32_11 : i32
    scf.if %16 {
      %c0_12 = arith.constant 0 : index
      %c0_13 = arith.constant 0 : index
      %17 = vector.load %arg11[%c0_12, %c0_13] : memref<256x128xf32, #tpu.memory_space<vmem>>, vector<256x128xf32>
      %c0_14 = arith.constant 0 : index
      %c0_15 = arith.constant 0 : index
      %18 = vector.load %arg6[%c0_14, %c0_15] : memref<256x1xf32, #tpu.memory_space<vmem>>, vector<256x1xf32>
      %19 = vector.broadcast %18 : vector<256x1xf32> to vector<256x128xf32>
      %20 = arith.mulf %17, %19 : vector<256x128xf32>
      %c0_16 = arith.constant 0 : index
      %c0_17 = arith.constant 0 : index
      %21 = vector.load %arg7[%c0_16, %c0_17] : memref<1x128xf32, #tpu.memory_space<vmem>>, vector<1x128xf32>
      %22 = vector.broadcast %21 : vector<1x128xf32> to vector<256x128xf32>
      %23 = arith.addf %20, %22 : vector<256x128xf32>
      %c0_18 = arith.constant 0 : index
      %c0_19 = arith.constant 0 : index
      %24 = vector.load %arg5[%c0_18, %c0_19] : memref<256x128xbf16, #tpu.memory_space<vmem>>, vector<256x128xbf16>
      %25 = arith.extf %24 : vector<256x128xbf16> to vector<256x128xf32>
      %26 = arith.addf %23, %25 : vector<256x128xf32>
      %c0_20 = arith.constant 0 : index
      %c0_21 = arith.constant 0 : index
      %27 = vector.load %arg8[%c0_20, %c0_21] : memref<256x1xf32, #tpu.memory_space<vmem>>, vector<256x1xf32>
      %28 = vector.broadcast %27 : vector<256x1xf32> to vector<256x128xf32>
      %29 = arith.mulf %26, %28 : vector<256x128xf32>
      %c0_22 = arith.constant 0 : index
      %c0_23 = arith.constant 0 : index
      %30 = vector.load %arg9[%c0_22, %c0_23] : memref<256x128xf32, #tpu.memory_space<vmem>>, vector<256x128xf32>
      tpu.vector_store %arg9[%c0_22, %c0_23], %29 {strides = array<i32>} : memref<256x128xf32, #tpu.memory_space<vmem>>, vector<256x128xf32>,
      %cst_24 = arith.constant dense<0.000000e+00> : vector<128xf32>
      %31 = vector.multi_reduction <add>, %29, %cst_24 [0] : vector<256x128xf32> to vector<128xf32>
      %32 = vector.shape_cast %31 : vector<128xf32> to vector<1x128xf32>
      %33 = arith.mulf %29, %29 : vector<256x128xf32>
      %cst_25 = arith.constant dense<0.000000e+00> : vector<128xf32>
      %34 = vector.multi_reduction <add>, %33, %cst_25 [0] : vector<256x128xf32> to vector<128xf32>
      %35 = vector.shape_cast %34 : vector<128xf32> to vector<1x128xf32>
      %cst_26 = arith.constant 0.000000e+00 : f32
      %36 = vector.broadcast %cst_26 : f32 to vector<6x128xf32>
      %37 = tpu.concatenate %32, %35, %36 in 0 : vector<1x128xf32>, vector<1x128xf32>, vector<6x128xf32> -> vector<8x128xf32>
      %c0_27 = arith.constant 0 : index
      %c0_28 = arith.constant 0 : index
      %c0_29 = arith.constant 0 : index
      %38 = vector.load %arg10[%c0_27, %c0_28, %c0_29] : memref<1x8x128xf32, #tpu.memory_space<vmem>>, vector<1x8x128xf32>
      %39 = vector.shape_cast %38 : vector<1x8x128xf32> to vector<8x128xf32>
      %40 = vector.shape_cast %37 : vector<8x128xf32> to vector<1x8x128xf32>
      tpu.vector_store %arg10[%c0_27, %c0_28, %c0_29], %40 {strides = array<i32>} : memref<1x8x128xf32, #tpu.memory_space<vmem>>, vector<1x8x128xf32>,
    } else {
    }
    return
  }
  func.func @transform_0(%arg0: i32, %arg1: i32, %arg2: i32) -> (i32, i32, i32) {
    %c0_i32 = arith.constant 0 : i32
    return %arg1, %arg0, %arg2 : i32, i32, i32
  }
  func.func @transform_1(%arg0: i32, %arg1: i32, %arg2: i32) -> (i32, i32) {
    %c0_i32 = arith.constant 0 : i32
    return %arg2, %arg1 : i32, i32
  }
  func.func @transform_2(%arg0: i32, %arg1: i32, %arg2: i32) -> (i32, i32) {
    %c3_i32 = arith.constant 3 : i32
    %c0_i32 = arith.constant 0 : i32
    return %arg0, %c3_i32 : i32, i32
  }
  func.func @transform_3(%arg0: i32, %arg1: i32, %arg2: i32) -> (i32, i32) {
    %c0_i32 = arith.constant 0 : i32
    %c0_i32_0 = arith.constant 0 : i32
    return %arg0, %c0_i32 : i32, i32
  }
  func.func @transform_4(%arg0: i32, %arg1: i32, %arg2: i32) -> (i32, i32) {
    %c0_i32 = arith.constant 0 : i32
    %c0_i32_0 = arith.constant 0 : i32
    %c0_i32_1 = arith.constant 0 : i32
    return %c0_i32, %c0_i32_0 : i32, i32
  }
  func.func @transform_5(%arg0: i32, %arg1: i32, %arg2: i32) -> (i32, i32) {
    %c0_i32 = arith.constant 0 : i32
    %c0_i32_0 = arith.constant 0 : i32
    return %arg0, %c0_i32 : i32, i32
  }
  func.func @transform_6(%arg0: i32, %arg1: i32, %arg2: i32) -> (i32, i32) {
    %c0_i32 = arith.constant 0 : i32
    %c0_i32_0 = arith.constant 0 : i32
    return %arg0, %c0_i32 : i32, i32
  }
  func.func @transform_7(%arg0: i32, %arg1: i32, %arg2: i32) -> (i32, i32, i32) {
    %c0_i32 = arith.constant 0 : i32
    %c0_i32_0 = arith.constant 0 : i32
    %c0_i32_1 = arith.constant 0 : i32
    return %arg0, %c0_i32, %c0_i32_0 : i32, i32, i32
  }
}

module attributes {stable_mosaic.version = 11 : i64} {
  func.func @_matmul_kernel(%arg0: i32, %arg1: i32, %arg2: i32, %arg3: memref<256x128xf32, #tpu.memory_space<vmem>>, %arg4: memref<128x512xbf16, #tpu.memory_space<vmem>>, %arg5: memref<1x128xf32, #tpu.memory_space<vmem>>, %arg6: memref<1x128xf32, #tpu.memory_space<vmem>>, %arg7: memref<1x128xf32, #tpu.memory_space<vmem>>, %arg8: memref<1x128xf32, #tpu.memory_space<vmem>>, %arg9: memref<256x512xbf16, #tpu.memory_space<vmem>>, %arg10: memref<256x512xf32, #tpu.memory_space<vmem>>) attributes {dimension_semantics = [#tpu.dimension_semantics<parallel>, #tpu.dimension_semantics<parallel>, #tpu.dimension_semantics<arbitrary>], iteration_bounds = array<i64: 3, 1, 1>, scalar_prefetch = 0 : i64, scratch_operands = 1 : i64, tpu.core_type = #tpu.core_type<tc>, window_params = [{transform_indices = @transform_0, window_bounds = array<i64: 256, 128>}, {transform_indices = @transform_1, window_bounds = array<i64: 128, 512>}, {transform_indices = @transform_2, window_bounds = array<i64: 1, 128>}, {transform_indices = @transform_3, window_bounds = array<i64: 1, 128>}, {transform_indices = @transform_4, window_bounds = array<i64: 1, 128>}, {transform_indices = @transform_5, window_bounds = array<i64: 1, 128>}, {transform_indices = @transform_6, window_bounds = array<i64: 256, 512>}]} {
    %c0_i32 = arith.constant 0 : i32
    %0 = arith.cmpi eq, %arg2, %c0_i32 : i32
    %1 = arith.extui %0 : i1 to i32
    %c0_i32_0 = arith.constant 0 : i32
    %2 = arith.cmpi ne, %1, %c0_i32_0 : i32
    scf.if %2 {
      %cst_18 = arith.constant 0.000000e+00 : f32
      %25 = vector.broadcast %cst_18 : f32 to vector<256x512xf32>
      %c0_19 = arith.constant 0 : index
      %c0_20 = arith.constant 0 : index
      %26 = vector.load %arg10[%c0_19, %c0_20] : memref<256x512xf32, #tpu.memory_space<vmem>>, vector<256x512xf32>
      tpu.vector_store %arg10[%c0_19, %c0_20], %25 {strides = array<i32>} : memref<256x512xf32, #tpu.memory_space<vmem>>, vector<256x512xf32>,
    } else {
    }
    %c0 = arith.constant 0 : index
    %c0_1 = arith.constant 0 : index
    %3 = vector.load %arg3[%c0, %c0_1] : memref<256x128xf32, #tpu.memory_space<vmem>>, vector<256x128xf32>
    %c0_2 = arith.constant 0 : index
    %c0_3 = arith.constant 0 : index
    %4 = vector.load %arg5[%c0_2, %c0_3] : memref<1x128xf32, #tpu.memory_space<vmem>>, vector<1x128xf32>
    %5 = vector.broadcast %4 : vector<1x128xf32> to vector<256x128xf32>
    %6 = arith.subf %3, %5 : vector<256x128xf32>
    %c0_4 = arith.constant 0 : index
    %c0_5 = arith.constant 0 : index
    %7 = vector.load %arg6[%c0_4, %c0_5] : memref<1x128xf32, #tpu.memory_space<vmem>>, vector<1x128xf32>
    %8 = vector.broadcast %7 : vector<1x128xf32> to vector<256x128xf32>
    %9 = arith.mulf %6, %8 : vector<256x128xf32>
    %c0_6 = arith.constant 0 : index
    %c0_7 = arith.constant 0 : index
    %10 = vector.load %arg7[%c0_6, %c0_7] : memref<1x128xf32, #tpu.memory_space<vmem>>, vector<1x128xf32>
    %11 = vector.broadcast %10 : vector<1x128xf32> to vector<256x128xf32>
    %12 = arith.mulf %9, %11 : vector<256x128xf32>
    %c0_8 = arith.constant 0 : index
    %c0_9 = arith.constant 0 : index
    %13 = vector.load %arg8[%c0_8, %c0_9] : memref<1x128xf32, #tpu.memory_space<vmem>>, vector<1x128xf32>
    %14 = vector.broadcast %13 : vector<1x128xf32> to vector<256x128xf32>
    %15 = arith.addf %12, %14 : vector<256x128xf32>
    %c0_10 = arith.constant 0 : index
    %c0_11 = arith.constant 0 : index
    %16 = vector.load %arg10[%c0_10, %c0_11] : memref<256x512xf32, #tpu.memory_space<vmem>>, vector<256x512xf32>
    %17 = arith.truncf %15 : vector<256x128xf32> to vector<256x128xbf16>
    %c0_12 = arith.constant 0 : index
    %c0_13 = arith.constant 0 : index
    %18 = vector.load %arg4[%c0_12, %c0_13] : memref<128x512xbf16, #tpu.memory_space<vmem>>, vector<128x512xbf16>
    %cst = arith.constant dense<0.000000e+00> : vector<256x512xf32>
    %19 = tpu.matmul %17, %18, %cst {dimension_numbers = #tpu.dot_dimension_numbers<[1], [0], [0], [1], [0, 0, 1, 1], [], []>} : vector<256x128xbf16>, vector<128x512xbf16>, vector<256x512xf32> -> vector<256x512xf32>
    %20 = arith.addf %16, %19 : vector<256x512xf32>
    %c0_14 = arith.constant 0 : index
    %c0_15 = arith.constant 0 : index
    %21 = vector.load %arg10[%c0_14, %c0_15] : memref<256x512xf32, #tpu.memory_space<vmem>>, vector<256x512xf32>
    tpu.vector_store %arg10[%c0_14, %c0_15], %20 {strides = array<i32>} : memref<256x512xf32, #tpu.memory_space<vmem>>, vector<256x512xf32>,
    %c0_i32_16 = arith.constant 0 : i32
    %22 = arith.cmpi eq, %arg2, %c0_i32_16 : i32
    %23 = arith.extui %22 : i1 to i32
    %c0_i32_17 = arith.constant 0 : i32
    %24 = arith.cmpi ne, %23, %c0_i32_17 : i32
    scf.if %24 {
      %c0_18 = arith.constant 0 : index
      %c0_19 = arith.constant 0 : index
      %25 = vector.load %arg10[%c0_18, %c0_19] : memref<256x512xf32, #tpu.memory_space<vmem>>, vector<256x512xf32>
      %26 = arith.truncf %25 : vector<256x512xf32> to vector<256x512xbf16>
      %c0_20 = arith.constant 0 : index
      %c0_21 = arith.constant 0 : index
      %27 = vector.load %arg9[%c0_20, %c0_21] : memref<256x512xbf16, #tpu.memory_space<vmem>>, vector<256x512xbf16>
      tpu.vector_store %arg9[%c0_20, %c0_21], %26 {strides = array<i32>} : memref<256x512xbf16, #tpu.memory_space<vmem>>, vector<256x512xbf16>,
    } else {
    }
    return
  }
  func.func @transform_0(%arg0: i32, %arg1: i32, %arg2: i32) -> (i32, i32) {
    %c0_i32 = arith.constant 0 : i32
    return %arg0, %arg2 : i32, i32
  }
  func.func @transform_1(%arg0: i32, %arg1: i32, %arg2: i32) -> (i32, i32) {
    %c0_i32 = arith.constant 0 : i32
    return %arg2, %arg1 : i32, i32
  }
  func.func @transform_2(%arg0: i32, %arg1: i32, %arg2: i32) -> (i32, i32) {
    %c0_i32 = arith.constant 0 : i32
    %c0_i32_0 = arith.constant 0 : i32
    return %c0_i32, %arg2 : i32, i32
  }
  func.func @transform_3(%arg0: i32, %arg1: i32, %arg2: i32) -> (i32, i32) {
    %c0_i32 = arith.constant 0 : i32
    %c0_i32_0 = arith.constant 0 : i32
    return %c0_i32, %arg2 : i32, i32
  }
  func.func @transform_4(%arg0: i32, %arg1: i32, %arg2: i32) -> (i32, i32) {
    %c0_i32 = arith.constant 0 : i32
    %c0_i32_0 = arith.constant 0 : i32
    return %c0_i32, %arg2 : i32, i32
  }
  func.func @transform_5(%arg0: i32, %arg1: i32, %arg2: i32) -> (i32, i32) {
    %c0_i32 = arith.constant 0 : i32
    %c0_i32_0 = arith.constant 0 : i32
    return %c0_i32, %arg2 : i32, i32
  }
  func.func @transform_6(%arg0: i32, %arg1: i32, %arg2: i32) -> (i32, i32) {
    %c0_i32 = arith.constant 0 : i32
    return %arg0, %arg1 : i32, i32
  }
}

module attributes {stable_mosaic.version = 11 : i64} {
  func.func @_matmul_kernel(%arg0: i32, %arg1: i32, %arg2: i32, %arg3: memref<256x128xf32, #tpu.memory_space<vmem>>, %arg4: memref<128x512xbf16, #tpu.memory_space<vmem>>, %arg5: memref<1x128xf32, #tpu.memory_space<vmem>>, %arg6: memref<1x128xf32, #tpu.memory_space<vmem>>, %arg7: memref<1x128xf32, #tpu.memory_space<vmem>>, %arg8: memref<1x128xf32, #tpu.memory_space<vmem>>, %arg9: memref<256x512xbf16, #tpu.memory_space<vmem>>, %arg10: memref<256x512xf32, #tpu.memory_space<vmem>>) attributes {dimension_semantics = [#tpu.dimension_semantics<parallel>, #tpu.dimension_semantics<parallel>, #tpu.dimension_semantics<arbitrary>], iteration_bounds = array<i64: 3, 1, 1>, scalar_prefetch = 0 : i64, scratch_operands = 1 : i64, tpu.core_type = #tpu.core_type<tc>, window_params = [{transform_indices = @transform_0, window_bounds = array<i64: 256, 128>}, {transform_indices = @transform_1, window_bounds = array<i64: 128, 512>}, {transform_indices = @transform_2, window_bounds = array<i64: 1, 128>}, {transform_indices = @transform_3, window_bounds = array<i64: 1, 128>}, {transform_indices = @transform_4, window_bounds = array<i64: 1, 128>}, {transform_indices = @transform_5, window_bounds = array<i64: 1, 128>}, {transform_indices = @transform_6, window_bounds = array<i64: 256, 512>}]} {
    %c0_i32 = arith.constant 0 : i32
    %0 = arith.cmpi eq, %arg2, %c0_i32 : i32
    %1 = arith.extui %0 : i1 to i32
    %c0_i32_0 = arith.constant 0 : i32
    %2 = arith.cmpi ne, %1, %c0_i32_0 : i32
    scf.if %2 {
      %cst_19 = arith.constant 0.000000e+00 : f32
      %27 = vector.broadcast %cst_19 : f32 to vector<256x512xf32>
      %c0_20 = arith.constant 0 : index
      %c0_21 = arith.constant 0 : index
      %28 = vector.load %arg10[%c0_20, %c0_21] : memref<256x512xf32, #tpu.memory_space<vmem>>, vector<256x512xf32>
      tpu.vector_store %arg10[%c0_20, %c0_21], %27 {strides = array<i32>} : memref<256x512xf32, #tpu.memory_space<vmem>>, vector<256x512xf32>,
    } else {
    }
    %c0 = arith.constant 0 : index
    %c0_1 = arith.constant 0 : index
    %3 = vector.load %arg3[%c0, %c0_1] : memref<256x128xf32, #tpu.memory_space<vmem>>, vector<256x128xf32>
    %c0_2 = arith.constant 0 : index
    %c0_3 = arith.constant 0 : index
    %4 = vector.load %arg5[%c0_2, %c0_3] : memref<1x128xf32, #tpu.memory_space<vmem>>, vector<1x128xf32>
    %5 = vector.broadcast %4 : vector<1x128xf32> to vector<256x128xf32>
    %6 = arith.subf %3, %5 : vector<256x128xf32>
    %c0_4 = arith.constant 0 : index
    %c0_5 = arith.constant 0 : index
    %7 = vector.load %arg6[%c0_4, %c0_5] : memref<1x128xf32, #tpu.memory_space<vmem>>, vector<1x128xf32>
    %8 = vector.broadcast %7 : vector<1x128xf32> to vector<256x128xf32>
    %9 = arith.mulf %6, %8 : vector<256x128xf32>
    %c0_6 = arith.constant 0 : index
    %c0_7 = arith.constant 0 : index
    %10 = vector.load %arg7[%c0_6, %c0_7] : memref<1x128xf32, #tpu.memory_space<vmem>>, vector<1x128xf32>
    %11 = vector.broadcast %10 : vector<1x128xf32> to vector<256x128xf32>
    %12 = arith.mulf %9, %11 : vector<256x128xf32>
    %c0_8 = arith.constant 0 : index
    %c0_9 = arith.constant 0 : index
    %13 = vector.load %arg8[%c0_8, %c0_9] : memref<1x128xf32, #tpu.memory_space<vmem>>, vector<1x128xf32>
    %14 = vector.broadcast %13 : vector<1x128xf32> to vector<256x128xf32>
    %15 = arith.addf %12, %14 : vector<256x128xf32>
    %cst = arith.constant 0.000000e+00 : f32
    %16 = vector.broadcast %cst : f32 to vector<256x128xf32>
    %17 = arith.maximumf %15, %16 : vector<256x128xf32>
    %c0_10 = arith.constant 0 : index
    %c0_11 = arith.constant 0 : index
    %18 = vector.load %arg10[%c0_10, %c0_11] : memref<256x512xf32, #tpu.memory_space<vmem>>, vector<256x512xf32>
    %19 = arith.truncf %17 : vector<256x128xf32> to vector<256x128xbf16>
    %c0_12 = arith.constant 0 : index
    %c0_13 = arith.constant 0 : index
    %20 = vector.load %arg4[%c0_12, %c0_13] : memref<128x512xbf16, #tpu.memory_space<vmem>>, vector<128x512xbf16>
    %cst_14 = arith.constant dense<0.000000e+00> : vector<256x512xf32>
    %21 = tpu.matmul %19, %20, %cst_14 {dimension_numbers = #tpu.dot_dimension_numbers<[1], [0], [0], [1], [0, 0, 1, 1], [], []>} : vector<256x128xbf16>, vector<128x512xbf16>, vector<256x512xf32> -> vector<256x512xf32>
    %22 = arith.addf %18, %21 : vector<256x512xf32>
    %c0_15 = arith.constant 0 : index
    %c0_16 = arith.constant 0 : index
    %23 = vector.load %arg10[%c0_15, %c0_16] : memref<256x512xf32, #tpu.memory_space<vmem>>, vector<256x512xf32>
    tpu.vector_store %arg10[%c0_15, %c0_16], %22 {strides = array<i32>} : memref<256x512xf32, #tpu.memory_space<vmem>>, vector<256x512xf32>,
    %c0_i32_17 = arith.constant 0 : i32
    %24 = arith.cmpi eq, %arg2, %c0_i32_17 : i32
    %25 = arith.extui %24 : i1 to i32
    %c0_i32_18 = arith.constant 0 : i32
    %26 = arith.cmpi ne, %25, %c0_i32_18 : i32
    scf.if %26 {
      %c0_19 = arith.constant 0 : index
      %c0_20 = arith.constant 0 : index
      %27 = vector.load %arg10[%c0_19, %c0_20] : memref<256x512xf32, #tpu.memory_space<vmem>>, vector<256x512xf32>
      %28 = arith.truncf %27 : vector<256x512xf32> to vector<256x512xbf16>
      %c0_21 = arith.constant 0 : index
      %c0_22 = arith.constant 0 : index
      %29 = vector.load %arg9[%c0_21, %c0_22] : memref<256x512xbf16, #tpu.memory_space<vmem>>, vector<256x512xbf16>
      tpu.vector_store %arg9[%c0_21, %c0_22], %28 {strides = array<i32>} : memref<256x512xbf16, #tpu.memory_space<vmem>>, vector<256x512xbf16>,
    } else {
    }
    return
  }
  func.func @transform_0(%arg0: i32, %arg1: i32, %arg2: i32) -> (i32, i32) {
    %c0_i32 = arith.constant 0 : i32
    return %arg0, %arg2 : i32, i32
  }
  func.func @transform_1(%arg0: i32, %arg1: i32, %arg2: i32) -> (i32, i32) {
    %c0_i32 = arith.constant 0 : i32
    return %arg2, %arg1 : i32, i32
  }
  func.func @transform_2(%arg0: i32, %arg1: i32, %arg2: i32) -> (i32, i32) {
    %c0_i32 = arith.constant 0 : i32
    %c0_i32_0 = arith.constant 0 : i32
    return %c0_i32, %arg2 : i32, i32
  }
  func.func @transform_3(%arg0: i32, %arg1: i32, %arg2: i32) -> (i32, i32) {
    %c0_i32 = arith.constant 0 : i32
    %c0_i32_0 = arith.constant 0 : i32
    return %c0_i32, %arg2 : i32, i32
  }
  func.func @transform_4(%arg0: i32, %arg1: i32, %arg2: i32) -> (i32, i32) {
    %c0_i32 = arith.constant 0 : i32
    %c0_i32_0 = arith.constant 0 : i32
    return %c0_i32, %arg2 : i32, i32
  }
  func.func @transform_5(%arg0: i32, %arg1: i32, %arg2: i32) -> (i32, i32) {
    %c0_i32 = arith.constant 0 : i32
    %c0_i32_0 = arith.constant 0 : i32
    return %c0_i32, %arg2 : i32, i32
  }
  func.func @transform_6(%arg0: i32, %arg1: i32, %arg2: i32) -> (i32, i32) {
    %c0_i32 = arith.constant 0 : i32
    return %arg0, %arg1 : i32, i32
  }
}

module attributes {stable_mosaic.version = 11 : i64} {
  func.func @_bn_act_kernel(%arg0: i32, %arg1: memref<256x128xf32, #tpu.memory_space<vmem>>, %arg2: memref<1x128xf32, #tpu.memory_space<vmem>>, %arg3: memref<1x128xf32, #tpu.memory_space<vmem>>, %arg4: memref<1x128xf32, #tpu.memory_space<vmem>>, %arg5: memref<1x128xf32, #tpu.memory_space<vmem>>, %arg6: memref<256x128xf32, #tpu.memory_space<vmem>>) attributes {dimension_semantics = [#tpu.dimension_semantics<parallel>], iteration_bounds = array<i64: 3>, scalar_prefetch = 0 : i64, scratch_operands = 0 : i64, tpu.core_type = #tpu.core_type<tc>, window_params = [{transform_indices = @transform_0, window_bounds = array<i64: 256, 128>}, {pipeline_mode = #tpu.pipeline_mode<synchronous>, transform_indices = @transform_1, window_bounds = array<i64: 1, 128>}, {pipeline_mode = #tpu.pipeline_mode<synchronous>, transform_indices = @transform_2, window_bounds = array<i64: 1, 128>}, {pipeline_mode = #tpu.pipeline_mode<synchronous>, transform_indices = @transform_3, window_bounds = array<i64: 1, 128>}, {pipeline_mode = #tpu.pipeline_mode<synchronous>, transform_indices = @transform_4, window_bounds = array<i64: 1, 128>}, {transform_indices = @transform_5, window_bounds = array<i64: 256, 128>}]} {
    %c0 = arith.constant 0 : index
    %c0_0 = arith.constant 0 : index
    %0 = vector.load %arg1[%c0, %c0_0] : memref<256x128xf32, #tpu.memory_space<vmem>>, vector<256x128xf32>
    %c0_1 = arith.constant 0 : index
    %c0_2 = arith.constant 0 : index
    %1 = vector.load %arg2[%c0_1, %c0_2] : memref<1x128xf32, #tpu.memory_space<vmem>>, vector<1x128xf32>
    %2 = vector.broadcast %1 : vector<1x128xf32> to vector<256x128xf32>
    %3 = arith.subf %0, %2 : vector<256x128xf32>
    %c0_3 = arith.constant 0 : index
    %c0_4 = arith.constant 0 : index
    %4 = vector.load %arg3[%c0_3, %c0_4] : memref<1x128xf32, #tpu.memory_space<vmem>>, vector<1x128xf32>
    %5 = vector.broadcast %4 : vector<1x128xf32> to vector<256x128xf32>
    %6 = arith.mulf %3, %5 : vector<256x128xf32>
    %c0_5 = arith.constant 0 : index
    %c0_6 = arith.constant 0 : index
    %7 = vector.load %arg4[%c0_5, %c0_6] : memref<1x128xf32, #tpu.memory_space<vmem>>, vector<1x128xf32>
    %8 = vector.broadcast %7 : vector<1x128xf32> to vector<256x128xf32>
    %9 = arith.mulf %6, %8 : vector<256x128xf32>
    %c0_7 = arith.constant 0 : index
    %c0_8 = arith.constant 0 : index
    %10 = vector.load %arg5[%c0_7, %c0_8] : memref<1x128xf32, #tpu.memory_space<vmem>>, vector<1x128xf32>
    %11 = vector.broadcast %10 : vector<1x128xf32> to vector<256x128xf32>
    %12 = arith.addf %9, %11 : vector<256x128xf32>
    %cst = arith.constant 0.000000e+00 : f32
    %13 = vector.broadcast %cst : f32 to vector<256x128xf32>
    %14 = arith.maximumf %12, %13 : vector<256x128xf32>
    %c0_9 = arith.constant 0 : index
    %c0_10 = arith.constant 0 : index
    %15 = vector.load %arg6[%c0_9, %c0_10] : memref<256x128xf32, #tpu.memory_space<vmem>>, vector<256x128xf32>
    tpu.vector_store %arg6[%c0_9, %c0_10], %14 {strides = array<i32>} : memref<256x128xf32, #tpu.memory_space<vmem>>, vector<256x128xf32>,
    return
  }
  func.func @transform_0(%arg0: i32) -> (i32, i32) {
    %c0_i32 = arith.constant 0 : i32
    %c0_i32_0 = arith.constant 0 : i32
    return %arg0, %c0_i32 : i32, i32
  }
  func.func @transform_1(%arg0: i32) -> (i32, i32) {
    %c0_i32 = arith.constant 0 : i32
    %c0_i32_0 = arith.constant 0 : i32
    %c0_i32_1 = arith.constant 0 : i32
    return %c0_i32, %c0_i32_0 : i32, i32
  }
  func.func @transform_2(%arg0: i32) -> (i32, i32) {
    %c0_i32 = arith.constant 0 : i32
    %c0_i32_0 = arith.constant 0 : i32
    %c0_i32_1 = arith.constant 0 : i32
    return %c0_i32, %c0_i32_0 : i32, i32
  }
  func.func @transform_3(%arg0: i32) -> (i32, i32) {
    %c0_i32 = arith.constant 0 : i32
    %c0_i32_0 = arith.constant 0 : i32
    %c0_i32_1 = arith.constant 0 : i32
    return %c0_i32, %c0_i32_0 : i32, i32
  }
  func.func @transform_4(%arg0: i32) -> (i32, i32) {
    %c0_i32 = arith.constant 0 : i32
    %c0_i32_0 = arith.constant 0 : i32
    %c0_i32_1 = arith.constant 0 : i32
    return %c0_i32, %c0_i32_0 : i32, i32
  }
  func.func @transform_5(%arg0: i32) -> (i32, i32) {
    %c0_i32 = arith.constant 0 : i32
    %c0_i32_0 = arith.constant 0 : i32
    return %arg0, %c0_i32 : i32, i32
  }
}

</mosaic_0001>

<bundles_post_ra>
// kernel: rgcn_forward.8
= control target key start
LH: loop header
LB: loop body
LE: loop exit
PB: predicated region body
PF: predicated region fallthrough
CT: control target
= control target key end

     0   :  { %s3798_s0 = inlined_call_operand.vmem [shape: bf16[3,768,768], index: 0, kind: input, shape index: {}]   ;;  %s3799_s1 = inlined_call_operand.vmem [shape: bf16[768,512], index: 1, kind: input, shape index: {}, may-alias: {1,2}]   ;;  %s3800_s2 = inlined_call_operand.vmem [shape: bf16[768,512], index: 2, kind: input, shape index: {}, may-alias: {1,2}]   ;;  %s3801_s3 = inlined_call_operand.vmem [shape: f32[768,1], index: 3, kind: input, shape index: {}]   ;;  %s3802_s4 = inlined_call_operand.vmem [shape: f32[1,128], index: 4, kind: input, shape index: {}]   ;;  %s3803_s5 = inlined_call_operand.vmem [shape: f32[768,1], index: 5, kind: input, shape index: {}]   ;;  %s3804_s6 = inlined_call_operand.vmem [shape: f32[768,128], index: 6, kind: output, shape index: {0}]   ;;  %s3805_s7 = inlined_call_operand.vmem [shape: f32[3,8,128], index: 7, kind: output, shape index: {1}]  }
   0x1   :  { %3810 = sst [smem:[#allocation12_spill]] %s3798_s0 }
   0x2   :  { %3811 = sst [smem:[#allocation13_spill]] %s3799_s1 }
   0x3   :  { %3812 = sst [smem:[#allocation14_spill]] %s3800_s2 }
   0x4   :  { %3813 = sst [smem:[#allocation15_spill]] %s3801_s3 }
   0x5   :  { %3814 = sst [smem:[#allocation16_spill]] %s3802_s4 }
   0x6   :  { %3815 = sst [smem:[#allocation17_spill]] %s3803_s5 }
   0x7   :  { %3816 = sst [smem:[#allocation18_spill]] %s3804_s6 }
   0x8   :  { %3817 = sst [smem:[#allocation19_spill]] %s3805_s7 }
   0x9   :  { %s3103_s24 = smov 0   ;;  %s3105_s25 = smov 0  }
   0xa   :  { %s3107_s26 = smov 0   ;;  %s3109_s27 = smov 0  }
   0xb   :  { %s3111_s28 = smov 0   ;;  %s3113_s29 = smov 0  }
   0xc   :  { %s3115_s30 = smov 0   ;;  %s3117_s8 = smov 0  }
   0xd   :  { %s3119_s9 = smov 0   ;;  %s3121_s10 = smov 0  }
   0xe   :  { %s3123_s11 = smov 0   ;;  %s3125_s12 = smov 0  }
   0xf   :  { %s3127_s13 = smov 0  }
  0x10 LB: > { %3818 = sst [smem:[#allocation6_spill]] %s3055_s12  ;;  %s30_s14 = sadd.s32 1, %s3047_s10  ;;  %s3059_s13 = sphi %s3127_s13, %s18_s13   ;;  %s3055_s12 = sphi %s3125_s12, %s3842_s12   ;;  %s3051_s11 = sphi %s3123_s11, %s3854_s11   ;;  %s3047_s10 = sphi %s3121_s10, %s3853_s10   ;;  %s3043_s9 = sphi %s3119_s9, %s3852_s9   ;;  %s3039_s8 = sphi %s3117_s8, %s3851_s8   ;;  %s3035_s30 = sphi %s3115_s30, %s3850_s30   ;;  %s3031_s29 = sphi %s3113_s29, %s3849_s29   ;;  %s3027_s28 = sphi %s3111_s28, %s3848_s28   ;;  %s3023_s27 = sphi %s3109_s27, %s3847_s27   ;;  %s3019_s26 = sphi %s3107_s26, %s3846_s26   ;;  %s3015_s25 = sphi %s3105_s25, %s3845_s25   ;;  %s3011_s24 = sphi %s3103_s24, %s3844_s24  }
  0x11   : > { %s33_s15 = sadd.s32 1, %s3051_s11  ;;  %p31_p0 = scmp.ge.s32.totalorder %s30_s14, 3 }
  0x12   : > { %s37_s16 = sadd.s32 1, %s3055_s12  ;;  %s48_s17 = sadd.s32 1, %s3031_s29 }
  0x13   : > { %p55_p1 = scmp.ne.s32.totalorder %s3031_s29, %s3027_s28  ;;  %s3856_s14 = smov (%p31_p0, %s30_s14), 0 }
  0x14   : > { %3819 = sst [smem:[#allocation7_spill]] %s3856_s14  ;;  %s3858_s15 = smov (!%p31_p0, %s33_s15), %s3051_s11 }
  0x15   : > { %s44_s18 = ssub.s32 %s3047_s10, %s3856_s14  ;;  %p56_p2 = scmp.eq.s32.totalorder %s3059_s13, 0 }
  0x16   : > { %p35_p3 = scmp.ge.s32.totalorder %s3858_s15, 3  ;;  %s76_s19 = sadd.s32 1, %s3023_s27 }
  0x17   : > { %p3183_p4 = por %p56_p2, %p55_p1  ;;  %p83_p5 = scmp.ne.s32.totalorder %s3023_s27, %s3019_s26 }
  0x18   : > { %s3860_s15 = smov (%p35_p3, %s3858_s15), 0  ;;  %s3862_s16 = smov (!%p35_p3, %s37_s16), %s3055_s12 }
  0x19   : > { %3821 = sst [smem:[#allocation8_spill]] %s3860_s15  ;;  %s41_s21 = ssub.s32 %s3051_s11, %s3860_s15 }
  0x1a   : > { %p3196_p6 = por %p83_p5, %p56_p2  ;;  %p39_p7 = scmp.ge.s32.totalorder %s3862_s16, 3 }
  0x1b   : > { %s73_s23 = sor.u32 %s44_s18, %s41_s21  ;;  %s102_s14 = sadd.s32 1, %s3015_s25 }
  0x1c   : > { %p74_p8 = scmp.eq.s32.totalorder %s73_s23, 0  ;;  %s3864_s16 = smov (%p39_p7, %s3862_s16), 0 }
  0x1d   : > { %3823 = sst [smem:[#allocation9_spill]] %s3864_s16  ;;  %s42_s7 = ssub.s32 %s3055_s12, %s3864_s16 }
  0x1e   : > { %s3204_s4 = scalar_select %p74_p8, %s3023_s27, %s76_s19  }
  0x1f   : > { %p109_p9 = scmp.ne.s32.totalorder %s3015_s25, %s3011_s24  ;;  %s43_s6 = sor.u32 %s42_s7, %s41_s21 }
  0x20   : > { %3824 = sst [smem:[#allocation10_spill]] %s3204_s4  ;;  %p100_p10 = scmp.eq.s32.totalorder %s42_s7, 0 }
  0x21   : > { %s45_s15 = sor.u32 %s44_s18, %s43_s6  ;;  %p3212_p11 = por %p109_p9, %p56_p2 }
  0x22   : > { %p46_p12 = scmp.eq.s32.totalorder %s45_s15, 0  ;;  %p2467_p13 = scmp.ge.s32.totalorder %s3059_s13, 27 }
  0x23   : > { %s3217_s3 = scalar_select %p100_p10, %s3015_s25, %s102_s14  }
  0x24   : > { %s3220_s23 = scalar_select %p46_p12, %s3031_s29, %s48_s17  }
  0x25   : > { %263 = sbr.rel (%p2467_p13) target bundleno = 133 (0x85), region = 20 }
  0x26   : > { %3826 = sst [smem:[#allocation11_spill]] %s3220_s23 }
  0x2c   : > { %266 = sbr.rel (!%p3183_p4) target bundleno = 71 (0x47), region = 24  ;;  %s268_s6 = sand.u32 (%p3183_p4), 1, %s3031_s29  }
  0x2d   : > { %s2470_s7 = sshll.u32 (%p3183_p4), %s3047_s10, 1  ;;  %s2783_s18 = smul.u32 (%p3183_p4), 192, %s3055_s12 }
  0x2e   : > { %s2468_s19 = sshll.u32 (%p3183_p4), %s268_s6, 8  ;;  %s2784_s21 = smul.u32 (%p3183_p4), 576, %s3051_s11 }
  0x2f   : > { %s274_s15 = sadd.s32 (%p3183_p4), %s2783_s18, %s2470_s7  ;;  %s3827_s0 = sld [smem:[#allocation12_spill]] (%p3183_p4) }
  0x30   : > { %s276_s14 = sadd.s32 (%p3183_p4), %s2784_s21, %s274_s15  ;;  %s3237_s20 = scalar_lea.vmem (%p3183_p4), [#allocation3], %s2468_s19 }
  0x31   : > { %s2472_s16 = sshll.u32 (%p3183_p4), %s276_s14, 2 }
  0x35   : > { %s3232_s4 = scalar_lea.vmem %s3827_s0, %s2472_s16 }
  0x36   : > { %v368_v0 = vld [vmem:[%s3232_s4] sm:$0xff]  ;;  %v370_v1 = vld [vmem:[%s3232_s4 + $0x18] sm:$0xff]  ;;  %v372_v2 = vld [vmem:[%s3232_s4 + $0x30] sm:$0xff] }
  0x37   : > { %369 = vst [vmem:[%s3237_s20] sm:$0xff] %v368_v0  ;;  %371 = vst [vmem:[%s3237_s20 + $0x8] sm:$0xff] %v370_v1  ;;  %v374_v3 = vld [vmem:[%s3232_s4 + $0x48] sm:$0xff]  ;;  %v376_v4 = vld [vmem:[%s3232_s4 + $0x60] sm:$0xff] }
  0x38   : > { %373 = vst [vmem:[%s3237_s20 + $0x10] sm:$0xff] %v372_v2  ;;  %v378_v5 = vld [vmem:[%s3232_s4 + $0x78] sm:$0xff]  ;;  %375 = vst [vmem:[%s3237_s20 + $0x18] sm:$0xff] %v374_v3  ;;  %v380_v6 = vld [vmem:[%s3232_s4 + $0x90] sm:$0xff] }
  0x39   : > { %377 = vst [vmem:[%s3237_s20 + $0x20] sm:$0xff] %v376_v4  ;;  %379 = vst [vmem:[%s3237_s20 + $0x28] sm:$0xff] %v378_v5  ;;  %v382_v7 = vld [vmem:[%s3232_s4 + $0xa8] sm:$0xff]  ;;  %v384_v8 = vld [vmem:[%s3232_s4 + $0xc0] sm:$0xff] }
  0x3a   : > { %381 = vst [vmem:[%s3237_s20 + $0x30] sm:$0xff] %v380_v6  ;;  %383 = vst [vmem:[%s3237_s20 + $0x38] sm:$0xff] %v382_v7  ;;  %v386_v9 = vld [vmem:[%s3232_s4 + $0xd8] sm:$0xff]  ;;  %v388_v10 = vld [vmem:[%s3232_s4 + $0xf0] sm:$0xff] }
  0x3b   : > { %385 = vst [vmem:[%s3237_s20 + $0x40] sm:$0xff] %v384_v8  ;;  %v390_v11 = vld [vmem:[%s3232_s4 + $0x108] sm:$0xff]  ;;  %387 = vst [vmem:[%s3237_s20 + $0x48] sm:$0xff] %v386_v9  ;;  %v392_v12 = vld [vmem:[%s3232_s4 + $0x120] sm:$0xff] }
  0x3c   : > { %389 = vst [vmem:[%s3237_s20 + $0x50] sm:$0xff] %v388_v10  ;;  %391 = vst [vmem:[%s3237_s20 + $0x58] sm:$0xff] %v390_v11  ;;  %v394_v13 = vld [vmem:[%s3232_s4 + $0x138] sm:$0xff]  ;;  %v396_v14 = vld [vmem:[%s3232_s4 + $0x150] sm:$0xff] }
  0x3d   : > { %393 = vst [vmem:[%s3237_s20 + $0x60] sm:$0xff] %v392_v12  ;;  %395 = vst [vmem:[%s3237_s20 + $0x68] sm:$0xff] %v394_v13  ;;  %v398_v15 = vld [vmem:[%s3232_s4 + $0x168] sm:$0xff]  ;;  %v400_v16 = vld [vmem:[%s3232_s4 + $0x180] sm:$0xff] }
  0x3e   : > { %397 = vst [vmem:[%s3237_s20 + $0x70] sm:$0xff] %v396_v14  ;;  %v402_v17 = vld [vmem:[%s3232_s4 + $0x198] sm:$0xff]  ;;  %399 = vst [vmem:[%s3237_s20 + $0x78] sm:$0xff] %v398_v15  ;;  %v404_v18 = vld [vmem:[%s3232_s4 + $0x1b0] sm:$0xff] }
  0x3f   : > { %401 = vst [vmem:[%s3237_s20 + $0x80] sm:$0xff] %v400_v16  ;;  %403 = vst [vmem:[%s3237_s20 + $0x88] sm:$0xff] %v402_v17  ;;  %v406_v19 = vld [vmem:[%s3232_s4 + $0x1c8] sm:$0xff]  ;;  %v408_v20 = vld [vmem:[%s3232_s4 + $0x1e0] sm:$0xff] }
  0x40   : > { %405 = vst [vmem:[%s3237_s20 + $0x90] sm:$0xff] %v404_v18  ;;  %407 = vst [vmem:[%s3237_s20 + $0x98] sm:$0xff] %v406_v19  ;;  %v410_v21 = vld [vmem:[%s3232_s4 + $0x1f8] sm:$0xff]  ;;  %v412_v22 = vld [vmem:[%s3232_s4 + $0x210] sm:$0xff] }
  0x41   : > { %409 = vst [vmem:[%s3237_s20 + $0xa0] sm:$0xff] %v408_v20  ;;  %v414_v23 = vld [vmem:[%s3232_s4 + $0x228] sm:$0xff]  ;;  %411 = vst [vmem:[%s3237_s20 + $0xa8] sm:$0xff] %v410_v21  ;;  %v416_v24 = vld [vmem:[%s3232_s4 + $0x240] sm:$0xff] }
  0x42   : > { %413 = vst [vmem:[%s3237_s20 + $0xb0] sm:$0xff] %v412_v22  ;;  %415 = vst [vmem:[%s3237_s20 + $0xb8] sm:$0xff] %v414_v23  ;;  %v418_v25 = vld [vmem:[%s3232_s4 + $0x258] sm:$0xff]  ;;  %v420_v26 = vld [vmem:[%s3232_s4 + $0x270] sm:$0xff] }
  0x43   : > { %417 = vst [vmem:[%s3237_s20 + $0xc0] sm:$0xff] %v416_v24  ;;  %419 = vst [vmem:[%s3237_s20 + $0xc8] sm:$0xff] %v418_v25  ;;  %v422_v27 = vld [vmem:[%s3232_s4 + $0x288] sm:$0xff]  ;;  %v424_v28 = vld [vmem:[%s3232_s4 + $0x2a0] sm:$0xff] }
  0x44   : > { %421 = vst [vmem:[%s3237_s20 + $0xd0] sm:$0xff] %v420_v26  ;;  %v426_v29 = vld [vmem:[%s3232_s4 + $0x2b8] sm:$0xff]  ;;  %423 = vst [vmem:[%s3237_s20 + $0xd8] sm:$0xff] %v422_v27  ;;  %v428_v30 = vld [vmem:[%s3232_s4 + $0x2d0] sm:$0xff] }
  0x45   : > { %425 = vst [vmem:[%s3237_s20 + $0xe0] sm:$0xff] %v424_v28  ;;  %427 = vst [vmem:[%s3237_s20 + $0xe8] sm:$0xff] %v426_v29  ;;  %v430_v31 = vld [vmem:[%s3232_s4 + $0x2e8] sm:$0xff] }
  0x46   : > { %429 = vst [vmem:[%s3237_s20 + $0xf0] sm:$0xff] %v428_v30  ;;  %431 = vst [vmem:[%s3237_s20 + $0xf8] sm:$0xff] %v430_v31 }
  0x47 PF: > { %437 = sbr.rel (!%p3196_p6) target bundleno = 102 (0x66), region = 62  ;;  %s439_s16 = sand.u32 (%p3196_p6), 1, %s3023_s27  }
  0x48   : > { %s2574_s23 = sshll.u32 (%p3196_p6), %s3047_s10, 7  ;;  %s2473_s6 = sshll.u32 (%p3196_p6), %s439_s16, 7 }
  0x49   : > { %s444_s7 = sadd.s32 (%p3196_p6), %s3051_s11, %s2574_s23  ;;  %s3828_s1 = sld [smem:[#allocation13_spill]] (%p3196_p6) }
  0x4a   : > { %s2476_s18 = sshll.u32 (%p3196_p6), %s444_s7, 2  ;;  %s3313_s4 = scalar_lea.vmem (%p3196_p6), [#allocation4], %s2473_s6 }
  0x4f   : > { %s3308_s15 = scalar_lea.vmem %s3828_s1, %s2476_s18 }
  0x50   : > { %v462_v32 = vld [vmem:[%s3308_s15] sm:$0xf]  ;;  %v464_v33 = vld [vmem:[%s3308_s15 + $0x10] sm:$0xf] }
  0x51   : > { %v466_v34 = vld [vmem:[%s3308_s15 + $0x20] sm:$0xf]  ;;  %463 = vst [vmem:[%s3313_s4] sm:$0xf] %v462_v32  ;;  %465 = vst [vmem:[%s3313_s4 + $0x4] sm:$0xf] %v464_v33 }
  0x52   : > { %467 = vst [vmem:[%s3313_s4 + $0x8] sm:$0xf] %v466_v34  ;;  %v468_v35 = vld [vmem:[%s3308_s15 + $0x30] sm:$0xf]  ;;  %v470_v36 = vld [vmem:[%s3308_s15 + $0x40] sm:$0xf] }
  0x53   : > { %v472_v37 = vld [vmem:[%s3308_s15 + $0x50] sm:$0xf]  ;;  %469 = vst [vmem:[%s3313_s4 + $0xc] sm:$0xf] %v468_v35  ;;  %471 = vst [vmem:[%s3313_s4 + $0x10] sm:$0xf] %v470_v36 }
  0x54   : > { %473 = vst [vmem:[%s3313_s4 + $0x14] sm:$0xf] %v472_v37  ;;  %v474_v38 = vld [vmem:[%s3308_s15 + $0x60] sm:$0xf]  ;;  %v476_v39 = vld [vmem:[%s3308_s15 + $0x70] sm:$0xf] }
  0x55   : > { %v478_v40 = vld [vmem:[%s3308_s15 + $0x80] sm:$0xf]  ;;  %475 = vst [vmem:[%s3313_s4 + $0x18] sm:$0xf] %v474_v38  ;;  %477 = vst [vmem:[%s3313_s4 + $0x1c] sm:$0xf] %v476_v39 }
  0x56   : > { %479 = vst [vmem:[%s3313_s4 + $0x20] sm:$0xf] %v478_v40  ;;  %v480_v41 = vld [vmem:[%s3308_s15 + $0x90] sm:$0xf]  ;;  %v482_v42 = vld [vmem:[%s3308_s15 + $0xa0] sm:$0xf] }
  0x57   : > { %v484_v43 = vld [vmem:[%s3308_s15 + $0xb0] sm:$0xf]  ;;  %481 = vst [vmem:[%s3313_s4 + $0x24] sm:$0xf] %v480_v41  ;;  %483 = vst [vmem:[%s3313_s4 + $0x28] sm:$0xf] %v482_v42 }
  0x58   : > { %485 = vst [vmem:[%s3313_s4 + $0x2c] sm:$0xf] %v484_v43  ;;  %v486_v44 = vld [vmem:[%s3308_s15 + $0xc0] sm:$0xf]  ;;  %v488_v45 = vld [vmem:[%s3308_s15 + $0xd0] sm:$0xf] }
  0x59   : > { %v490_v46 = vld [vmem:[%s3308_s15 + $0xe0] sm:$0xf]  ;;  %487 = vst [vmem:[%s3313_s4 + $0x30] sm:$0xf] %v486_v44  ;;  %489 = vst [vmem:[%s3313_s4 + $0x34] sm:$0xf] %v488_v45 }
  0x5a   : > { %491 = vst [vmem:[%s3313_s4 + $0x38] sm:$0xf] %v490_v46  ;;  %v492_v47 = vld [vmem:[%s3308_s15 + $0xf0] sm:$0xf]  ;;  %v494_v48 = vld [vmem:[%s3308_s15 + $0x100] sm:$0xf] }
  0x5b   : > { %v496_v49 = vld [vmem:[%s3308_s15 + $0x110] sm:$0xf]  ;;  %493 = vst [vmem:[%s3313_s4 + $0x3c] sm:$0xf] %v492_v47  ;;  %495 = vst [vmem:[%s3313_s4 + $0x40] sm:$0xf] %v494_v48 }
  0x5c   : > { %497 = vst [vmem:[%s3313_s4 + $0x44] sm:$0xf] %v496_v49  ;;  %v498_v50 = vld [vmem:[%s3308_s15 + $0x120] sm:$0xf]  ;;  %v500_v51 = vld [vmem:[%s3308_s15 + $0x130] sm:$0xf] }
  0x5d   : > { %v502_v52 = vld [vmem:[%s3308_s15 + $0x140] sm:$0xf]  ;;  %499 = vst [vmem:[%s3313_s4 + $0x48] sm:$0xf] %v498_v50  ;;  %501 = vst [vmem:[%s3313_s4 + $0x4c] sm:$0xf] %v500_v51 }
  0x5e   : > { %503 = vst [vmem:[%s3313_s4 + $0x50] sm:$0xf] %v502_v52  ;;  %v504_v53 = vld [vmem:[%s3308_s15 + $0x150] sm:$0xf]  ;;  %v506_v54 = vld [vmem:[%s3308_s15 + $0x160] sm:$0xf] }
  0x5f   : > { %v508_v55 = vld [vmem:[%s3308_s15 + $0x170] sm:$0xf]  ;;  %505 = vst [vmem:[%s3313_s4 + $0x54] sm:$0xf] %v504_v53  ;;  %507 = vst [vmem:[%s3313_s4 + $0x58] sm:$0xf] %v506_v54 }
  0x60   : > { %509 = vst [vmem:[%s3313_s4 + $0x5c] sm:$0xf] %v508_v55  ;;  %v510_v56 = vld [vmem:[%s3308_s15 + $0x180] sm:$0xf]  ;;  %v512_v57 = vld [vmem:[%s3308_s15 + $0x190] sm:$0xf] }
  0x61   : > { %v514_v58 = vld [vmem:[%s3308_s15 + $0x1a0] sm:$0xf]  ;;  %511 = vst [vmem:[%s3313_s4 + $0x60] sm:$0xf] %v510_v56  ;;  %513 = vst [vmem:[%s3313_s4 + $0x64] sm:$0xf] %v512_v57 }
  0x62   : > { %515 = vst [vmem:[%s3313_s4 + $0x68] sm:$0xf] %v514_v58  ;;  %v516_v59 = vld [vmem:[%s3308_s15 + $0x1b0] sm:$0xf]  ;;  %v518_v60 = vld [vmem:[%s3308_s15 + $0x1c0] sm:$0xf] }
  0x63   : > { %v520_v61 = vld [vmem:[%s3308_s15 + $0x1d0] sm:$0xf]  ;;  %517 = vst [vmem:[%s3313_s4 + $0x6c] sm:$0xf] %v516_v59  ;;  %519 = vst [vmem:[%s3313_s4 + $0x70] sm:$0xf] %v518_v60 }
  0x64   : > { %521 = vst [vmem:[%s3313_s4 + $0x74] sm:$0xf] %v520_v61  ;;  %v522_v62 = vld [vmem:[%s3308_s15 + $0x1e0] sm:$0xf]  ;;  %v524_v63 = vld [vmem:[%s3308_s15 + $0x1f0] sm:$0xf] }
  0x65   : > { %523 = vst [vmem:[%s3313_s4 + $0x78] sm:$0xf] %v522_v62  ;;  %525 = vst [vmem:[%s3313_s4 + $0x7c] sm:$0xf] %v524_v63 }
  0x66 PF: > { %612 = sbr.rel (!%p3212_p11) target bundleno = 133 (0x85), region = 103  ;;  %s614_s22 = sand.u32 (%p3212_p11), 1, %s3015_s25  }
  0x67   : > { %s2575_s14 = sshll.u32 (%p3212_p11), %s3055_s12, 9  ;;  %s2477_s17 = sshll.u32 (%p3212_p11), %s614_s22, 7 }
  0x68   : > { %s3829_s2 = sld [smem:[#allocation14_spill]] (%p3212_p11)  ;;  %s3387_s5 = scalar_lea.vmem (%p3212_p11), [#allocation5], %s2477_s17 }
  0x6e   : > { %s3383_s23 = scalar_lea.vmem %s3829_s2, %s2575_s14 }
  0x6f   : > { %v2480_v0 = vld [vmem:[%s3383_s23 + $0xc] sm:$0xf]  ;;  %v2481_v1 = vld [vmem:[%s3383_s23 + $0x1c] sm:$0xf] }
  0x70   : > { %638 = vst [vmem:[%s3387_s5] sm:$0xf] %v2480_v0  ;;  %640 = vst [vmem:[%s3387_s5 + $0x4] sm:$0xf] %v2481_v1  ;;  %v2482_v2 = vld [vmem:[%s3383_s23 + $0x2c] sm:$0xf] }
  0x71   : > { %v2483_v3 = vld [vmem:[%s3383_s23 + $0x3c] sm:$0xf]  ;;  %v2484_v4 = vld [vmem:[%s3383_s23 + $0x4c] sm:$0xf]  ;;  %642 = vst [vmem:[%s3387_s5 + $0x8] sm:$0xf] %v2482_v2 }
  0x72   : > { %644 = vst [vmem:[%s3387_s5 + $0xc] sm:$0xf] %v2483_v3  ;;  %646 = vst [vmem:[%s3387_s5 + $0x10] sm:$0xf] %v2484_v4  ;;  %v2485_v5 = vld [vmem:[%s3383_s23 + $0x5c] sm:$0xf] }
  0x73   : > { %v2486_v6 = vld [vmem:[%s3383_s23 + $0x6c] sm:$0xf]  ;;  %v2487_v7 = vld [vmem:[%s3383_s23 + $0x7c] sm:$0xf]  ;;  %648 = vst [vmem:[%s3387_s5 + $0x14] sm:$0xf] %v2485_v5 }
  0x74   : > { %650 = vst [vmem:[%s3387_s5 + $0x18] sm:$0xf] %v2486_v6  ;;  %652 = vst [vmem:[%s3387_s5 + $0x1c] sm:$0xf] %v2487_v7  ;;  %v2488_v8 = vld [vmem:[%s3383_s23 + $0x8c] sm:$0xf] }
  0x75   : > { %v2489_v9 = vld [vmem:[%s3383_s23 + $0x9c] sm:$0xf]  ;;  %v2490_v10 = vld [vmem:[%s3383_s23 + $0xac] sm:$0xf]  ;;  %654 = vst [vmem:[%s3387_s5 + $0x20] sm:$0xf] %v2488_v8 }
  0x76   : > { %656 = vst [vmem:[%s3387_s5 + $0x24] sm:$0xf] %v2489_v9  ;;  %658 = vst [vmem:[%s3387_s5 + $0x28] sm:$0xf] %v2490_v10  ;;  %v2491_v11 = vld [vmem:[%s3383_s23 + $0xbc] sm:$0xf] }
  0x77   : > { %v2492_v12 = vld [vmem:[%s3383_s23 + $0xcc] sm:$0xf]  ;;  %v2493_v13 = vld [vmem:[%s3383_s23 + $0xdc] sm:$0xf]  ;;  %660 = vst [vmem:[%s3387_s5 + $0x2c] sm:$0xf] %v2491_v11 }
  0x78   : > { %662 = vst [vmem:[%s3387_s5 + $0x30] sm:$0xf] %v2492_v12  ;;  %664 = vst [vmem:[%s3387_s5 + $0x34] sm:$0xf] %v2493_v13  ;;  %v2494_v14 = vld [vmem:[%s3383_s23 + $0xec] sm:$0xf] }
  0x79   : > { %v2495_v15 = vld [vmem:[%s3383_s23 + $0xfc] sm:$0xf]  ;;  %v2496_v16 = vld [vmem:[%s3383_s23 + $0x10c] sm:$0xf]  ;;  %666 = vst [vmem:[%s3387_s5 + $0x38] sm:$0xf] %v2494_v14 }
  0x7a   : > { %668 = vst [vmem:[%s3387_s5 + $0x3c] sm:$0xf] %v2495_v15  ;;  %670 = vst [vmem:[%s3387_s5 + $0x40] sm:$0xf] %v2496_v16  ;;  %v2497_v17 = vld [vmem:[%s3383_s23 + $0x11c] sm:$0xf] }
  0x7b   : > { %v2498_v18 = vld [vmem:[%s3383_s23 + $0x12c] sm:$0xf]  ;;  %v2499_v19 = vld [vmem:[%s3383_s23 + $0x13c] sm:$0xf]  ;;  %672 = vst [vmem:[%s3387_s5 + $0x44] sm:$0xf] %v2497_v17 }
  0x7c   : > { %674 = vst [vmem:[%s3387_s5 + $0x48] sm:$0xf] %v2498_v18  ;;  %676 = vst [vmem:[%s3387_s5 + $0x4c] sm:$0xf] %v2499_v19  ;;  %v2500_v20 = vld [vmem:[%s3383_s23 + $0x14c] sm:$0xf] }
  0x7d   : > { %v2501_v21 = vld [vmem:[%s3383_s23 + $0x15c] sm:$0xf]  ;;  %v2502_v22 = vld [vmem:[%s3383_s23 + $0x16c] sm:$0xf]  ;;  %678 = vst [vmem:[%s3387_s5 + $0x50] sm:$0xf] %v2500_v20 }
  0x7e   : > { %680 = vst [vmem:[%s3387_s5 + $0x54] sm:$0xf] %v2501_v21  ;;  %682 = vst [vmem:[%s3387_s5 + $0x58] sm:$0xf] %v2502_v22  ;;  %v2503_v23 = vld [vmem:[%s3383_s23 + $0x17c] sm:$0xf] }
  0x7f   : > { %v2504_v24 = vld [vmem:[%s3383_s23 + $0x18c] sm:$0xf]  ;;  %v2505_v25 = vld [vmem:[%s3383_s23 + $0x19c] sm:$0xf]  ;;  %684 = vst [vmem:[%s3387_s5 + $0x5c] sm:$0xf] %v2503_v23 }
  0x80   : > { %686 = vst [vmem:[%s3387_s5 + $0x60] sm:$0xf] %v2504_v24  ;;  %688 = vst [vmem:[%s3387_s5 + $0x64] sm:$0xf] %v2505_v25  ;;  %v2506_v26 = vld [vmem:[%s3383_s23 + $0x1ac] sm:$0xf] }
  0x81   : > { %v2507_v27 = vld [vmem:[%s3383_s23 + $0x1bc] sm:$0xf]  ;;  %v2508_v28 = vld [vmem:[%s3383_s23 + $0x1cc] sm:$0xf]  ;;  %690 = vst [vmem:[%s3387_s5 + $0x68] sm:$0xf] %v2506_v26 }
  0x82   : > { %692 = vst [vmem:[%s3387_s5 + $0x6c] sm:$0xf] %v2507_v27  ;;  %694 = vst [vmem:[%s3387_s5 + $0x70] sm:$0xf] %v2508_v28  ;;  %v2509_v29 = vld [vmem:[%s3383_s23 + $0x1dc] sm:$0xf] }
  0x83   : > { %v2510_v30 = vld [vmem:[%s3383_s23 + $0x1ec] sm:$0xf]  ;;  %v2511_v31 = vld [vmem:[%s3383_s23 + $0x1fc] sm:$0xf]  ;;  %696 = vst [vmem:[%s3387_s5 + $0x74] sm:$0xf] %v2509_v29 }
  0x84   : > { %698 = vst [vmem:[%s3387_s5 + $0x78] sm:$0xf] %v2510_v30  ;;  %700 = vst [vmem:[%s3387_s5 + $0x7c] sm:$0xf] %v2511_v31 }
  0x85 PF: > { %p2512_p0 = scmp.ge.s32.totalorder %s3059_s13, 1  ;;  %p804_p1 = scmp.lt.s32.totalorder %s3059_s13, 28 }
  0x87   : > { %p805_p2 = pnand %p2512_p0, %p804_p1 }
  0x88   : > { %s811_s6 = sand.u32 (!%p805_p2), 1, %s3027_s28   ;;  %s818_s7 = sand.u32 (!%p805_p2), 1, %s3019_s26  }
  0x89   : > { %808 = sbr.rel (%p805_p2) target bundleno = 726 (0x2d6), region = 152  ;;  %s2513_s18 = sshll.u32 (!%p805_p2), %s811_s6, 8 }
  0x8a   : > { %s2514_s19 = sshll.u32 (!%p805_p2), %s818_s7, 7  ;;  %s825_s21 = sand.u32 (!%p805_p2), 1, %s3011_s24  }
  0x8b   : > { %s2516_s15 = sshll.u32 (!%p805_p2), %s3043_s9, 5  ;;  %s2515_s4 = sshll.u32 (!%p805_p2), %s825_s21, 7 }
  0x8c   : > { %p883_p3 = scmp.lt.s32.totalorder (!%p805_p2), %s2516_s15, 95  ;;  %p900_p4 = scmp.lt.s32.totalorder (!%p805_p2), %s3043_s9, 2 }
  0x8d   : > { %p905_p5 = scmp.eq.s32.totalorder (!%p805_p2), %s3039_s8, 0  ;;  %s3830_s20 = sld [smem:[#allocation15_spill]] (!%p805_p2) }
  0x8e   : > { %s3831_s23 = sld [smem:[#allocation17_spill]] (!%p805_p2)  ;;  %s3832_s7 = sld [smem:[#allocation18_spill]] (!%p805_p2) }
  0x8f   : > { %p906_p6 = scmp.eq.s32.totalorder (!%p805_p2), %s3035_s30, 0  ;;  %p909_p7 = scmp.eq.s32.totalorder (!%p805_p2), %s3039_s8, 2 }
  0x90   : > { %s3866_s15 = smov (!%p883_p3, %s2516_s15), 95  ;;  %s3868_s9 = smov (!%p900_p4, %s3043_s9), 2 }
  0x91   : > { %s2517_s22 = sshll.u32 %s3866_s15, 3  ;;  %s2522_s0 = sshll.u32 %s3868_s9, 3 }
  0x92   : > { %s3833_s15 = sld [smem:[#allocation19_spill]]  ;;  %p910_p8 = scmp.eq.s32.totalorder %s3035_s30, 2 }
  0x93   : > { %s3463_s16 = scalar_lea.vmem %s3830_s20, %s2517_s22  ;;  %p907_p9 = pnand %p906_p6, %p905_p5 }
  0x94   : > { %s3468_s5 = scalar_lea.vmem %s3831_s23, %s2517_s22  ;;  %s3473_s21 = scalar_lea.vmem %s3832_s7, %s2517_s22  ;;  %v3061_v32 = vmov (!%p907_p9), 0.0  }
  0x95   : > { %p3483_p10 = pnand %p910_p8, %p909_p7  ;;  %s3487_s17 = scalar_lea.vmem [#allocation3], %s2513_s18  ;;  %915 = vst [vmem:[#allocation2] sm:$0xff] (!%p907_p9), %v3061_v32  ;;  %916 = vst [vmem:[#allocation2 + $0x8] sm:$0xff] (!%p907_p9), %v3061_v32 }
  0x96   : > { %s3489_s20 = scalar_lea.vmem [#allocation4], %s2514_s19  ;;  %s3491_s22 = scalar_lea.vmem [#allocation5], %s2515_s4  ;;  %917 = vst [vmem:[#allocation2 + $0x10] sm:$0xff] (!%p907_p9), %v3061_v32  ;;  %918 = vst [vmem:[#allocation2 + $0x18] sm:$0xff] (!%p907_p9), %v3061_v32 }
  0x97   : > { %914 = sbr.rel (%p907_p9) target bundleno = 165 (0xa5), region = 168  ;;  %919 = vst [vmem:[#allocation2 + $0x20] sm:$0xff] (!%p907_p9), %v3061_v32  ;;  %920 = vst [vmem:[#allocation2 + $0x28] sm:$0xff] (!%p907_p9), %v3061_v32 }
  0x98   : > { %s3478_s12 = scalar_lea.vmem %s3833_s15, %s2522_s0  ;;  %921 = vst [vmem:[#allocation2 + $0x30] sm:$0xff] (!%p907_p9), %v3061_v32  ;;  %922 = vst [vmem:[#allocation2 + $0x38] sm:$0xff] (!%p907_p9), %v3061_v32 }
  0x99   : > { %923 = vst [vmem:[#allocation2 + $0x40] sm:$0xff] (!%p907_p9), %v3061_v32  ;;  %924 = vst [vmem:[#allocation2 + $0x48] sm:$0xff] (!%p907_p9), %v3061_v32 }
  0x9a   : > { %925 = vst [vmem:[#allocation2 + $0x50] sm:$0xff] (!%p907_p9), %v3061_v32  ;;  %926 = vst [vmem:[#allocation2 + $0x58] sm:$0xff] (!%p907_p9), %v3061_v32 }
  0x9b   : > { %927 = vst [vmem:[#allocation2 + $0x60] sm:$0xff] (!%p907_p9), %v3061_v32  ;;  %928 = vst [vmem:[#allocation2 + $0x68] sm:$0xff] (!%p907_p9), %v3061_v32 }
  0x9c   : > { %929 = vst [vmem:[#allocation2 + $0x70] sm:$0xff] (!%p907_p9), %v3061_v32  ;;  %930 = vst [vmem:[#allocation2 + $0x78] sm:$0xff] (!%p907_p9), %v3061_v32 }
  0x9d   : > { %931 = vst [vmem:[#allocation2 + $0x80] sm:$0xff] (!%p907_p9), %v3061_v32  ;;  %932 = vst [vmem:[#allocation2 + $0x88] sm:$0xff] (!%p907_p9), %v3061_v32 }
  0x9e   : > { %933 = vst [vmem:[#allocation2 + $0x90] sm:$0xff] %v3061_v32  ;;  %934 = vst [vmem:[#allocation2 + $0x98] sm:$0xff] %v3061_v32 }
  0x9f   : > { %935 = vst [vmem:[#allocation2 + $0xa0] sm:$0xff] %v3061_v32  ;;  %936 = vst [vmem:[#allocation2 + $0xa8] sm:$0xff] %v3061_v32 }
  0xa0   : > { %937 = vst [vmem:[#allocation2 + $0xb0] sm:$0xff] %v3061_v32  ;;  %938 = vst [vmem:[#allocation2 + $0xb8] sm:$0xff] %v3061_v32 }
  0xa1   : > { %939 = vst [vmem:[#allocation2 + $0xc0] sm:$0xff] %v3061_v32  ;;  %940 = vst [vmem:[#allocation2 + $0xc8] sm:$0xff] %v3061_v32 }
  0xa2   : > { %941 = vst [vmem:[#allocation2 + $0xd0] sm:$0xff] %v3061_v32  ;;  %942 = vst [vmem:[#allocation2 + $0xd8] sm:$0xff] %v3061_v32 }
  0xa3   : > { %943 = vst [vmem:[#allocation2 + $0xe0] sm:$0xff] %v3061_v32  ;;  %944 = vst [vmem:[#allocation2 + $0xe8] sm:$0xff] %v3061_v32 }
  0xa4   : > { %945 = vst [vmem:[#allocation2 + $0xf0] sm:$0xff] %v3061_v32  ;;  %946 = vst [vmem:[#allocation2 + $0xf8] sm:$0xff] %v3061_v32 }
  0xa5 PF: > { %v2891_v33 = vld [vmem:[%s3489_s20 + $0x40] sm:$0xff]   ;;  %v2893_v35 = vld [vmem:[%s3489_s20 + $0x48] sm:$0xff]   ;;  %v2895_v37 = vld [vmem:[%s3489_s20 + $0x50] sm:$0xff]   ;;  %s3835_s2 = sld [smem:[#allocation16_spill]] (!%p3483_p10)  ;;  %vm2279_vm0 = vcmask (!%p3483_p10), 1040384   ;;  %vm2281_vm1 = vcmask (!%p3483_p10), 1041408  }
  0xa6   : > { %v2892_v34 = vld [vmem:[%s3489_s20] sm:$0xff]   ;;  %2655 = vmatprep.subr.bf16.mxu0 %v2891_v33  ;;  %2767 = vmatprep.subr.bf16.mxu1 %v2891_v33  ;;  %v2894_v36 = vld [vmem:[%s3489_s20 + $0x8] sm:$0xff]   ;;  %v2896_v38 = vld [vmem:[%s3489_s20 + $0x10] sm:$0xff]  }
  0xa7   : > { %2656 = vmatpush3.bf16.msra.mxu0 %v2892_v34  ;;  %2775 = vmatpush3.bf16.msra.mxu1 %v2892_v34  ;;  %v2897_v39 = vld [vmem:[%s3489_s20 + $0x58] sm:$0xff]   ;;  %v2899_v41 = vld [vmem:[%s3489_s20 + $0x60] sm:$0xff]   ;;  %v2901_v43 = vld [vmem:[%s3489_s20 + $0x68] sm:$0xff]  }
  0xa8   : > { %2657 = vmatprep.subr.bf16.mxu0 %v2893_v35  ;;  %2768 = vmatprep.subr.bf16.mxu1 %v2893_v35  ;;  %v2898_v40 = vld [vmem:[%s3489_s20 + $0x18] sm:$0xff]   ;;  %v2900_v42 = vld [vmem:[%s3489_s20 + $0x20] sm:$0xff]   ;;  %v2902_v46 = vld [vmem:[%s3489_s20 + $0x28] sm:$0xff]  }
  0xa9   : > { %v2909_v44 = vld [vmem:[%s3487_s17 + $0x4] ss:$8 sps:$4 sm:$0xff]   ;;  %v2903_v47 = vld [vmem:[%s3489_s20 + $0x70] sm:$0xff]   ;;  %v2905_v49 = vld [vmem:[%s3489_s20 + $0x78] sm:$0xff]  }
  0xaa   : > { %v2912_v45 = vld [vmem:[%s3487_s17 + $0x84] ss:$8 sps:$4 sm:$0xff]   ;;  %1331 = vmatprep.mubr.bf16.mxu0 %v2909_v44  ;;  %v2904_v48 = vld [vmem:[%s3489_s20 + $0x30] sm:$0xff]   ;;  %v2906_v50 = vld [vmem:[%s3489_s20 + $0x38] sm:$0xff]  }
  0xab   : > { %2658 = vmatpush3.bf16.msra.mxu0 %v2894_v36  ;;  %2776 = vmatpush3.bf16.msra.mxu1 %v2894_v36  ;;  %v2907_v51 = vld [vmem:[%s3487_s17] ss:$8 sps:$4 sm:$0xff]   ;;  %v2913_v53 = vld [vmem:[%s3487_s17 + $0x14] ss:$8 sps:$4 sm:$0xff]   ;;  %v2917_v55 = vld [vmem:[%s3487_s17 + $0x10] ss:$8 sps:$4 sm:$0xff]  }
  0xac   : > { %2659 = vmatprep.subr.bf16.mxu0 %v2895_v37  ;;  %2769 = vmatprep.subr.bf16.mxu1 %v2895_v37  ;;  %v2910_v52 = vld [vmem:[%s3487_s17 + $0x80] ss:$8 sps:$4 sm:$0xff]   ;;  %v2915_v54 = vld [vmem:[%s3487_s17 + $0x94] ss:$8 sps:$4 sm:$0xff]   ;;  %v2918_v56 = vld [vmem:[%s3487_s17 + $0x90] ss:$8 sps:$4 sm:$0xff]  }
  0xad   : > { %1395 = vmatprep.mubr.bf16.mxu1 %v2912_v45  ;;  %v2919_v57 = vld [vmem:[%s3487_s17 + $0x24] ss:$8 sps:$4 sm:$0xff]   ;;  %v2923_v59 = vld [vmem:[%s3487_s17 + $0x20] ss:$8 sps:$4 sm:$0xff]   ;;  %v2925_v61 = vld [vmem:[%s3487_s17 + $0x34] ss:$8 sps:$4 sm:$0xff]  }
  0xae   : > { %v2921_v58 = vld [vmem:[%s3487_s17 + $0xa4] ss:$8 sps:$4 sm:$0xff]   ;;  %v2924_v60 = vld [vmem:[%s3487_s17 + $0xa0] ss:$8 sps:$4 sm:$0xff]   ;;  %v2927_v62 = vld [vmem:[%s3487_s17 + $0xb4] ss:$8 sps:$4 sm:$0xff]  }
  0xaf   : > { %2660 = vmatpush3.bf16.msra.mxu0 %v2896_v38  ;;  %2777 = vmatpush3.bf16.msra.mxu1 %v2896_v38  ;;  %v2929_v63 = vld [vmem:[%s3487_s17 + $0x30] ss:$8 sps:$4 sm:$0xff]   ;;  %v2931_v1 = vld [vmem:[%s3487_s17 + $0x44] ss:$8 sps:$4 sm:$0xff]   ;;  %v2935_v3 = vld [vmem:[%s3487_s17 + $0x40] ss:$8 sps:$4 sm:$0xff]  }
  0xb0   : > { %2661 = vmatprep.subr.bf16.mxu0 %v2897_v39  ;;  %2770 = vmatprep.subr.bf16.mxu1 %v2897_v39  ;;  %v2930_v0 = vld [vmem:[%s3487_s17 + $0xb0] ss:$8 sps:$4 sm:$0xff]   ;;  %v2933_v2 = vld [vmem:[%s3487_s17 + $0xc4] ss:$8 sps:$4 sm:$0xff]   ;;  %v2936_v4 = vld [vmem:[%s3487_s17 + $0xc0] ss:$8 sps:$4 sm:$0xff]  }
  0xb1   : > { %v2937_v5 = vld [vmem:[%s3487_s17 + $0x54] ss:$8 sps:$4 sm:$0xff]   ;;  %v2941_v7 = vld [vmem:[%s3487_s17 + $0x50] ss:$8 sps:$4 sm:$0xff]   ;;  %v2943_v9 = vld [vmem:[%s3487_s17 + $0x64] ss:$8 sps:$4 sm:$0xff]  }
  0xb2   : > { %v2939_v6 = vld [vmem:[%s3487_s17 + $0xd4] ss:$8 sps:$4 sm:$0xff]   ;;  %v2942_v8 = vld [vmem:[%s3487_s17 + $0xd0] ss:$8 sps:$4 sm:$0xff]   ;;  %v2945_v10 = vld [vmem:[%s3487_s17 + $0xe4] ss:$8 sps:$4 sm:$0xff]  }
  0xb3   : > { %2662 = vmatpush3.bf16.msra.mxu0 %v2898_v40  ;;  %2778 = vmatpush3.bf16.msra.mxu1 %v2898_v40  ;;  %v2947_v11 = vld [vmem:[%s3487_s17 + $0x60] ss:$8 sps:$4 sm:$0xff]   ;;  %v2949_v13 = vld [vmem:[%s3487_s17 + $0x74] ss:$8 sps:$4 sm:$0xff]   ;;  %v2953_v15 = vld [vmem:[%s3487_s17 + $0x70] ss:$8 sps:$4 sm:$0xff]  }
  0xb4   : > { %2663 = vmatprep.subr.bf16.mxu0 %v2899_v41  ;;  %2771 = vmatprep.subr.bf16.mxu1 %v2899_v41  ;;  %v2948_v12 = vld [vmem:[%s3487_s17 + $0xe0] ss:$8 sps:$4 sm:$0xff]   ;;  %v2951_v14 = vld [vmem:[%s3487_s17 + $0xf4] ss:$8 sps:$4 sm:$0xff]   ;;  %v2954_v16 = vld [vmem:[%s3487_s17 + $0xf0] ss:$8 sps:$4 sm:$0xff]  }
  0xb5   : > { %v947_v19 = vld [vmem:[#allocation2] sm:$0xff]  ;;  %v948_v27 = vld [vmem:[#allocation2 + $0x8] sm:$0xff]  ;;  %v949_v39 = vld [vmem:[#allocation2 + $0x10] sm:$0xff] }
  0xb6   : > { %v963_v21 = vld [vmem:[#allocation2 + $0x80] sm:$0xff]  ;;  %v964_v29 = vld [vmem:[#allocation2 + $0x88] sm:$0xff]  ;;  %v965_v41 = vld [vmem:[#allocation2 + $0x90] sm:$0xff] }
  0xb7   : > { %2664 = vmatpush3.bf16.msra.mxu0 %v2900_v42  ;;  %2779 = vmatpush3.bf16.msra.mxu1 %v2900_v42 }
  0xb8   : > { %2665 = vmatprep.subr.bf16.mxu0 %v2901_v43  ;;  %2772 = vmatprep.subr.bf16.mxu1 %v2901_v43 }
  0xbb   : > { %2666 = vmatpush3.bf16.msra.mxu0 %v2902_v46  ;;  %2780 = vmatpush3.bf16.msra.mxu1 %v2902_v46 }
  0xbc   : > { %2667 = vmatprep.subr.bf16.mxu0 %v2903_v47  ;;  %2773 = vmatprep.subr.bf16.mxu1 %v2903_v47  ;;  %v950_v47 = vld [vmem:[#allocation2 + $0x18] sm:$0xff] }
  0xbf   : > { %2668 = vmatpush3.bf16.msra.mxu0 %v2904_v48  ;;  %2781 = vmatpush3.bf16.msra.mxu1 %v2904_v48 }
  0xc0   : > { %2669 = vmatprep.subr.bf16.mxu0 %v2905_v49  ;;  %2774 = vmatprep.subr.bf16.mxu1 %v2905_v49  ;;  %v966_v49 = vld [vmem:[#allocation2 + $0x98] sm:$0xff] }
  0xc3   : > { %2670 = vmatpush3.bf16.msra.mxu0 %v2906_v50  ;;  %2782 = vmatpush3.bf16.msra.mxu1 %v2906_v50 }
  0xc6   : > { %1332 = vmatmul.mubr.bf16.vlgmr.msra.gmra.mrb[0].mxu0 %v2907_v51  ;;  %1396 = vmatmul.mubr.bf16.vlgmr.msra.gmra.mrb[0].mxu1 %v2910_v52 }
  0xc7   : > { %1339 = vmatprep.mubr.bf16.mxu0 %v2913_v53  ;;  %1403 = vmatprep.mubr.bf16.mxu1 %v2915_v54 }
  0xce   : > { %1340 = vmatmul.mubr.bf16.gmra.mrb[4].mxu0 %v2917_v55  ;;  %1404 = vmatmul.mubr.bf16.gmra.mrb[4].mxu1 %v2918_v56 }
  0xcf   : > { %1347 = vmatprep.mubr.bf16.mxu0 %v2919_v57  ;;  %1411 = vmatprep.mubr.bf16.mxu1 %v2921_v58 }
  0xd6   : > { %1348 = vmatmul.mubr.bf16.gmra.mrb[8].mxu0 %v2923_v59  ;;  %1412 = vmatmul.mubr.bf16.gmra.mrb[8].mxu1 %v2924_v60  ;;  %v951_v59 = vld [vmem:[#allocation2 + $0x20] sm:$0xff] }
  0xd7   : > { %1355 = vmatprep.mubr.bf16.mxu0 %v2925_v61  ;;  %1419 = vmatprep.mubr.bf16.mxu1 %v2927_v62  ;;  %v967_v61 = vld [vmem:[#allocation2 + $0xa0] sm:$0xff] }
  0xde   : > { %1356 = vmatmul.mubr.bf16.gmra.mrb[12].mxu0 %v2929_v63  ;;  %1420 = vmatmul.mubr.bf16.gmra.mrb[12].mxu1 %v2930_v0 }
  0xdf   : > { %1363 = vmatprep.mubr.bf16.mxu0 %v2931_v1  ;;  %1427 = vmatprep.mubr.bf16.mxu1 %v2933_v2 }
  0xe6   : > { %1364 = vmatmul.mubr.bf16.gmra.mrb[16].mxu0 %v2935_v3  ;;  %1428 = vmatmul.mubr.bf16.gmra.mrb[16].mxu1 %v2936_v4  ;;  %v952_v3 = vld [vmem:[#allocation2 + $0x28] sm:$0xff] }
  0xe7   : > { %1371 = vmatprep.mubr.bf16.mxu0 %v2937_v5  ;;  %1435 = vmatprep.mubr.bf16.mxu1 %v2939_v6  ;;  %v968_v5 = vld [vmem:[#allocation2 + $0xa8] sm:$0xff] }
  0xee   : > { %1372 = vmatmul.mubr.bf16.gmra.mrb[20].mxu0 %v2941_v7  ;;  %1436 = vmatmul.mubr.bf16.gmra.mrb[20].mxu1 %v2942_v8 }
  0xef   : > { %1379 = vmatprep.mubr.bf16.mxu0 %v2943_v9  ;;  %1443 = vmatprep.mubr.bf16.mxu1 %v2945_v10 }
  0xf6   : > { %1380 = vmatmul.mubr.bf16.gmra.mrb[24].mxu0 %v2947_v11  ;;  %1444 = vmatmul.mubr.bf16.gmra.mrb[24].mxu1 %v2948_v12 }
  0xf7   : > { %1387 = vmatprep.mubr.bf16.mxu0 %v2949_v13  ;;  %1451 = vmatprep.mubr.bf16.mxu1 %v2951_v14 }
  0xfe   : > { %1388 = vmatmul.mubr.bf16.gmra.mrb[28].mxu0 %v2953_v15  ;;  %1452 = vmatmul.mubr.bf16.gmra.mrb[28].mxu1 %v2954_v16  ;;  %v953_v15 = vld [vmem:[#allocation2 + $0x30] sm:$0xff] }
 0x199   : > { %v2671_v17 = vpop.f32.mrb[0].mxu0  ;;  %v2719_v18 = vpop.f32.mrb[0].mxu1 }
 0x19a   : > { %v2672_v20 = vpop.f32.mrb[1].mxu0  ;;  %v2720_v22 = vpop.f32.mrb[1].mxu1 }
 0x19b   : > { %v2673_v23 = vadd.f32 %v2672_v20, %v2671_v17  ;;  %v2721_v24 = vadd.f32 %v2720_v22, %v2719_v18  ;;  %v2674_v25 = vpop.f32.mrb[2].mxu0  ;;  %v2722_v26 = vpop.f32.mrb[2].mxu1  ;;  %v969_v17 = vld [vmem:[#allocation2 + $0xb0] sm:$0xff] }
 0x19c   : > { %v2675_v28 = vpop.f32.mrb[3].mxu0  ;;  %v2723_v30 = vpop.f32.mrb[3].mxu1 }
 0x19d   : > { %v1460_v31 = vadd.f32 %v2673_v23, %v947_v19  ;;  %v1476_v32 = vadd.f32 %v2721_v24, %v963_v21  ;;  %v2676_v33 = vadd.f32 %v2675_v28, %v2674_v25  ;;  %v2724_v34 = vadd.f32 %v2723_v30, %v2722_v26  ;;  %v954_v23 = vld [vmem:[#allocation2 + $0x38] sm:$0xff] }
 0x19e   : > { %v970_v25 = vld [vmem:[#allocation2 + $0xb8] sm:$0xff] }
 0x19f   : > { %1492 = vst [vmem:[#allocation2] sm:$0xff] %v1460_v31  ;;  %1508 = vst [vmem:[#allocation2 + $0x80] sm:$0xff] %v1476_v32  ;;  %v1461_v35 = vadd.f32 %v2676_v33, %v948_v27  ;;  %v1477_v36 = vadd.f32 %v2724_v34, %v964_v29 }
 0x1a1   : > { %1493 = vst [vmem:[#allocation2 + $0x8] sm:$0xff] %v1461_v35  ;;  %1509 = vst [vmem:[#allocation2 + $0x88] sm:$0xff] %v1477_v36  ;;  %v2677_v37 = vpop.f32.mrb[4].mxu0  ;;  %v2725_v38 = vpop.f32.mrb[4].mxu1  ;;  %v955_v35 = vld [vmem:[#allocation2 + $0x40] sm:$0xff] }
 0x1a2   : > { %v2678_v40 = vpop.f32.mrb[5].mxu0  ;;  %v2726_v42 = vpop.f32.mrb[5].mxu1 }
 0x1a3   : > { %v2679_v43 = vadd.f32 %v2678_v40, %v2677_v37  ;;  %v2727_v44 = vadd.f32 %v2726_v42, %v2725_v38  ;;  %v2680_v45 = vpop.f32.mrb[6].mxu0  ;;  %v2728_v46 = vpop.f32.mrb[6].mxu1  ;;  %v971_v37 = vld [vmem:[#allocation2 + $0xc0] sm:$0xff] }
 0x1a4   : > { %v2681_v48 = vpop.f32.mrb[7].mxu0  ;;  %v2729_v50 = vpop.f32.mrb[7].mxu1 }
 0x1a5   : > { %v1462_v51 = vadd.f32 %v2679_v43, %v949_v39  ;;  %v1478_v52 = vadd.f32 %v2727_v44, %v965_v41  ;;  %v2682_v53 = vadd.f32 %v2681_v48, %v2680_v45  ;;  %v2730_v54 = vadd.f32 %v2729_v50, %v2728_v46  ;;  %v956_v43 = vld [vmem:[#allocation2 + $0x48] sm:$0xff] }
 0x1a6   : > { %v972_v45 = vld [vmem:[#allocation2 + $0xc8] sm:$0xff] }
 0x1a7   : > { %1494 = vst [vmem:[#allocation2 + $0x10] sm:$0xff] %v1462_v51  ;;  %1510 = vst [vmem:[#allocation2 + $0x90] sm:$0xff] %v1478_v52  ;;  %v1463_v55 = vadd.f32 %v2682_v53, %v950_v47  ;;  %v1479_v56 = vadd.f32 %v2730_v54, %v966_v49 }
 0x1a9   : > { %1495 = vst [vmem:[#allocation2 + $0x18] sm:$0xff] %v1463_v55  ;;  %1511 = vst [vmem:[#allocation2 + $0x98] sm:$0xff] %v1479_v56  ;;  %v2683_v57 = vpop.f32.mrb[8].mxu0  ;;  %v2731_v58 = vpop.f32.mrb[8].mxu1  ;;  %v957_v55 = vld [vmem:[#allocation2 + $0x50] sm:$0xff] }
 0x1aa   : > { %v2684_v60 = vpop.f32.mrb[9].mxu0  ;;  %v2732_v62 = vpop.f32.mrb[9].mxu1 }
 0x1ab   : > { %v2685_v63 = vadd.f32 %v2684_v60, %v2683_v57  ;;  %v2733_v0 = vadd.f32 %v2732_v62, %v2731_v58  ;;  %v2686_v1 = vpop.f32.mrb[10].mxu0  ;;  %v2734_v2 = vpop.f32.mrb[10].mxu1  ;;  %v973_v57 = vld [vmem:[#allocation2 + $0xd0] sm:$0xff] }
 0x1ac   : > { %v2687_v4 = vpop.f32.mrb[11].mxu0  ;;  %v2735_v6 = vpop.f32.mrb[11].mxu1 }
 0x1ad   : > { %v1464_v7 = vadd.f32 %v2685_v63, %v951_v59  ;;  %v1480_v8 = vadd.f32 %v2733_v0, %v967_v61  ;;  %v2688_v9 = vadd.f32 %v2687_v4, %v2686_v1  ;;  %v2736_v10 = vadd.f32 %v2735_v6, %v2734_v2  ;;  %v958_v63 = vld [vmem:[#allocation2 + $0x58] sm:$0xff] }
 0x1ae   : > { %v974_v1 = vld [vmem:[#allocation2 + $0xd8] sm:$0xff] }
 0x1af   : > { %1496 = vst [vmem:[#allocation2 + $0x20] sm:$0xff] %v1464_v7  ;;  %1512 = vst [vmem:[#allocation2 + $0xa0] sm:$0xff] %v1480_v8  ;;  %v1465_v11 = vadd.f32 %v2688_v9, %v952_v3  ;;  %v1481_v12 = vadd.f32 %v2736_v10, %v968_v5 }
 0x1b1   : > { %1497 = vst [vmem:[#allocation2 + $0x28] sm:$0xff] %v1465_v11  ;;  %1513 = vst [vmem:[#allocation2 + $0xa8] sm:$0xff] %v1481_v12  ;;  %v2689_v13 = vpop.f32.mrb[12].mxu0  ;;  %v2737_v14 = vpop.f32.mrb[12].mxu1  ;;  %v959_v11 = vld [vmem:[#allocation2 + $0x60] sm:$0xff] }
 0x1b2   : > { %v2690_v16 = vpop.f32.mrb[13].mxu0  ;;  %v2738_v18 = vpop.f32.mrb[13].mxu1 }
 0x1b3   : > { %v2691_v19 = vadd.f32 %v2690_v16, %v2689_v13  ;;  %v2739_v20 = vadd.f32 %v2738_v18, %v2737_v14  ;;  %v2692_v21 = vpop.f32.mrb[14].mxu0  ;;  %v2740_v22 = vpop.f32.mrb[14].mxu1  ;;  %v975_v13 = vld [vmem:[#allocation2 + $0xe0] sm:$0xff] }
 0x1b4   : > { %v2693_v24 = vpop.f32.mrb[15].mxu0  ;;  %v2741_v26 = vpop.f32.mrb[15].mxu1 }
 0x1b5   : > { %v1466_v27 = vadd.f32 %v2691_v19, %v953_v15  ;;  %v1482_v28 = vadd.f32 %v2739_v20, %v969_v17  ;;  %v2694_v29 = vadd.f32 %v2693_v24, %v2692_v21  ;;  %v2742_v30 = vadd.f32 %v2741_v26, %v2740_v22  ;;  %v960_v19 = vld [vmem:[#allocation2 + $0x68] sm:$0xff] }
 0x1b6   : > { %v976_v21 = vld [vmem:[#allocation2 + $0xe8] sm:$0xff] }
 0x1b7   : > { %1498 = vst [vmem:[#allocation2 + $0x30] sm:$0xff] %v1466_v27  ;;  %1514 = vst [vmem:[#allocation2 + $0xb0] sm:$0xff] %v1482_v28  ;;  %v1467_v31 = vadd.f32 %v2694_v29, %v954_v23  ;;  %v1483_v32 = vadd.f32 %v2742_v30, %v970_v25 }
 0x1b9   : > { %1499 = vst [vmem:[#allocation2 + $0x38] sm:$0xff] %v1467_v31  ;;  %1515 = vst [vmem:[#allocation2 + $0xb8] sm:$0xff] %v1483_v32  ;;  %v2695_v33 = vpop.f32.mrb[16].mxu0  ;;  %v2743_v34 = vpop.f32.mrb[16].mxu1  ;;  %v961_v31 = vld [vmem:[#allocation2 + $0x70] sm:$0xff] }
 0x1ba   : > { %v2696_v36 = vpop.f32.mrb[17].mxu0  ;;  %v2744_v38 = vpop.f32.mrb[17].mxu1 }
 0x1bb   : > { %v2697_v39 = vadd.f32 %v2696_v36, %v2695_v33  ;;  %v2745_v40 = vadd.f32 %v2744_v38, %v2743_v34  ;;  %v2698_v41 = vpop.f32.mrb[18].mxu0  ;;  %v2746_v42 = vpop.f32.mrb[18].mxu1  ;;  %v977_v33 = vld [vmem:[#allocation2 + $0xf0] sm:$0xff] }
 0x1bc   : > { %v2699_v44 = vpop.f32.mrb[19].mxu0  ;;  %v2747_v46 = vpop.f32.mrb[19].mxu1 }
 0x1bd   : > { %v1468_v47 = vadd.f32 %v2697_v39, %v955_v35  ;;  %v1484_v48 = vadd.f32 %v2745_v40, %v971_v37  ;;  %v2700_v49 = vadd.f32 %v2699_v44, %v2698_v41  ;;  %v2748_v50 = vadd.f32 %v2747_v46, %v2746_v42  ;;  %v962_v39 = vld [vmem:[#allocation2 + $0x78] sm:$0xff] }
 0x1be   : > { %v978_v41 = vld [vmem:[#allocation2 + $0xf8] sm:$0xff] }
 0x1bf   : > { %1500 = vst [vmem:[#allocation2 + $0x40] sm:$0xff] %v1468_v47  ;;  %1516 = vst [vmem:[#allocation2 + $0xc0] sm:$0xff] %v1484_v48  ;;  %v1469_v51 = vadd.f32 %v2700_v49, %v956_v43  ;;  %v1485_v52 = vadd.f32 %v2748_v50, %v972_v45  ;;  %v1560_v49 = vld [vmem:[%s3463_s16 + $0x10] sm:$0xff] (!%p3483_p10)  ;;  %v1558_v50 = vld [vmem:[%s3463_s16] sm:$0xff] (!%p3483_p10) }
 0x1c1   : > { %1501 = vst [vmem:[#allocation2 + $0x48] sm:$0xff] %v1469_v51  ;;  %1517 = vst [vmem:[#allocation2 + $0xc8] sm:$0xff] %v1485_v52  ;;  %v2701_v53 = vpop.f32.mrb[20].mxu0  ;;  %v2749_v54 = vpop.f32.mrb[20].mxu1  ;;  %v3062_v51 = vmov (!%p3483_p10), 0   ;;  %v1561_v52 = vld [vmem:[%s3463_s16 + $0x18] sm:$0xff] (!%p3483_p10) }
 0x1c2   : > { %v2702_v56 = vpop.f32.mrb[21].mxu0  ;;  %v2750_v58 = vpop.f32.mrb[21].mxu1  ;;  %2956 = vset.pattern.permute.xlu1 (!%p3483_p10), %v3062_v51  ;;  %2955 = vset.pattern.permute.xlu0 (!%p3483_p10), %v3062_v51 }
 0x1c3   : > { %v2703_v59 = vadd.f32 %v2702_v56, %v2701_v53  ;;  %v2751_v60 = vadd.f32 %v2750_v58, %v2749_v54  ;;  %v2704_v61 = vpop.f32.mrb[22].mxu0  ;;  %v2752_v62 = vpop.f32.mrb[22].mxu1  ;;  %1602 = vperm.xlu1 (!%p3483_p10), %2956, %v1560_v49   ;;  %1592 = vperm.xlu0 (!%p3483_p10), %2955, %v1558_v50   ;;  %v1559_v53 = vld [vmem:[%s3463_s16 + $0x8] sm:$0xff] (!%p3483_p10)  ;;  %v1565_v56 = vld [vmem:[%s3463_s16 + $0x38] sm:$0xff] (!%p3483_p10)  ;;  %v1947_v49 = vld [vmem:[%s3468_s5 + $0xf0] sm:$0xff] (!%p3483_p10) }
 0x1c4   : > { %v2705_v0 = vpop.f32.mrb[23].mxu0  ;;  %v2753_v2 = vpop.f32.mrb[23].mxu1  ;;  %v1563_v54 = vld [vmem:[%s3463_s16 + $0x28] sm:$0xff] (!%p3483_p10) }
 0x1c5   : > { %v1470_v3 = vadd.f32 %v2703_v59, %v957_v55  ;;  %v1486_v4 = vadd.f32 %v2751_v60, %v973_v57  ;;  %v2706_v5 = vadd.f32 %v2705_v0, %v2704_v61  ;;  %v2754_v6 = vadd.f32 %v2753_v2, %v2752_v62  ;;  %v1562_v55 = vld [vmem:[%s3463_s16 + $0x20] sm:$0xff] (!%p3483_p10)  ;;  %v1564_v57 = vld [vmem:[%s3463_s16 + $0x30] sm:$0xff] (!%p3483_p10)  ;;  %v1567_v58 = vld [vmem:[%s3463_s16 + $0x48] sm:$0xff] (!%p3483_p10) }
 0x1c6   : > { %v1566_v59 = vld [vmem:[%s3463_s16 + $0x40] sm:$0xff] (!%p3483_p10)  ;;  %v1569_v60 = vld [vmem:[%s3463_s16 + $0x58] sm:$0xff] (!%p3483_p10)  ;;  %v1568_v61 = vld [vmem:[%s3463_s16 + $0x50] sm:$0xff] (!%p3483_p10) }
 0x1c7   : > { %1502 = vst [vmem:[#allocation2 + $0x50] sm:$0xff] %v1470_v3  ;;  %1518 = vst [vmem:[#allocation2 + $0xd0] sm:$0xff] %v1486_v4  ;;  %v1471_v7 = vadd.f32 %v2706_v5, %v958_v63  ;;  %v1487_v8 = vadd.f32 %v2754_v6, %v974_v1  ;;  %1607 = vperm.xlu1 (!%p3483_p10), %2956, %v1561_v52   ;;  %1597 = vperm.xlu0 (!%p3483_p10), %2955, %v1559_v53   ;;  %v1571_v62 = vld [vmem:[%s3463_s16 + $0x68] sm:$0xff] (!%p3483_p10)  ;;  %v1570_v63 = vld [vmem:[%s3463_s16 + $0x60] sm:$0xff] (!%p3483_p10) }
 0x1c8   : > { %v1573_v0 = vld [vmem:[%s3463_s16 + $0x78] sm:$0xff] (!%p3483_p10)  ;;  %v1572_v1 = vld [vmem:[%s3463_s16 + $0x70] sm:$0xff] (!%p3483_p10)  ;;  %v1575_v2 = vld [vmem:[%s3463_s16 + $0x88] sm:$0xff] (!%p3483_p10) }
 0x1c9   : > { %1503 = vst [vmem:[#allocation2 + $0x58] sm:$0xff] %v1471_v7  ;;  %1519 = vst [vmem:[#allocation2 + $0xd8] sm:$0xff] %v1487_v8  ;;  %v2707_v9 = vpop.f32.mrb[24].mxu0  ;;  %v2755_v10 = vpop.f32.mrb[24].mxu1  ;;  %v1574_v3 = vld [vmem:[%s3463_s16 + $0x80] sm:$0xff] (!%p3483_p10)  ;;  %v1577_v4 = vld [vmem:[%s3463_s16 + $0x98] sm:$0xff] (!%p3483_p10) }
 0x1ca   : > { %v2708_v12 = vpop.f32.mrb[25].mxu0  ;;  %v2756_v14 = vpop.f32.mrb[25].mxu1  ;;  %v1576_v5 = vld [vmem:[%s3463_s16 + $0x90] sm:$0xff] (!%p3483_p10)  ;;  %v1579_v6 = vld [vmem:[%s3463_s16 + $0xa8] sm:$0xff] (!%p3483_p10)  ;;  %v1578_v7 = vld [vmem:[%s3463_s16 + $0xa0] sm:$0xff] (!%p3483_p10) }
 0x1cb   : > { %v2709_v15 = vadd.f32 %v2708_v12, %v2707_v9  ;;  %v2757_v16 = vadd.f32 %v2756_v14, %v2755_v10  ;;  %v2710_v17 = vpop.f32.mrb[26].mxu0  ;;  %v2758_v18 = vpop.f32.mrb[26].mxu1  ;;  %1617 = vperm.xlu1 (!%p3483_p10), %2956, %v1563_v54   ;;  %1612 = vperm.xlu0 (!%p3483_p10), %2955, %v1562_v55   ;;  %v1581_v8 = vld [vmem:[%s3463_s16 + $0xb8] sm:$0xff] (!%p3483_p10)  ;;  %v1580_v9 = vld [vmem:[%s3463_s16 + $0xb0] sm:$0xff] (!%p3483_p10)  ;;  %v1583_v10 = vld [vmem:[%s3463_s16 + $0xc8] sm:$0xff] (!%p3483_p10) }
 0x1cc   : > { %v2711_v20 = vpop.f32.mrb[27].mxu0  ;;  %v2759_v22 = vpop.f32.mrb[27].mxu1  ;;  %v1585_v12 = vld [vmem:[%s3463_s16 + $0xd8] sm:$0xff] (!%p3483_p10)  ;;  %v1918_v14 = vld [vmem:[%s3468_s5 + $0x8] sm:$0xff] (!%p3483_p10) }
 0x1cd   : > { %v1472_v23 = vadd.f32 %v2709_v15, %v959_v11  ;;  %v1488_v24 = vadd.f32 %v2757_v16, %v975_v13  ;;  %v2712_v25 = vadd.f32 %v2711_v20, %v2710_v17  ;;  %v2760_v26 = vadd.f32 %v2759_v22, %v2758_v18  ;;  %v1582_v11 = vld [vmem:[%s3463_s16 + $0xc0] sm:$0xff] (!%p3483_p10)  ;;  %v1584_v13 = vld [vmem:[%s3463_s16 + $0xd0] sm:$0xff] (!%p3483_p10)  ;;  %v1920_v16 = vld [vmem:[%s3468_s5 + $0x18] sm:$0xff] (!%p3483_p10) }
 0x1ce   : > { %v1917_v15 = vld [vmem:[%s3468_s5] sm:$0xff] (!%p3483_p10)  ;;  %v1919_v17 = vld [vmem:[%s3468_s5 + $0x10] sm:$0xff] (!%p3483_p10)  ;;  %v1922_v18 = vld [vmem:[%s3468_s5 + $0x28] sm:$0xff] (!%p3483_p10) }
 0x1cf   : > { %1504 = vst [vmem:[#allocation2 + $0x60] sm:$0xff] %v1472_v23  ;;  %1520 = vst [vmem:[#allocation2 + $0xe0] sm:$0xff] %v1488_v24  ;;  %v1473_v27 = vadd.f32 %v2712_v25, %v960_v19  ;;  %v1489_v28 = vadd.f32 %v2760_v26, %v976_v21  ;;  %1627 = vperm.xlu1 (!%p3483_p10), %2956, %v1565_v56   ;;  %1622 = vperm.xlu0 (!%p3483_p10), %2955, %v1564_v57   ;;  %v1921_v19 = vld [vmem:[%s3468_s5 + $0x20] sm:$0xff] (!%p3483_p10)  ;;  %v1924_v20 = vld [vmem:[%s3468_s5 + $0x38] sm:$0xff] (!%p3483_p10) }
 0x1d0   : > { %v1923_v21 = vld [vmem:[%s3468_s5 + $0x30] sm:$0xff] (!%p3483_p10)  ;;  %v1926_v22 = vld [vmem:[%s3468_s5 + $0x48] sm:$0xff] (!%p3483_p10)  ;;  %v1925_v23 = vld [vmem:[%s3468_s5 + $0x40] sm:$0xff] (!%p3483_p10) }
 0x1d1   : > { %1505 = vst [vmem:[#allocation2 + $0x68] sm:$0xff] %v1473_v27  ;;  %1521 = vst [vmem:[#allocation2 + $0xe8] sm:$0xff] %v1489_v28  ;;  %v2713_v29 = vpop.f32.mrb[28].mxu0  ;;  %v2761_v30 = vpop.f32.mrb[28].mxu1  ;;  %v1928_v24 = vld [vmem:[%s3468_s5 + $0x58] sm:$0xff] (!%p3483_p10)  ;;  %v1927_v25 = vld [vmem:[%s3468_s5 + $0x50] sm:$0xff] (!%p3483_p10) }
 0x1d2   : > { %v2714_v32 = vpop.f32.mrb[29].mxu0  ;;  %v2762_v34 = vpop.f32.mrb[29].mxu1  ;;  %v1930_v26 = vld [vmem:[%s3468_s5 + $0x68] sm:$0xff] (!%p3483_p10)  ;;  %v1929_v27 = vld [vmem:[%s3468_s5 + $0x60] sm:$0xff] (!%p3483_p10)  ;;  %v1932_v28 = vld [vmem:[%s3468_s5 + $0x78] sm:$0xff] (!%p3483_p10) }
 0x1d3   : > { %v2715_v35 = vadd.f32 %v2714_v32, %v2713_v29  ;;  %v2763_v36 = vadd.f32 %v2762_v34, %v2761_v30  ;;  %v2716_v37 = vpop.f32.mrb[30].mxu0  ;;  %v2764_v38 = vpop.f32.mrb[30].mxu1  ;;  %1525 = sbr.rel (%p3483_p10) target bundleno = 726 (0x2d6), region = 172  ;;  %1637 = vperm.xlu1 (!%p3483_p10), %2956, %v1567_v58   ;;  %1632 = vperm.xlu0 (!%p3483_p10), %2955, %v1566_v59   ;;  %v1931_v29 = vld [vmem:[%s3468_s5 + $0x70] sm:$0xff] (!%p3483_p10)  ;;  %v1934_v30 = vld [vmem:[%s3468_s5 + $0x88] sm:$0xff] (!%p3483_p10)  ;;  %v1936_v32 = vld [vmem:[%s3468_s5 + $0x98] sm:$0xff] (!%p3483_p10) }
 0x1d4   : > { %v2717_v40 = vpop.f32.mrb[31].mxu0  ;;  %v2765_v42 = vpop.f32.mrb[31].mxu1  ;;  %v1938_v34 = vld [vmem:[%s3468_s5 + $0xa8] sm:$0xff] (!%p3483_p10) }
 0x1d5   : > { %v1474_v43 = vadd.f32 %v2715_v35, %v961_v31  ;;  %v1490_v44 = vadd.f32 %v2763_v36, %v977_v33  ;;  %v2718_v45 = vadd.f32 %v2717_v40, %v2716_v37  ;;  %v2766_v46 = vadd.f32 %v2765_v42, %v2764_v38  ;;  %v1933_v31 = vld [vmem:[%s3468_s5 + $0x80] sm:$0xff] (!%p3483_p10)  ;;  %v1935_v33 = vld [vmem:[%s3468_s5 + $0x90] sm:$0xff] (!%p3483_p10)  ;;  %v1940_v36 = vld [vmem:[%s3468_s5 + $0xb8] sm:$0xff] (!%p3483_p10) }
 0x1d6   : > { %v1937_v35 = vld [vmem:[%s3468_s5 + $0xa0] sm:$0xff] (!%p3483_p10)  ;;  %v1939_v37 = vld [vmem:[%s3468_s5 + $0xb0] sm:$0xff] (!%p3483_p10)  ;;  %v1587_v40 = vld [vmem:[%s3463_s16 + $0xe8] sm:$0xff] (!%p3483_p10) }
 0x1d7   : > { %1506 = vst [vmem:[#allocation2 + $0x70] sm:$0xff] %v1474_v43  ;;  %1522 = vst [vmem:[#allocation2 + $0xf0] sm:$0xff] %v1490_v44  ;;  %v1475_v47 = vadd.f32 %v2718_v45, %v962_v39  ;;  %v1491_v48 = vadd.f32 %v2766_v46, %v978_v41  ;;  %1647 = vperm.xlu1 (!%p3483_p10), %2956, %v1569_v60   ;;  %1642 = vperm.xlu0 (!%p3483_p10), %2955, %v1568_v61   ;;  %v1586_v38 = vld [vmem:[%s3463_s16 + $0xe0] sm:$0xff] (!%p3483_p10)  ;;  %v1942_v41 = vld [vmem:[%s3468_s5 + $0xc8] sm:$0xff] (!%p3483_p10) }
 0x1d8   : > { %v1941_v39 = vld [vmem:[%s3468_s5 + $0xc0] sm:$0xff] (!%p3483_p10)  ;;  %v1588_v42 = vld [vmem:[%s3463_s16 + $0xf0] sm:$0xff] (!%p3483_p10)  ;;  %v1589_v44 = vld [vmem:[%s3463_s16 + $0xf8] sm:$0xff] (!%p3483_p10) }
 0x1d9   : > { %1507 = vst [vmem:[#allocation2 + $0x78] sm:$0xff] %v1475_v47  ;;  %1523 = vst [vmem:[#allocation2 + $0xf8] sm:$0xff] %v1491_v48  ;;  %v1943_v43 = vld [vmem:[%s3468_s5 + $0xd0] sm:$0xff] (!%p3483_p10)  ;;  %v1944_v45 = vld [vmem:[%s3468_s5 + $0xd8] sm:$0xff] (!%p3483_p10) }
 0x1da   : > { %v1946_v46 = vld [vmem:[%s3468_s5 + $0xe8] sm:$0xff]  ;;  %v1945_v47 = vld [vmem:[%s3468_s5 + $0xe0] sm:$0xff]  ;;  %v1948_v48 = vld [vmem:[%s3468_s5 + $0xf8] sm:$0xff] }
 0x1db   : > { %1657 = vperm.xlu1 %2956, %v1571_v62   ;;  %1652 = vperm.xlu0 %2955, %v1570_v63  }
 0x1df   : > { %1667 = vperm.xlu1 %2956, %v1573_v0   ;;  %1662 = vperm.xlu0 %2955, %v1572_v1  }
 0x1e3   : > { %1677 = vperm.xlu1 %2956, %v1575_v2   ;;  %1672 = vperm.xlu0 %2955, %v1574_v3  }
 0x1e7   : > { %1687 = vperm.xlu1 %2956, %v1577_v4   ;;  %1682 = vperm.xlu0 %2955, %v1576_v5  }
 0x1eb   : > { %1697 = vperm.xlu1 %2956, %v1579_v6   ;;  %1692 = vperm.xlu0 %2955, %v1578_v7  }
 0x1ef   : > { %1707 = vperm.xlu1 %2956, %v1581_v8   ;;  %1702 = vperm.xlu0 %2955, %v1580_v9   ;;  %v1526_v8 = vld [vmem:[#allocation2] sm:$0xff]  ;;  %v1527_v9 = vld [vmem:[#allocation2 + $0x8] sm:$0xff] }
 0x1f3   : > { %1717 = vperm.xlu1 %2956, %v1583_v10   ;;  %1712 = vperm.xlu0 %2955, %v1582_v11  }
 0x1f7   : > { %1727 = vperm.xlu1 %2956, %v1585_v12   ;;  %1722 = vperm.xlu0 %2955, %v1584_v13   ;;  %v1528_v12 = vld [vmem:[#allocation2 + $0x10] sm:$0xff] }
 0x1fb   : > { %1956 = vperm.xlu1 %2956, %v1918_v14   ;;  %1951 = vperm.xlu0 %2955, %v1917_v15   ;;  %v3642_v15 = vld [vmem:[%s3835_s2] ss:$0 sm:$0xff] }
 0x1ff   : > { %1966 = vperm.xlu1 %2956, %v1920_v16   ;;  %1961 = vperm.xlu0 %2955, %v1919_v17   ;;  %v1529_v16 = vld [vmem:[#allocation2 + $0x18] sm:$0xff] }
 0x203   : > { %1976 = vperm.xlu1 %2956, %v1922_v18   ;;  %1971 = vperm.xlu0 %2955, %v1921_v19   ;;  %v2577_v19 = vld [vmem:[%s3491_s22] sm:$0xff]  }
 0x207   : > { %1986 = vperm.xlu1 %2956, %v1924_v20   ;;  %1981 = vperm.xlu0 %2955, %v1923_v21   ;;  %v2579_v21 = vunpack.c.h.bf16 %v2577_v19 }
 0x20b   : > { %1996 = vperm.xlu1 %2956, %v1926_v22   ;;  %1991 = vperm.xlu0 %2955, %v1925_v23  }
 0x20f   : > { %2006 = vperm.xlu1 %2956, %v1928_v24   ;;  %2001 = vperm.xlu0 %2955, %v1927_v25   ;;  %v1531_v25 = vld [vmem:[#allocation2 + $0x28] sm:$0xff] }
 0x213   : > { %2016 = vperm.xlu1 %2956, %v1930_v26   ;;  %2011 = vperm.xlu0 %2955, %v1929_v27   ;;  %v1530_v26 = vld [vmem:[#allocation2 + $0x20] sm:$0xff]  ;;  %v2578_v27 = vunpack.c.l.bf16 %v2577_v19 }
 0x217   : > { %2026 = vperm.xlu1 %2956, %v1932_v28   ;;  %2021 = vperm.xlu0 %2955, %v1931_v29   ;;  %v2640_v28 = vld [vmem:[%s3491_s22 + $0x8] sm:$0xff]  }
 0x21b   : > { %2036 = vperm.xlu1 %2956, %v1934_v30   ;;  %2031 = vperm.xlu0 %2955, %v1933_v31   ;;  %v1533_v31 = vld [vmem:[#allocation2 + $0x38] sm:$0xff] }
 0x21f   : > { %2046 = vperm.xlu1 %2956, %v1936_v32   ;;  %2041 = vperm.xlu0 %2955, %v1935_v33  }
 0x223   : > { %2056 = vperm.xlu1 %2956, %v1938_v34   ;;  %2051 = vperm.xlu0 %2955, %v1937_v35   ;;  %v2582_v35 = vunpack.c.l.bf16 %v2640_v28 }
 0x227   : > { %2066 = vperm.xlu1 %2956, %v1940_v36   ;;  %2061 = vperm.xlu0 %2955, %v1939_v37   ;;  %v2641_v36 = vld [vmem:[%s3491_s22 + $0x10] sm:$0xff]  }
 0x22b   : > { %1732 = vperm.xlu1 %2956, %v1586_v38   ;;  %2071 = vperm.xlu0 %2955, %v1941_v39  }
 0x22f   : > { %1737 = vperm.xlu1 %2956, %v1587_v40   ;;  %2076 = vperm.xlu0 %2955, %v1942_v41   ;;  %v2583_v40 = vunpack.c.h.bf16 %v2640_v28  ;;  %v1537_v28 = vld [vmem:[#allocation2 + $0x58] sm:$0xff] }
 0x233   : > { %1742 = vperm.xlu1 %2956, %v1588_v42   ;;  %2081 = vperm.xlu0 %2955, %v1943_v43   ;;  %v1532_v42 = vld [vmem:[#allocation2 + $0x30] sm:$0xff] }
 0x237   : > { %1747 = vperm.xlu1 %2956, %v1589_v44   ;;  %2086 = vperm.xlu0 %2955, %v1944_v45  }
 0x23b   : > { %2096 = vperm.xlu1 %2956, %v1946_v46   ;;  %2091 = vperm.xlu0 %2955, %v1945_v47   ;;  %v2587_v47 = vunpack.c.h.bf16 %v2641_v36 }
 0x23f   : > { %2106 = vperm.xlu1 %2956, %v1948_v48   ;;  %2101 = vperm.xlu0 %2955, %v1947_v49   ;;  %v2642_v48 = vld [vmem:[%s3491_s22 + $0x18] sm:$0xff]  }
 0x242   : > { %v1603_v50 = vpop.permute.xlu1 %1602  ;;  %v1593_v51 = vpop.permute.xlu0 %1592 }
 0x243   : > { %v1750_v13 = vmul.f32 %v1593_v51, %v1526_v8  ;;  %v1752_v20 = vmul.f32 %v1603_v50, %v1528_v12 }
 0x245   : > { %v1789_v22 = vadd.f32 %v3642_v15, %v1750_v13  ;;  %v1791_v32 = vadd.f32 %v3642_v15, %v1752_v20 }
 0x246   : > { %v1608_v52 = vpop.permute.xlu1 %1607  ;;  %v1598_v53 = vpop.permute.xlu0 %1597 }
 0x247   : > { %v1751_v14 = vmul.f32 %v1598_v53, %v1527_v9  ;;  %v1753_v23 = vmul.f32 %v1608_v52, %v1529_v16  ;;  %v1885_v39 = vadd.f32 %v2578_v27, %v1789_v22  ;;  %v1887_v51 = vadd.f32 %v2582_v35, %v1791_v32 }
 0x248   : > { %v2586_v52 = vunpack.c.l.bf16 %v2641_v36  ;;  %v2591_v16 = vunpack.c.h.bf16 %v2642_v48  ;;  %v2590_v22 = vunpack.c.l.bf16 %v2642_v48 }
 0x249   : > { %v1790_v24 = vadd.f32 %v3642_v15, %v1751_v14  ;;  %v1792_v37 = vadd.f32 %v3642_v15, %v1753_v23 }
 0x24a   : > { %v1618_v54 = vpop.permute.xlu1 %1617  ;;  %v1613_v55 = vpop.permute.xlu0 %1612 }
 0x24b   : > { %v1755_v33 = vmul.f32 %v1618_v54, %v1531_v25  ;;  %v1754_v34 = vmul.f32 %v1613_v55, %v1530_v26  ;;  %v1886_v38 = vadd.f32 %v2579_v21, %v1790_v24  ;;  %v1535_v54 = vld [vmem:[#allocation2 + $0x48] sm:$0xff]  ;;  %v1534_v55 = vld [vmem:[#allocation2 + $0x40] sm:$0xff]  ;;  %v1888_v9 = vadd.f32 %v2583_v40, %v1792_v37 }
 0x24d   : > { %v1794_v49 = vadd.f32 %v3642_v15, %v1755_v33  ;;  %v1793_v50 = vadd.f32 %v3642_v15, %v1754_v34 }
 0x24e   : > { %v1628_v56 = vpop.permute.xlu1 %1627  ;;  %v1623_v57 = vpop.permute.xlu0 %1622 }
 0x24f   : > { %v1757_v41 = vmul.f32 %v1628_v56, %v1533_v31  ;;  %v1756_v53 = vmul.f32 %v1623_v57, %v1532_v42  ;;  %v2643_v57 = vld [vmem:[%s3491_s22 + $0x20] sm:$0xff]   ;;  %v1890_v25 = vadd.f32 %v2587_v47, %v1794_v49  ;;  %v1889_v26 = vadd.f32 %v2586_v52, %v1793_v50  ;;  %v1536_v31 = vld [vmem:[#allocation2 + $0x50] sm:$0xff] }
 0x251   : > { %v1796_v12 = vadd.f32 %v3642_v15, %v1757_v41  ;;  %v1795_v27 = vadd.f32 %v3642_v15, %v1756_v53 }
 0x252   : > { %v3607_v58 = vpop.permute.xlu1 %1637  ;;  %v3609_v59 = vpop.permute.xlu0 %1632 }
 0x253   : > { %v1759_v23 = vmul.f32 %v3607_v58, %v1535_v54  ;;  %v1758_v24 = vmul.f32 %v3609_v59, %v1534_v55  ;;  %v1892_v58 = vadd.f32 %v2591_v16, %v1796_v12  ;;  %v2594_v59 = vunpack.c.l.bf16 %v2643_v57  ;;  %v1538_v54 = vld [vmem:[#allocation2 + $0x60] sm:$0xff]  ;;  %v2645_v16 = vld [vmem:[%s3491_s22 + $0x30] sm:$0xff]  }
 0x254   : > { %v1891_v52 = vadd.f32 %v2590_v22, %v1795_v27 }
 0x256   : > { %v3611_v60 = vpop.permute.xlu1 %1647  ;;  %v3613_v61 = vpop.permute.xlu0 %1642 }
 0x257   : > { %v1761_v47 = vmul.f32 %v3611_v60, %v1537_v28  ;;  %v1760_v48 = vmul.f32 %v3613_v61, %v1536_v31 }
 0x25a   : > { %v3615_v62 = vpop.permute.xlu1 %1657  ;;  %v3617_v63 = vpop.permute.xlu0 %1652 }
 0x25e   : > { %v3619_v0 = vpop.permute.xlu1 %1667  ;;  %v3621_v1 = vpop.permute.xlu0 %1662 }
 0x262   : > { %v3623_v2 = vpop.permute.xlu1 %1677  ;;  %v3625_v3 = vpop.permute.xlu0 %1672 }
 0x266   : > { %v3627_v4 = vpop.permute.xlu1 %1687  ;;  %v3629_v5 = vpop.permute.xlu0 %1682 }
 0x26a   : > { %v3631_v6 = vpop.permute.xlu1 %1697  ;;  %v3633_v7 = vpop.permute.xlu0 %1692 }
 0x26e   : > { %v3635_v10 = vpop.permute.xlu1 %1707  ;;  %v3637_v11 = vpop.permute.xlu0 %1702 }
 0x272   : > { %v3644_v17 = vpop.permute.xlu1 %1717  ;;  %v3646_v18 = vpop.permute.xlu0 %1712 }
 0x276   : > { %v3652_v29 = vpop.permute.xlu1 %1727  ;;  %v3654_v30 = vpop.permute.xlu0 %1722 }
 0x27a   : > { %v1957_v43 = vpop.permute.xlu1 %1956  ;;  %v1952_v44 = vpop.permute.xlu0 %1951 }
 0x27b   : > { %v2110_v45 = vmul.f32 %v1957_v43, %v1886_v38  ;;  %v2109_v46 = vmul.f32 %v1952_v44, %v1885_v39  ;;  %v2595_v38 = vunpack.c.h.bf16 %v2643_v57  ;;  %v1539_v39 = vld [vmem:[#allocation2 + $0x68] sm:$0xff]  ;;  %v1541_v57 = vld [vmem:[#allocation2 + $0x78] sm:$0xff] }
 0x27c   : > { %v2644_v44 = vld [vmem:[%s3491_s22 + $0x28] sm:$0xff]   ;;  %v1763_v53 = vmul.f32 %v3615_v62, %v1539_v39  ;;  %v1762_v62 = vmul.f32 %v3617_v63, %v1538_v54 }
 0x27d   : > { %2142 = vst [vmem:[%s3473_s21 + $0x8] sm:$0xff] %v2110_v45  ;;  %v2211_v56 = vmul.f32 %v2110_v45, %v2110_v45  ;;  %2141 = vst [vmem:[%s3473_s21] sm:$0xff] %v2109_v46  ;;  %v2210_v8 = vmul.f32 %v2109_v46, %v2109_v46  ;;  %v2173_v19 = vadd.f32 %v2110_v45, %v2109_v46  ;;  %v2598_v12 = vunpack.c.l.bf16 %v2644_v44 }
 0x27e   : > { %v1967_v13 = vpop.permute.xlu1 %1966  ;;  %v1962_v14 = vpop.permute.xlu0 %1961  ;;  %v1798_v45 = vadd.f32 %v3642_v15, %v1759_v23  ;;  %v1797_v46 = vadd.f32 %v3642_v15, %v1758_v24  ;;  %v1540_v23 = vld [vmem:[#allocation2 + $0x70] sm:$0xff]  ;;  %v1802_v27 = vadd.f32 %v3642_v15, %v1763_v53 }
 0x27f   : > { %v2112_v20 = vmul.f32 %v1967_v13, %v1888_v9  ;;  %v2111_v21 = vmul.f32 %v1962_v14, %v1887_v51  ;;  %v2242_v32 = vadd.f32 %v2211_v56, %v2210_v8  ;;  %v2599_v9 = vunpack.c.h.bf16 %v2644_v44 }
 0x280   : > { %v1893_v22 = vadd.f32 %v2594_v59, %v1797_v46  ;;  %v1764_v59 = vmul.f32 %v3621_v1, %v1540_v23 }
 0x281   : > { %2144 = vst [vmem:[%s3473_s21 + $0x18] sm:$0xff] %v2112_v20  ;;  %2143 = vst [vmem:[%s3473_s21 + $0x10] sm:$0xff] %v2111_v21  ;;  %v2174_v33 = vadd.f32 %v2173_v19, %v2111_v21  ;;  %v2212_v34 = vmul.f32 %v2111_v21, %v2111_v21  ;;  %v2213_v35 = vmul.f32 %v2112_v20, %v2112_v20 }
 0x282   : > { %v1977_v36 = vpop.permute.xlu1 %1976  ;;  %v1972_v37 = vpop.permute.xlu0 %1971  ;;  %v1800_v19 = vadd.f32 %v3642_v15, %v1761_v47  ;;  %v1894_v21 = vadd.f32 %v2595_v38, %v1798_v45  ;;  %v1765_v38 = vmul.f32 %v3619_v0, %v1541_v57 }
 0x283   : > { %v2243_v40 = vadd.f32 %v2242_v32, %v2212_v34  ;;  %v2114_v41 = vmul.f32 %v1977_v36, %v1890_v25  ;;  %v2113_v42 = vmul.f32 %v1972_v37, %v1889_v26  ;;  %v2175_v43 = vadd.f32 %v2174_v33, %v2112_v20 }
 0x284   : > { %v1799_v20 = vadd.f32 %v3642_v15, %v1760_v48  ;;  %v2603_v33 = vunpack.c.h.bf16 %v2645_v16  ;;  %v2602_v34 = vunpack.c.l.bf16 %v2645_v16  ;;  %v1896_v39 = vadd.f32 %v2599_v9, %v1800_v19 }
 0x285   : > { %2146 = vst [vmem:[%s3473_s21 + $0x28] sm:$0xff] %v2114_v41  ;;  %2145 = vst [vmem:[%s3473_s21 + $0x20] sm:$0xff] %v2113_v42  ;;  %v2176_v49 = vadd.f32 %v2175_v43, %v2113_v42  ;;  %v2214_v50 = vmul.f32 %v2113_v42, %v2113_v42  ;;  %v2244_v51 = vadd.f32 %v2243_v40, %v2213_v35  ;;  %v1543_v42 = vld [vmem:[#allocation2 + $0x88] sm:$0xff]  ;;  %v1542_v43 = vld [vmem:[#allocation2 + $0x80] sm:$0xff] }
 0x286   : > { %v2215_v55 = vmul.f32 %v2114_v41, %v2114_v41  ;;  %v1987_v56 = vpop.permute.xlu1 %1986  ;;  %v1982_v8 = vpop.permute.xlu0 %1981  ;;  %v1895_v40 = vadd.f32 %v2598_v12, %v1799_v20  ;;  %v1898_v0 = vadd.f32 %v2603_v33, %v1802_v27  ;;  %v1803_v9 = vadd.f32 %v3642_v15, %v1764_v59  ;;  %v1544_v20 = vld [vmem:[#allocation2 + $0x90] sm:$0xff]  ;;  %v1547_v33 = vld [vmem:[#allocation2 + $0xa8] sm:$0xff] }
 0x287   : > { %v2245_v60 = vadd.f32 %v2244_v51, %v2214_v50  ;;  %v2116_v13 = vmul.f32 %v1987_v56, %v1892_v58  ;;  %v2115_v61 = vmul.f32 %v1982_v8, %v1891_v52  ;;  %v2177_v14 = vadd.f32 %v2176_v49, %v2114_v41  ;;  %v2646_v58 = vld [vmem:[%s3491_s22 + $0x38] sm:$0xff]   ;;  %v2647_v56 = vld [vmem:[%s3491_s22 + $0x40] sm:$0xff]  }
 0x288   : > { %v1801_v41 = vadd.f32 %v3642_v15, %v1762_v62  ;;  %v2607_v50 = vunpack.c.h.bf16 %v2646_v58  ;;  %v2606_v1 = vunpack.c.l.bf16 %v2646_v58  ;;  %v1545_v51 = vld [vmem:[#allocation2 + $0x98] sm:$0xff]  ;;  %v1804_v8 = vadd.f32 %v3642_v15, %v1765_v38 }
 0x289   : > { %2148 = vst [vmem:[%s3473_s21 + $0x38] sm:$0xff] %v2116_v13  ;;  %2147 = vst [vmem:[%s3473_s21 + $0x30] sm:$0xff] %v2115_v61  ;;  %v2178_v24 = vadd.f32 %v2177_v14, %v2115_v61  ;;  %v2216_v25 = vmul.f32 %v2115_v61, %v2115_v61  ;;  %v2246_v26 = vadd.f32 %v2245_v60, %v2215_v55  ;;  %v2611_v57 = vunpack.c.h.bf16 %v2647_v56 }
 0x28a   : > { %v2217_v28 = vmul.f32 %v2116_v13, %v2116_v13  ;;  %v1997_v31 = vpop.permute.xlu1 %1996  ;;  %v1992_v32 = vpop.permute.xlu0 %1991  ;;  %v1767_v12 = vmul.f32 %v3623_v2, %v1543_v42  ;;  %v1766_v60 = vmul.f32 %v3625_v3, %v1542_v43  ;;  %v1897_v16 = vadd.f32 %v2602_v34, %v1801_v41  ;;  %v1546_v34 = vld [vmem:[#allocation2 + $0xa0] sm:$0xff] }
 0x28b   : > { %v2247_v35 = vadd.f32 %v2246_v26, %v2216_v25  ;;  %v2118_v36 = vmul.f32 %v1997_v31, %v1894_v21  ;;  %v2117_v63 = vmul.f32 %v1992_v32, %v1893_v22  ;;  %v2179_v37 = vadd.f32 %v2178_v24, %v2116_v13  ;;  %v2648_v26 = vld [vmem:[%s3491_s22 + $0x48] sm:$0xff]  }
 0x28c   : > { %v1769_v19 = vmul.f32 %v3627_v4, %v1545_v51  ;;  %v2610_v23 = vunpack.c.l.bf16 %v2647_v56  ;;  %v1806_v27 = vadd.f32 %v3642_v15, %v1767_v12  ;;  %v1900_v31 = vadd.f32 %v2607_v50, %v1804_v8  ;;  %v1548_v50 = vld [vmem:[#allocation2 + $0xb0] sm:$0xff] }
 0x28d   : > { %2150 = vst [vmem:[%s3473_s21 + $0x48] sm:$0xff] %v2118_v36  ;;  %2149 = vst [vmem:[%s3473_s21 + $0x40] sm:$0xff] %v2117_v63  ;;  %v2180_v44 = vadd.f32 %v2179_v37, %v2117_v63  ;;  %v2218_v45 = vmul.f32 %v2117_v63, %v2117_v63  ;;  %v2248_v46 = vadd.f32 %v2247_v35, %v2217_v28 }
 0x28e   : > { %v2219_v47 = vmul.f32 %v2118_v36, %v2118_v36  ;;  %v2007_v48 = vpop.permute.xlu1 %2006  ;;  %v2002_v49 = vpop.permute.xlu0 %2001  ;;  %v1805_v28 = vadd.f32 %v3642_v15, %v1766_v60  ;;  %v1899_v32 = vadd.f32 %v2606_v1, %v1803_v9  ;;  %v1768_v4 = vmul.f32 %v3629_v5, %v1544_v20 }
 0x28f   : > { %v2249_v52 = vadd.f32 %v2248_v46, %v2218_v45  ;;  %v2120_v53 = vmul.f32 %v2007_v48, %v1896_v39  ;;  %v2119_v54 = vmul.f32 %v2002_v49, %v1895_v40  ;;  %v2181_v55 = vadd.f32 %v2180_v44, %v2118_v36  ;;  %v2649_v44 = vld [vmem:[%s3491_s22 + $0x50] sm:$0xff]  }
 0x290   : > { %v1808_v37 = vadd.f32 %v3642_v15, %v1769_v19  ;;  %v2615_v39 = vunpack.c.h.bf16 %v2648_v26  ;;  %v2614_v40 = vunpack.c.l.bf16 %v2648_v26  ;;  %v1771_v45 = vmul.f32 %v3631_v6, %v1547_v33  ;;  %v1551_v33 = vld [vmem:[#allocation2 + $0xc8] sm:$0xff] }
 0x291   : > { %2152 = vst [vmem:[%s3473_s21 + $0x58] sm:$0xff] %v2120_v53  ;;  %2151 = vst [vmem:[%s3473_s21 + $0x50] sm:$0xff] %v2119_v54  ;;  %v2182_v13 = vadd.f32 %v2181_v55, %v2119_v54  ;;  %v2220_v61 = vmul.f32 %v2119_v54, %v2119_v54  ;;  %v2250_v14 = vadd.f32 %v2249_v52, %v2219_v47  ;;  %v2619_v56 = vunpack.c.h.bf16 %v2649_v44 }
 0x292   : > { %v2221_v21 = vmul.f32 %v2120_v53, %v2120_v53  ;;  %v2017_v22 = vpop.permute.xlu1 %2016  ;;  %v2012_v62 = vpop.permute.xlu0 %2011  ;;  %v1770_v46 = vmul.f32 %v3633_v7, %v1546_v34  ;;  %v1902_v47 = vadd.f32 %v2611_v57, %v1806_v27  ;;  %v1901_v48 = vadd.f32 %v2610_v23, %v1805_v28  ;;  %v1550_v57 = vld [vmem:[#allocation2 + $0xc0] sm:$0xff] }
 0x293   : > { %v2251_v2 = vadd.f32 %v2250_v14, %v2220_v61  ;;  %v2122_v24 = vmul.f32 %v2017_v22, %v1898_v0  ;;  %v2121_v3 = vmul.f32 %v2012_v62, %v1897_v16  ;;  %v2183_v25 = vadd.f32 %v2182_v13, %v2120_v53  ;;  %v1549_v0 = vld [vmem:[#allocation2 + $0xb8] sm:$0xff] }
 0x294   : > { %v1807_v49 = vadd.f32 %v3642_v15, %v1768_v4  ;;  %v1904_v6 = vadd.f32 %v2615_v39, %v1808_v37  ;;  %v2618_v7 = vunpack.c.l.bf16 %v2649_v44  ;;  %v2650_v13 = vld [vmem:[%s3491_s22 + $0x58] sm:$0xff]   ;;  %v1810_v61 = vadd.f32 %v3642_v15, %v1771_v45  ;;  %v2651_v37 = vld [vmem:[%s3491_s22 + $0x60] sm:$0xff]  }
 0x295   : > { %2154 = vst [vmem:[%s3473_s21 + $0x68] sm:$0xff] %v2122_v24  ;;  %2153 = vst [vmem:[%s3473_s21 + $0x60] sm:$0xff] %v2121_v3  ;;  %v2184_v35 = vadd.f32 %v2183_v25, %v2121_v3  ;;  %v2222_v36 = vmul.f32 %v2121_v3, %v2121_v3  ;;  %v2252_v63 = vadd.f32 %v2251_v2, %v2221_v21  ;;  %v2623_v3 = vunpack.c.h.bf16 %v2650_v13 }
 0x296   : > { %v2223_v58 = vmul.f32 %v2122_v24, %v2122_v24  ;;  %v2027_v38 = vpop.permute.xlu1 %2026  ;;  %v2022_v59 = vpop.permute.xlu0 %2021  ;;  %v1809_v14 = vadd.f32 %v3642_v15, %v1770_v46  ;;  %v1773_v16 = vmul.f32 %v3635_v10, %v1549_v0  ;;  %v1772_v19 = vmul.f32 %v3637_v11, %v1548_v50 }
 0x297   : > { %v2253_v41 = vadd.f32 %v2252_v63, %v2222_v36  ;;  %v2124_v42 = vmul.f32 %v2027_v38, %v1900_v31  ;;  %v2123_v5 = vmul.f32 %v2022_v59, %v1899_v32  ;;  %v2185_v43 = vadd.f32 %v2184_v35, %v2122_v24 }
 0x298   : > { %v1903_v62 = vadd.f32 %v2614_v40, %v1807_v49  ;;  %v2622_v25 = vunpack.c.l.bf16 %v2650_v13  ;;  %v1812_v11 = vadd.f32 %v3642_v15, %v1773_v16  ;;  %v1811_v31 = vadd.f32 %v3642_v15, %v1772_v19  ;;  %v1552_v49 = vld [vmem:[#allocation2 + $0xd0] sm:$0xff] }
 0x299   : > { %2156 = vst [vmem:[%s3473_s21 + $0x78] sm:$0xff] %v2124_v42  ;;  %2155 = vst [vmem:[%s3473_s21 + $0x70] sm:$0xff] %v2123_v5  ;;  %v2186_v1 = vadd.f32 %v2185_v43, %v2123_v5  ;;  %v2224_v51 = vmul.f32 %v2123_v5, %v2123_v5  ;;  %v2254_v52 = vadd.f32 %v2253_v41, %v2223_v58 }
 0x29a   : > { %v2225_v53 = vmul.f32 %v2124_v42, %v2124_v42  ;;  %v2037_v54 = vpop.permute.xlu1 %2036  ;;  %v2032_v55 = vpop.permute.xlu0 %2031  ;;  %v1906_v32 = vadd.f32 %v2619_v56, %v1810_v61  ;;  %v1905_v4 = vadd.f32 %v2618_v7, %v1809_v14  ;;  %v1774_v34 = vmul.f32 %v3646_v18, %v1550_v57  ;;  %v2652_v7 = vld [vmem:[%s3491_s22 + $0x68] sm:$0xff]  }
 0x29b   : > { %v2255_v8 = vadd.f32 %v2254_v52, %v2224_v51  ;;  %v2126_v9 = vmul.f32 %v2037_v54, %v1902_v47  ;;  %v2125_v12 = vmul.f32 %v2032_v55, %v1901_v48  ;;  %v2187_v60 = vadd.f32 %v2186_v1, %v2124_v42  ;;  %v1555_v57 = vld [vmem:[#allocation2 + $0xe8] sm:$0xff] }
 0x29c   : > { %v1775_v5 = vmul.f32 %v3644_v17, %v1551_v33  ;;  %v1908_v43 = vadd.f32 %v2623_v3, %v1812_v11  ;;  %v1907_v44 = vadd.f32 %v2622_v25, %v1811_v31  ;;  %v2626_v18 = vunpack.c.l.bf16 %v2651_v37  ;;  %v2653_v11 = vld [vmem:[%s3491_s22 + $0x70] sm:$0xff]  }
 0x29d   : > { %2158 = vst [vmem:[%s3473_s21 + $0x88] sm:$0xff] %v2126_v9  ;;  %2157 = vst [vmem:[%s3473_s21 + $0x80] sm:$0xff] %v2125_v12  ;;  %v2188_v20 = vadd.f32 %v2187_v60, %v2125_v12  ;;  %v2226_v21 = vmul.f32 %v2125_v12, %v2125_v12  ;;  %v2256_v22 = vadd.f32 %v2255_v8, %v2225_v53  ;;  %v2627_v53 = vunpack.c.h.bf16 %v2651_v37  ;;  %v1553_v8 = vld [vmem:[#allocation2 + $0xd8] sm:$0xff] }
 0x29e   : > { %v2227_v23 = vmul.f32 %v2126_v9, %v2126_v9  ;;  %v2047_v2 = vpop.permute.xlu1 %2046  ;;  %v2042_v24 = vpop.permute.xlu0 %2041  ;;  %v1813_v45 = vadd.f32 %v3642_v15, %v1774_v34  ;;  %v1814_v54 = vadd.f32 %v3642_v15, %v1775_v5  ;;  %v1776_v55 = vmul.f32 %v3654_v30, %v1552_v49  ;;  %v1554_v30 = vld [vmem:[#allocation2 + $0xe0] sm:$0xff] }
 0x29f   : > { %v2257_v26 = vadd.f32 %v2256_v22, %v2226_v21  ;;  %v2128_v27 = vmul.f32 %v2047_v2, %v1904_v6  ;;  %v2127_v10 = vmul.f32 %v2042_v24, %v1903_v62  ;;  %v2189_v28 = vadd.f32 %v2188_v20, %v2126_v9 }
 0x2a0   : > { %v1909_v56 = vadd.f32 %v2626_v18, %v1813_v45  ;;  %v2630_v14 = vunpack.c.l.bf16 %v2652_v7  ;;  %v1777_v16 = vmul.f32 %v3652_v29, %v1553_v8  ;;  %v1815_v19 = vadd.f32 %v3642_v15, %v1776_v55 }
 0x2a1   : > { %2160 = vst [vmem:[%s3473_s21 + $0x98] sm:$0xff] %v2128_v27  ;;  %2159 = vst [vmem:[%s3473_s21 + $0x90] sm:$0xff] %v2127_v10  ;;  %v2190_v35 = vadd.f32 %v2189_v28, %v2127_v10  ;;  %v2228_v36 = vmul.f32 %v2127_v10, %v2127_v10  ;;  %v2258_v63 = vadd.f32 %v2257_v26, %v2227_v23  ;;  %v2631_v25 = vunpack.c.h.bf16 %v2652_v7  ;;  %v1556_v10 = vld [vmem:[#allocation2 + $0xf0] sm:$0xff] }
 0x2a2   : > { %v2229_v58 = vmul.f32 %v2128_v27, %v2128_v27  ;;  %v2057_v38 = vpop.permute.xlu1 %2056  ;;  %v2052_v59 = vpop.permute.xlu0 %2051  ;;  %v1910_v21 = vadd.f32 %v2627_v53, %v1814_v54  ;;  %v1816_v26 = vadd.f32 %v3642_v15, %v1777_v16  ;;  %v1911_v28 = vadd.f32 %v2630_v14, %v1815_v19 }
 0x2a3   : > { %v2259_v39 = vadd.f32 %v2258_v63, %v2228_v36  ;;  %v2130_v40 = vmul.f32 %v2057_v38, %v1906_v32  ;;  %v2129_v41 = vmul.f32 %v2052_v59, %v1905_v4  ;;  %v2191_v42 = vadd.f32 %v2190_v35, %v2128_v27  ;;  %v2654_v35 = vld [vmem:[%s3491_s22 + $0x78] sm:$0xff]  }
 0x2a4   : > { %v2634_v38 = vunpack.c.l.bf16 %v2653_v11 }
 0x2a5   : > { %2162 = vst [vmem:[%s3473_s21 + $0xa8] sm:$0xff] %v2130_v40  ;;  %2161 = vst [vmem:[%s3473_s21 + $0xa0] sm:$0xff] %v2129_v41  ;;  %v2192_v46 = vadd.f32 %v2191_v42, %v2129_v41  ;;  %v2230_v47 = vmul.f32 %v2129_v41, %v2129_v41  ;;  %v2260_v48 = vadd.f32 %v2259_v39, %v2229_v58  ;;  %v1557_v58 = vld [vmem:[#allocation2 + $0xf8] sm:$0xff]  ;;  %v2635_v41 = vunpack.c.h.bf16 %v2653_v11 }
 0x2a6   : > { %v2067_v0 = vpop.permute.xlu1 %2066  ;;  %v2062_v50 = vpop.permute.xlu0 %2061  ;;  %v2231_v17 = vmul.f32 %v2130_v40, %v2130_v40 }
 0x2a7   : > { %v2261_v1 = vadd.f32 %v2260_v48, %v2230_v47  ;;  %v2132_v51 = vmul.f32 %v2067_v0, %v1908_v43  ;;  %v2131_v52 = vmul.f32 %v2062_v50, %v1907_v44  ;;  %v2193_v6 = vadd.f32 %v2192_v46, %v2130_v40 }
 0x2a8   : > { %v1912_v40 = vadd.f32 %v2631_v25, %v1816_v26  ;;  %v2638_v44 = vunpack.c.l.bf16 %v2654_v35  ;;  %v2639_v50 = vunpack.c.h.bf16 %v2654_v35 }
 0x2a9   : > { %2164 = vst [vmem:[%s3473_s21 + $0xb8] sm:$0xff] %v2132_v51  ;;  %2163 = vst [vmem:[%s3473_s21 + $0xb0] sm:$0xff] %v2131_v52  ;;  %v2232_v9 = vmul.f32 %v2131_v52, %v2131_v52  ;;  %v2262_v12 = vadd.f32 %v2261_v1, %v2231_v17  ;;  %v2194_v20 = vadd.f32 %v2193_v6, %v2131_v52 }
 0x2aa   : > { %v1733_v60 = vpop.permute.xlu1 %1732  ;;  %v2072_v13 = vpop.permute.xlu0 %2071  ;;  %v2233_v24 = vmul.f32 %v2132_v51, %v2132_v51 }
 0x2ab   : > { %v2133_v61 = vmul.f32 %v2072_v13, %v1909_v56  ;;  %v2263_v22 = vadd.f32 %v2262_v12, %v2232_v9  ;;  %v1778_v3 = vmul.f32 %v1733_v60, %v1554_v30  ;;  %v2195_v29 = vadd.f32 %v2194_v20, %v2132_v51 }
 0x2ad   : > { %2165 = vst [vmem:[%s3473_s21 + $0xc0] sm:$0xff] %v2133_v61  ;;  %v2234_v31 = vmul.f32 %v2133_v61, %v2133_v61  ;;  %v2264_v32 = vadd.f32 %v2263_v22, %v2233_v24  ;;  %v1817_v36 = vadd.f32 %v3642_v15, %v1778_v3  ;;  %v2196_v59 = vadd.f32 %v2195_v29, %v2133_v61 }
 0x2ae   : > { %v1738_v62 = vpop.permute.xlu1 %1737  ;;  %v2077_v23 = vpop.permute.xlu0 %2076 }
 0x2af   : > { %v2134_v2 = vmul.f32 %v2077_v23, %v1910_v21  ;;  %v1779_v27 = vmul.f32 %v1738_v62, %v1555_v57  ;;  %v2265_v42 = vadd.f32 %v2264_v32, %v2234_v31  ;;  %v1913_v0 = vadd.f32 %v2634_v38, %v1817_v36 }
 0x2b1   : > { %2166 = vst [vmem:[%s3473_s21 + $0xc8] sm:$0xff] %v2134_v2  ;;  %v2235_v63 = vmul.f32 %v2134_v2, %v2134_v2  ;;  %v1818_v39 = vadd.f32 %v3642_v15, %v1779_v27  ;;  %v2197_v18 = vadd.f32 %v2196_v59, %v2134_v2 }
 0x2b2   : > { %v1743_v4 = vpop.permute.xlu1 %1742  ;;  %v2082_v33 = vpop.permute.xlu0 %2081 }
 0x2b3   : > { %v2135_v34 = vmul.f32 %v2082_v33, %v1911_v28  ;;  %v1780_v37 = vmul.f32 %v1743_v4, %v1556_v10  ;;  %v2266_v48 = vadd.f32 %v2265_v42, %v2235_v63  ;;  %v1914_v17 = vadd.f32 %v2635_v41, %v1818_v39 }
 0x2b5   : > { %2167 = vst [vmem:[%s3473_s21 + $0xd0] sm:$0xff] %v2135_v34  ;;  %v2236_v45 = vmul.f32 %v2135_v34, %v2135_v34  ;;  %v1819_v49 = vadd.f32 %v3642_v15, %v1780_v37  ;;  %v2198_v1 = vadd.f32 %v2197_v18, %v2135_v34 }
 0x2b6   : > { %v1748_v5 = vpop.permute.xlu1 %1747  ;;  %v2087_v43 = vpop.permute.xlu0 %2086 }
 0x2b7   : > { %v1781_v46 = vmul.f32 %v1748_v5, %v1557_v58  ;;  %v2136_v47 = vmul.f32 %v2087_v43, %v1912_v40  ;;  %v2267_v55 = vadd.f32 %v2266_v48, %v2236_v45  ;;  %v1915_v8 = vadd.f32 %v2638_v44, %v1819_v49 }
 0x2b9   : > { %v1820_v51 = vadd.f32 %v3642_v15, %v1781_v46  ;;  %2168 = vst [vmem:[%s3473_s21 + $0xd8] sm:$0xff] %v2136_v47  ;;  %v2237_v52 = vmul.f32 %v2136_v47, %v2136_v47  ;;  %v2199_v6 = vadd.f32 %v2198_v1, %v2136_v47 }
 0x2ba   : > { %v2097_v53 = vpop.permute.xlu1 %2096  ;;  %v2092_v54 = vpop.permute.xlu0 %2091 }
 0x2bb   : > { %v2138_v56 = vmul.f32 %v2097_v53, %v1914_v17  ;;  %v2137_v7 = vmul.f32 %v2092_v54, %v1913_v0  ;;  %v2268_v9 = vadd.f32 %v2267_v55, %v2237_v52  ;;  %v1916_v13 = vadd.f32 %v2639_v50, %v1820_v51 }
 0x2bd   : > { %2170 = vst [vmem:[%s3473_s21 + $0xe8] sm:$0xff] %v2138_v56  ;;  %2169 = vst [vmem:[%s3473_s21 + $0xe0] sm:$0xff] %v2137_v7  ;;  %v2200_v12 = vadd.f32 %v2199_v6, %v2137_v7  ;;  %v2238_v60 = vmul.f32 %v2137_v7, %v2137_v7  ;;  %v2239_v61 = vmul.f32 %v2138_v56, %v2138_v56 }
 0x2be   : > { %v2107_v15 = vpop.permute.xlu1 %2106  ;;  %v2102_v14 = vpop.permute.xlu0 %2101 }
 0x2bf   : > { %v2269_v16 = vadd.f32 %v2268_v9, %v2238_v60  ;;  %v2140_v19 = vmul.f32 %v2107_v15, %v1916_v13  ;;  %v2139_v20 = vmul.f32 %v2102_v14, %v1915_v8  ;;  %v2201_v30 = vadd.f32 %v2200_v12, %v2138_v56 }
 0x2c1   : > { %2172 = vst [vmem:[%s3473_s21 + $0xf8] sm:$0xff] %v2140_v19  ;;  %2171 = vst [vmem:[%s3473_s21 + $0xf0] sm:$0xff] %v2139_v20  ;;  %v2202_v21 = vadd.f32 %v2201_v30, %v2139_v20  ;;  %v2240_v22 = vmul.f32 %v2139_v20, %v2139_v20  ;;  %v2270_v62 = vadd.f32 %v2269_v16, %v2239_v61 }
 0x2c2   : > { %v2241_v57 = vmul.f32 %v2140_v19, %v2140_v19 }
 0x2c3   : > { %v2203_v23 = vadd.f32 %v2202_v21, %v2140_v19  ;;  %v2271_v2 = vadd.f32 %v2270_v62, %v2240_v22 }
 0x2c5   : > { %v2204_v24 = vrot.slane %v2203_v23, 4  ;;  %v2272_v3 = vadd.f32 %v2271_v2, %v2241_v57 }
 0x2c7   : > { %v2205_v25 = vadd.f32 %v2204_v24, %v2203_v23  ;;  %v2273_v26 = vrot.slane %v2272_v3, 4 }
 0x2c9   : > { %v2206_v29 = vrot.slane %v2205_v25, 2  ;;  %v2274_v27 = vadd.f32 %v2273_v26, %v2272_v3 }
 0x2cb   : > { %v2207_v10 = vadd.f32 %v2206_v29, %v2205_v25  ;;  %v2275_v28 = vrot.slane %v2274_v27, 2 }
 0x2cd   : > { %v2208_v11 = vrot.slane %v2207_v10, 1  ;;  %v2276_v31 = vadd.f32 %v2275_v28, %v2274_v27 }
 0x2cf   : > { %v2277_v32 = vrot.slane %v2276_v31, 1  ;;  %v2209_v4 = vadd.f32 %v2208_v11, %v2207_v10 }
 0x2d1   : > { %v2278_v33 = vadd.f32 %v2277_v32, %v2276_v31 }
 0x2d3   : > { %v2280_v34 = vsel %vm2279_vm0, %v2209_v4, %v2278_v33 }
 0x2d4   : > { %v2282_v35 = vsel %vm2281_vm1, %v2280_v34, 0.0 }
 0x2d5   : > { %2283 = vst [vmem:[%s3478_s12] sm:$0xff] %v2282_v35 }
 0x2d6 PF: > { %s18_s13 = sadd.s32 1, %s3059_s13   ;;  %s3837_s8 = sld [smem:[#allocation10_spill]] }
 0x2d7   : > { %p3754_p11 = scmp.ge.s32.totalorder %s18_s13, 29   ;;  %s3838_s9 = sld [smem:[#allocation11_spill]] }
 0x2d8   : > { %s3839_s18 = sld [smem:[#allocation6_spill]]  ;;  %s3840_s19 = sld [smem:[#allocation7_spill]] }
 0x2d9   : > { %s3841_s4 = sld [smem:[#allocation8_spill]]  ;;  %s3842_s12 = sld [smem:[#allocation9_spill]] }
 0x2da   : > { %s3844_s24 = smov %s3015_s25  ;;  %s3845_s25 = smov %s3217_s3 }
 0x2db   : > { %s3846_s26 = smov %s3023_s27  ;;  %s3848_s28 = smov %s3031_s29 }
 0x2dc   : > { %s3847_s27 = smov %s3837_s8  ;;  %s3850_s30 = smov %s3047_s10 }
 0x2dd   : > { %s3849_s29 = smov %s3838_s9  ;;  %s3851_s8 = smov %s3051_s11 }
 0x2de   : > { %s3852_s9 = smov %s3839_s18  ;;  %s3853_s10 = smov %s3840_s19 }
 0x2df   : > { %s3854_s11 = smov %s3841_s4  ;;  %17 = sbr.rel (!%p3754_p11) target bundleno = 16 (0x10), region = 241 }

// kernel: rgcn_forward.7
= control target key start
LH: loop header
LB: loop body
LE: loop exit
PB: predicated region body
PF: predicated region fallthrough
CT: control target
= control target key end

     0   :  { %s2351_s9 = smov 0   ;;  %s2353_s10 = smov 0   ;;  %s2619_s0 = inlined_call_operand.vmem [shape: f32[768,128], index: 0, kind: input, shape index: {}]   ;;  %s2620_s1 = inlined_call_operand.vmem [shape: bf16[128,512], index: 1, kind: input, shape index: {}]   ;;  %s2621_s2 = inlined_call_operand.vmem [shape: bf16[768,512], index: 2, kind: output, shape index: {}]  }
   0x1   :  { %s2355_s11 = smov 0  }
   0x2 LB: > { %s31_s12 = sadd.s32 1, %s2329_s10  ;;  %p2069_p0 = scmp.ge.s32.totalorder %s2333_s11, 1  ;;  %s2333_s11 = sphi %s2355_s11, %s12_s11   ;;  %s2329_s10 = sphi %s2353_s10, %s2623_s10   ;;  %s2325_s9 = sphi %s2351_s9, %s2622_s9  }
   0x3   : > { %p33_p1 = scmp.ge.s32.totalorder %s31_s12, 3  ;;  %p158_p2 = scmp.lt.s32.totalorder %s2333_s11, 4 }
   0x5   : > { %s2625_s12 = smov (%p33_p1, %s31_s12), 0  ;;  %p159_p3 = pnand %p2069_p0, %p158_p2 }
   0x6   : > { %v2263_v0 = vld [vmem:[%s2620_s1 + $0x4] ss:$16 sps:$4 sm:$0xff] (!%p159_p3)   ;;  %v2265_v1 = vld [vmem:[%s2620_s1 + $0xc] ss:$16 sps:$4 sm:$0xff] (!%p159_p3)   ;;  %v2335_v2 = vmov (!%p159_p3), 0   ;;  %s2070_s19 = sshll.u32 (!%p159_p3), %s2325_s9, 5 }
   0x7   : > { %162 = sbr.rel (%p159_p3) target bundleno = 378 (0x17a), region = 28  ;;  %764 = vmatprep.mubr.bf16.mxu0 (!%p159_p3), %v2335_v2  ;;  %957 = vmatprep.mubr.bf16.mxu1 (!%p159_p3), %v2335_v2  ;;  %v2267_v3 = vld [vmem:[%s2620_s1] ss:$16 sps:$4 sm:$0xff] (!%p159_p3)   ;;  %v2268_v4 = vld [vmem:[%s2620_s1 + $0x8] ss:$16 sps:$4 sm:$0xff] (!%p159_p3)   ;;  %p199_p4 = scmp.lt.s32.totalorder (!%p159_p3), %s2070_s19, 95 }
   0x8   : > { %732 = vmatprep.subr.bf16.mxu0 (!%p159_p3), %v2263_v0  ;;  %925 = vmatprep.subr.bf16.mxu1 (!%p159_p3), %v2265_v1  ;;  %v2269_v5 = vld [vmem:[%s2620_s1 + $0x24] ss:$16 sps:$4 sm:$0xff] (!%p159_p3)   ;;  %v2271_v6 = vld [vmem:[%s2620_s1 + $0x2c] ss:$16 sps:$4 sm:$0xff] (!%p159_p3)   ;;  %v2273_v7 = vld [vmem:[%s2620_s1 + $0x20] ss:$16 sps:$4 sm:$0xff] (!%p159_p3)  }
   0x9   : > { %733 = vmatpush1.bf16.msra.mxu0 (!%p159_p3), %v2267_v3  ;;  %926 = vmatpush1.bf16.msra.mxu1 (!%p159_p3), %v2268_v4  ;;  %v2274_v8 = vld [vmem:[%s2620_s1 + $0x28] ss:$16 sps:$4 sm:$0xff] (!%p159_p3)   ;;  %v2275_v9 = vld [vmem:[%s2620_s1 + $0x44] ss:$16 sps:$4 sm:$0xff] (!%p159_p3)   ;;  %v2277_v10 = vld [vmem:[%s2620_s1 + $0x4c] ss:$16 sps:$4 sm:$0xff] (!%p159_p3)  }
   0xa   : > { %734 = vmatprep.subr.bf16.mxu0 (!%p159_p3), %v2269_v5  ;;  %927 = vmatprep.subr.bf16.mxu1 (!%p159_p3), %v2271_v6  ;;  %v2279_v11 = vld [vmem:[%s2620_s1 + $0x40] ss:$16 sps:$4 sm:$0xff] (!%p159_p3)   ;;  %v2280_v12 = vld [vmem:[%s2620_s1 + $0x48] ss:$16 sps:$4 sm:$0xff] (!%p159_p3)   ;;  %v2281_v13 = vld [vmem:[%s2620_s1 + $0x64] ss:$16 sps:$4 sm:$0xff] (!%p159_p3)  }
   0xb   : > { %v2283_v14 = vld [vmem:[%s2620_s1 + $0x6c] ss:$16 sps:$4 sm:$0xff] (!%p159_p3)   ;;  %v2285_v15 = vld [vmem:[%s2620_s1 + $0x60] ss:$16 sps:$4 sm:$0xff] (!%p159_p3)   ;;  %v2286_v16 = vld [vmem:[%s2620_s1 + $0x68] ss:$16 sps:$4 sm:$0xff] (!%p159_p3)  }
   0xc   : > { %v2287_v17 = vld [vmem:[%s2620_s1 + $0x84] ss:$16 sps:$4 sm:$0xff] (!%p159_p3)   ;;  %v2289_v18 = vld [vmem:[%s2620_s1 + $0x8c] ss:$16 sps:$4 sm:$0xff] (!%p159_p3)   ;;  %v2291_v19 = vld [vmem:[%s2620_s1 + $0x80] ss:$16 sps:$4 sm:$0xff] (!%p159_p3)  }
   0xd   : > { %735 = vmatpush1.bf16.msra.mxu0 (!%p159_p3), %v2273_v7  ;;  %928 = vmatpush1.bf16.msra.mxu1 (!%p159_p3), %v2274_v8  ;;  %v2292_v20 = vld [vmem:[%s2620_s1 + $0x88] ss:$16 sps:$4 sm:$0xff] (!%p159_p3)   ;;  %v2293_v21 = vld [vmem:[%s2620_s1 + $0xa4] ss:$16 sps:$4 sm:$0xff] (!%p159_p3)   ;;  %v2295_v22 = vld [vmem:[%s2620_s1 + $0xac] ss:$16 sps:$4 sm:$0xff] (!%p159_p3)  }
   0xe   : > { %736 = vmatprep.subr.bf16.mxu0 %v2275_v9  ;;  %929 = vmatprep.subr.bf16.mxu1 %v2277_v10  ;;  %s2627_s19 = smov (!%p199_p4, %s2070_s19), 95  ;;  %v2297_v23 = vld [vmem:[%s2620_s1 + $0xa0] ss:$16 sps:$4 sm:$0xff]   ;;  %v2298_v24 = vld [vmem:[%s2620_s1 + $0xa8] ss:$16 sps:$4 sm:$0xff]  }
   0xf   : > { %v2299_v25 = vld [vmem:[%s2620_s1 + $0xc4] ss:$16 sps:$4 sm:$0xff]   ;;  %v2301_v26 = vld [vmem:[%s2620_s1 + $0xcc] ss:$16 sps:$4 sm:$0xff]   ;;  %s2071_s17 = sshll.u32 %s2627_s19, 3  ;;  %s2173_s5 = sshll.u32 %s2627_s19, 4 }
  0x10   : > { %v2303_v27 = vld [vmem:[%s2620_s1 + $0xc0] ss:$16 sps:$4 sm:$0xff]   ;;  %v2304_v28 = vld [vmem:[%s2620_s1 + $0xc8] ss:$16 sps:$4 sm:$0xff]   ;;  %v2305_v29 = vld [vmem:[%s2620_s1 + $0xe4] ss:$16 sps:$4 sm:$0xff]   ;;  %s2470_s28 = scalar_lea.vmem %s2619_s0, %s2071_s17  ;;  %s2544_s8 = scalar_lea.vmem %s2621_s2, %s2173_s5 }
  0x11   : > { %737 = vmatpush1.bf16.msra.mxu0 %v2279_v11  ;;  %930 = vmatpush1.bf16.msra.mxu1 %v2280_v12  ;;  %v2307_v30 = vld [vmem:[%s2620_s1 + $0xec] ss:$16 sps:$4 sm:$0xff]   ;;  %v2309_v31 = vld [vmem:[%s2620_s1 + $0xe0] ss:$16 sps:$4 sm:$0xff]   ;;  %v2310_v32 = vld [vmem:[%s2620_s1 + $0xe8] ss:$16 sps:$4 sm:$0xff]  }
  0x12   : > { %738 = vmatprep.subr.bf16.mxu0 %v2281_v13  ;;  %931 = vmatprep.subr.bf16.mxu1 %v2283_v14  ;;  %v364_v33 = vld [vmem:[%s2470_s28] sm:$0xff]  ;;  %v365_v34 = vld [vmem:[%s2470_s28 + $0x8] sm:$0xff]  ;;  %v366_v36 = vld [vmem:[%s2470_s28 + $0x10] sm:$0xff] }
  0x13   : > { %v524_v35 = vpack.c.bf16 %v365_v34, %v364_v33  ;;  %v367_v37 = vld [vmem:[%s2470_s28 + $0x18] sm:$0xff]  ;;  %v368_v39 = vld [vmem:[%s2470_s28 + $0x20] sm:$0xff]  ;;  %v369_v40 = vld [vmem:[%s2470_s28 + $0x28] sm:$0xff] }
  0x14   : > { %v525_v38 = vpack.c.bf16 %v367_v37, %v366_v36  ;;  %v526_v41 = vpack.c.bf16 %v369_v40, %v368_v39  ;;  %v370_v42 = vld [vmem:[%s2470_s28 + $0x30] sm:$0xff]  ;;  %v371_v43 = vld [vmem:[%s2470_s28 + $0x38] sm:$0xff]  ;;  %v372_v45 = vld [vmem:[%s2470_s28 + $0x40] sm:$0xff] }
  0x15   : > { %739 = vmatpush1.bf16.msra.mxu0 %v2285_v15  ;;  %932 = vmatpush1.bf16.msra.mxu1 %v2286_v16  ;;  %v527_v44 = vpack.c.bf16 %v371_v43, %v370_v42  ;;  %v373_v46 = vld [vmem:[%s2470_s28 + $0x48] sm:$0xff]  ;;  %v374_v48 = vld [vmem:[%s2470_s28 + $0x50] sm:$0xff]  ;;  %v375_v49 = vld [vmem:[%s2470_s28 + $0x58] sm:$0xff] }
  0x16   : > { %740 = vmatprep.subr.bf16.mxu0 %v2287_v17  ;;  %933 = vmatprep.subr.bf16.mxu1 %v2289_v18  ;;  %v528_v47 = vpack.c.bf16 %v373_v46, %v372_v45  ;;  %v529_v50 = vpack.c.bf16 %v375_v49, %v374_v48  ;;  %v376_v51 = vld [vmem:[%s2470_s28 + $0x60] sm:$0xff]  ;;  %v377_v52 = vld [vmem:[%s2470_s28 + $0x68] sm:$0xff]  ;;  %v378_v54 = vld [vmem:[%s2470_s28 + $0x70] sm:$0xff] }
  0x17   : > { %v530_v53 = vpack.c.bf16 %v377_v52, %v376_v51  ;;  %v379_v55 = vld [vmem:[%s2470_s28 + $0x78] sm:$0xff]  ;;  %v380_v57 = vld [vmem:[%s2470_s28 + $0x80] sm:$0xff]  ;;  %v381_v58 = vld [vmem:[%s2470_s28 + $0x88] sm:$0xff] }
  0x18   : > { %v531_v56 = vpack.c.bf16 %v379_v55, %v378_v54  ;;  %v532_v59 = vpack.c.bf16 %v381_v58, %v380_v57  ;;  %v382_v60 = vld [vmem:[%s2470_s28 + $0x90] sm:$0xff]  ;;  %v383_v61 = vld [vmem:[%s2470_s28 + $0x98] sm:$0xff]  ;;  %v384_v63 = vld [vmem:[%s2470_s28 + $0xa0] sm:$0xff] }
  0x19   : > { %741 = vmatpush1.bf16.msra.mxu0 %v2291_v19  ;;  %934 = vmatpush1.bf16.msra.mxu1 %v2292_v20  ;;  %v533_v62 = vpack.c.bf16 %v383_v61, %v382_v60  ;;  %v385_v0 = vld [vmem:[%s2470_s28 + $0xa8] sm:$0xff]  ;;  %v386_v3 = vld [vmem:[%s2470_s28 + $0xb0] sm:$0xff]  ;;  %v387_v4 = vld [vmem:[%s2470_s28 + $0xb8] sm:$0xff] }
  0x1a   : > { %742 = vmatprep.subr.bf16.mxu0 %v2293_v21  ;;  %935 = vmatprep.subr.bf16.mxu1 %v2295_v22  ;;  %v534_v1 = vpack.c.bf16 %v385_v0, %v384_v63  ;;  %v535_v5 = vpack.c.bf16 %v387_v4, %v386_v3  ;;  %v388_v6 = vld [vmem:[%s2470_s28 + $0xc0] sm:$0xff]  ;;  %v389_v7 = vld [vmem:[%s2470_s28 + $0xc8] sm:$0xff]  ;;  %v390_v9 = vld [vmem:[%s2470_s28 + $0xd0] sm:$0xff] }
  0x1b   : > { %v536_v8 = vpack.c.bf16 %v389_v7, %v388_v6  ;;  %v391_v10 = vld [vmem:[%s2470_s28 + $0xd8] sm:$0xff]  ;;  %v392_v12 = vld [vmem:[%s2470_s28 + $0xe0] sm:$0xff]  ;;  %v393_v13 = vld [vmem:[%s2470_s28 + $0xe8] sm:$0xff] }
  0x1c   : > { %v537_v11 = vpack.c.bf16 %v391_v10, %v390_v9  ;;  %v538_v14 = vpack.c.bf16 %v393_v13, %v392_v12  ;;  %v394_v15 = vld [vmem:[%s2470_s28 + $0xf0] sm:$0xff]  ;;  %v395_v16 = vld [vmem:[%s2470_s28 + $0xf8] sm:$0xff] }
  0x1d   : > { %743 = vmatpush1.bf16.msra.mxu0 %v2297_v23  ;;  %936 = vmatpush1.bf16.msra.mxu1 %v2298_v24  ;;  %v539_v17 = vpack.c.bf16 %v395_v16, %v394_v15 }
  0x1e   : > { %744 = vmatprep.subr.bf16.mxu0 %v2299_v25  ;;  %937 = vmatprep.subr.bf16.mxu1 %v2301_v26 }
  0x21   : > { %745 = vmatpush1.bf16.msra.mxu0 %v2303_v27  ;;  %938 = vmatpush1.bf16.msra.mxu1 %v2304_v28 }
  0x22   : > { %746 = vmatprep.subr.bf16.mxu0 %v2305_v29  ;;  %939 = vmatprep.subr.bf16.mxu1 %v2307_v30 }
  0x25   : > { %747 = vmatpush1.bf16.msra.mxu0 %v2309_v31  ;;  %940 = vmatpush1.bf16.msra.mxu1 %v2310_v32 }
  0x28   : > { %765 = vmatmul.mubr.bf16.vlgmr.msra.gmra.mrb[0].mxu0 %v524_v35  ;;  %958 = vmatmul.mubr.bf16.vlgmr.msra.gmra.mrb[0].mxu1 %v524_v35 }
  0x29   : > { %774 = vmatprep.mubr.bf16.mxu0 %v2335_v2  ;;  %967 = vmatprep.mubr.bf16.mxu1 %v2335_v2 }
  0x30   : > { %775 = vmatmul.mubr.bf16.gmra.mrb[4].mxu0 %v525_v38  ;;  %968 = vmatmul.mubr.bf16.gmra.mrb[4].mxu1 %v525_v38 }
  0x31   : > { %784 = vmatprep.mubr.bf16.mxu0 %v2335_v2  ;;  %977 = vmatprep.mubr.bf16.mxu1 %v2335_v2 }
  0x38   : > { %785 = vmatmul.mubr.bf16.gmra.mrb[8].mxu0 %v526_v41  ;;  %978 = vmatmul.mubr.bf16.gmra.mrb[8].mxu1 %v526_v41 }
  0x39   : > { %794 = vmatprep.mubr.bf16.mxu0 %v2335_v2  ;;  %987 = vmatprep.mubr.bf16.mxu1 %v2335_v2 }
  0x40   : > { %795 = vmatmul.mubr.bf16.gmra.mrb[12].mxu0 %v527_v44  ;;  %988 = vmatmul.mubr.bf16.gmra.mrb[12].mxu1 %v527_v44 }
  0x41   : > { %804 = vmatprep.mubr.bf16.mxu0 %v2335_v2  ;;  %997 = vmatprep.mubr.bf16.mxu1 %v2335_v2 }
  0x48   : > { %805 = vmatmul.mubr.bf16.gmra.mrb[16].mxu0 %v528_v47  ;;  %998 = vmatmul.mubr.bf16.gmra.mrb[16].mxu1 %v528_v47 }
  0x49   : > { %814 = vmatprep.mubr.bf16.mxu0 %v2335_v2  ;;  %1007 = vmatprep.mubr.bf16.mxu1 %v2335_v2 }
  0x50   : > { %815 = vmatmul.mubr.bf16.gmra.mrb[20].mxu0 %v529_v50  ;;  %1008 = vmatmul.mubr.bf16.gmra.mrb[20].mxu1 %v529_v50 }
  0x51   : > { %824 = vmatprep.mubr.bf16.mxu0 %v2335_v2  ;;  %1017 = vmatprep.mubr.bf16.mxu1 %v2335_v2 }
  0x58   : > { %825 = vmatmul.mubr.bf16.gmra.mrb[24].mxu0 %v530_v53  ;;  %1018 = vmatmul.mubr.bf16.gmra.mrb[24].mxu1 %v530_v53 }
  0x59   : > { %834 = vmatprep.mubr.bf16.mxu0 %v2335_v2  ;;  %1027 = vmatprep.mubr.bf16.mxu1 %v2335_v2 }
  0x60   : > { %835 = vmatmul.mubr.bf16.gmra.mrb[28].mxu0 %v531_v56  ;;  %1028 = vmatmul.mubr.bf16.gmra.mrb[28].mxu1 %v531_v56 }
  0x61   : > { %844 = vmatprep.mubr.bf16.mxu0 %v2335_v2  ;;  %1037 = vmatprep.mubr.bf16.mxu1 %v2335_v2 }
  0x68   : > { %845 = vmatmul.mubr.bf16.gmra.mrb[32].mxu0 %v532_v59  ;;  %1038 = vmatmul.mubr.bf16.gmra.mrb[32].mxu1 %v532_v59 }
  0x69   : > { %854 = vmatprep.mubr.bf16.mxu0 %v2335_v2  ;;  %1047 = vmatprep.mubr.bf16.mxu1 %v2335_v2 }
  0x70   : > { %855 = vmatmul.mubr.bf16.gmra.mrb[36].mxu0 %v533_v62  ;;  %1048 = vmatmul.mubr.bf16.gmra.mrb[36].mxu1 %v533_v62 }
  0x71   : > { %864 = vmatprep.mubr.bf16.mxu0 %v2335_v2  ;;  %1057 = vmatprep.mubr.bf16.mxu1 %v2335_v2 }
  0x78   : > { %865 = vmatmul.mubr.bf16.gmra.mrb[40].mxu0 %v534_v1  ;;  %1058 = vmatmul.mubr.bf16.gmra.mrb[40].mxu1 %v534_v1 }
  0x79   : > { %874 = vmatprep.mubr.bf16.mxu0 %v2335_v2  ;;  %1067 = vmatprep.mubr.bf16.mxu1 %v2335_v2 }
  0x80   : > { %875 = vmatmul.mubr.bf16.gmra.mrb[44].mxu0 %v535_v5  ;;  %1068 = vmatmul.mubr.bf16.gmra.mrb[44].mxu1 %v535_v5 }
  0x81   : > { %884 = vmatprep.mubr.bf16.mxu0 %v2335_v2  ;;  %1077 = vmatprep.mubr.bf16.mxu1 %v2335_v2 }
  0x88   : > { %885 = vmatmul.mubr.bf16.gmra.mrb[48].mxu0 %v536_v8  ;;  %1078 = vmatmul.mubr.bf16.gmra.mrb[48].mxu1 %v536_v8 }
  0x89   : > { %894 = vmatprep.mubr.bf16.mxu0 %v2335_v2  ;;  %1087 = vmatprep.mubr.bf16.mxu1 %v2335_v2 }
  0x90   : > { %895 = vmatmul.mubr.bf16.gmra.mrb[52].mxu0 %v537_v11  ;;  %1088 = vmatmul.mubr.bf16.gmra.mrb[52].mxu1 %v537_v11 }
  0x91   : > { %904 = vmatprep.mubr.bf16.mxu0 %v2335_v2  ;;  %1097 = vmatprep.mubr.bf16.mxu1 %v2335_v2 }
  0x98   : > { %905 = vmatmul.mubr.bf16.gmra.mrb[56].mxu0 %v538_v14  ;;  %1098 = vmatmul.mubr.bf16.gmra.mrb[56].mxu1 %v538_v14 }
  0x99   : > { %914 = vmatprep.mubr.bf16.mxu0 %v2335_v2  ;;  %1107 = vmatprep.mubr.bf16.mxu1 %v2335_v2 }
  0xa0   : > { %915 = vmatmul.mubr.bf16.gmra.mrb[60].mxu0 %v539_v17  ;;  %1108 = vmatmul.mubr.bf16.gmra.mrb[60].mxu1 %v539_v17 }
  0xfb   : > { %v766_v18 = vpop.f32.mrb[0].mxu0  ;;  %v959_v19 = vpop.f32.mrb[0].mxu1 }
  0xfc   : > { %v768_v20 = vpop.f32.mrb[1].mxu0  ;;  %v961_v21 = vpop.f32.mrb[1].mxu1 }
  0xfd   : > { %v2174_v2 = vpack.c.bf16 %v768_v20, %v766_v18  ;;  %v2175_v22 = vpack.c.bf16 %v961_v21, %v959_v19  ;;  %v770_v23 = vpop.f32.mrb[2].mxu0  ;;  %v963_v24 = vpop.f32.mrb[2].mxu1 }
  0xfe   : > { %v772_v25 = vpop.f32.mrb[3].mxu0  ;;  %v965_v26 = vpop.f32.mrb[3].mxu1 }
  0xff   : > { %1889 = vst [vmem:[%s2544_s8] sm:$0xff] %v2174_v2  ;;  %1890 = vst [vmem:[%s2544_s8 + $0x8] sm:$0xff] %v2175_v22  ;;  %v2176_v27 = vpack.c.bf16 %v772_v25, %v770_v23  ;;  %v2177_v28 = vpack.c.bf16 %v965_v26, %v963_v24 }
 0x101   : > { %1891 = vst [vmem:[%s2544_s8 + $0x10] sm:$0xff] %v2176_v27  ;;  %1892 = vst [vmem:[%s2544_s8 + $0x18] sm:$0xff] %v2177_v28 }
 0x103   : > { %v776_v29 = vpop.f32.mrb[4].mxu0  ;;  %v969_v30 = vpop.f32.mrb[4].mxu1 }
 0x104   : > { %v778_v31 = vpop.f32.mrb[5].mxu0  ;;  %v971_v32 = vpop.f32.mrb[5].mxu1 }
 0x105   : > { %v2178_v33 = vpack.c.bf16 %v778_v31, %v776_v29  ;;  %v2179_v34 = vpack.c.bf16 %v971_v32, %v969_v30  ;;  %v780_v35 = vpop.f32.mrb[6].mxu0  ;;  %v973_v36 = vpop.f32.mrb[6].mxu1 }
 0x106   : > { %v782_v37 = vpop.f32.mrb[7].mxu0  ;;  %v975_v38 = vpop.f32.mrb[7].mxu1 }
 0x107   : > { %1893 = vst [vmem:[%s2544_s8 + $0x20] sm:$0xff] %v2178_v33  ;;  %1894 = vst [vmem:[%s2544_s8 + $0x28] sm:$0xff] %v2179_v34  ;;  %v2180_v39 = vpack.c.bf16 %v782_v37, %v780_v35  ;;  %v2181_v40 = vpack.c.bf16 %v975_v38, %v973_v36 }
 0x109   : > { %1895 = vst [vmem:[%s2544_s8 + $0x30] sm:$0xff] %v2180_v39  ;;  %1896 = vst [vmem:[%s2544_s8 + $0x38] sm:$0xff] %v2181_v40 }
 0x10b   : > { %v786_v41 = vpop.f32.mrb[8].mxu0  ;;  %v979_v42 = vpop.f32.mrb[8].mxu1 }
 0x10c   : > { %v788_v43 = vpop.f32.mrb[9].mxu0  ;;  %v981_v44 = vpop.f32.mrb[9].mxu1 }
 0x10d   : > { %v2182_v45 = vpack.c.bf16 %v788_v43, %v786_v41  ;;  %v2183_v46 = vpack.c.bf16 %v981_v44, %v979_v42  ;;  %v790_v47 = vpop.f32.mrb[10].mxu0  ;;  %v983_v48 = vpop.f32.mrb[10].mxu1 }
 0x10e   : > { %v792_v49 = vpop.f32.mrb[11].mxu0  ;;  %v985_v50 = vpop.f32.mrb[11].mxu1 }
 0x10f   : > { %1897 = vst [vmem:[%s2544_s8 + $0x40] sm:$0xff] %v2182_v45  ;;  %1898 = vst [vmem:[%s2544_s8 + $0x48] sm:$0xff] %v2183_v46  ;;  %v2184_v51 = vpack.c.bf16 %v792_v49, %v790_v47  ;;  %v2185_v52 = vpack.c.bf16 %v985_v50, %v983_v48 }
 0x111   : > { %1899 = vst [vmem:[%s2544_s8 + $0x50] sm:$0xff] %v2184_v51  ;;  %1900 = vst [vmem:[%s2544_s8 + $0x58] sm:$0xff] %v2185_v52 }
 0x113   : > { %v796_v53 = vpop.f32.mrb[12].mxu0  ;;  %v989_v54 = vpop.f32.mrb[12].mxu1 }
 0x114   : > { %v798_v55 = vpop.f32.mrb[13].mxu0  ;;  %v991_v56 = vpop.f32.mrb[13].mxu1 }
 0x115   : > { %v2186_v57 = vpack.c.bf16 %v798_v55, %v796_v53  ;;  %v2187_v58 = vpack.c.bf16 %v991_v56, %v989_v54  ;;  %v800_v59 = vpop.f32.mrb[14].mxu0  ;;  %v993_v60 = vpop.f32.mrb[14].mxu1 }
 0x116   : > { %v802_v61 = vpop.f32.mrb[15].mxu0  ;;  %v995_v62 = vpop.f32.mrb[15].mxu1 }
 0x117   : > { %1901 = vst [vmem:[%s2544_s8 + $0x60] sm:$0xff] %v2186_v57  ;;  %1902 = vst [vmem:[%s2544_s8 + $0x68] sm:$0xff] %v2187_v58  ;;  %v2188_v63 = vpack.c.bf16 %v802_v61, %v800_v59  ;;  %v2189_v0 = vpack.c.bf16 %v995_v62, %v993_v60 }
 0x119   : > { %1903 = vst [vmem:[%s2544_s8 + $0x70] sm:$0xff] %v2188_v63  ;;  %1904 = vst [vmem:[%s2544_s8 + $0x78] sm:$0xff] %v2189_v0 }
 0x11b   : > { %v806_v1 = vpop.f32.mrb[16].mxu0  ;;  %v999_v3 = vpop.f32.mrb[16].mxu1 }
 0x11c   : > { %v808_v4 = vpop.f32.mrb[17].mxu0  ;;  %v1001_v5 = vpop.f32.mrb[17].mxu1 }
 0x11d   : > { %v2190_v6 = vpack.c.bf16 %v808_v4, %v806_v1  ;;  %v2191_v7 = vpack.c.bf16 %v1001_v5, %v999_v3  ;;  %v810_v8 = vpop.f32.mrb[18].mxu0  ;;  %v1003_v9 = vpop.f32.mrb[18].mxu1 }
 0x11e   : > { %v812_v10 = vpop.f32.mrb[19].mxu0  ;;  %v1005_v11 = vpop.f32.mrb[19].mxu1 }
 0x11f   : > { %1905 = vst [vmem:[%s2544_s8 + $0x80] sm:$0xff] %v2190_v6  ;;  %1906 = vst [vmem:[%s2544_s8 + $0x88] sm:$0xff] %v2191_v7  ;;  %v2192_v12 = vpack.c.bf16 %v812_v10, %v810_v8  ;;  %v2193_v13 = vpack.c.bf16 %v1005_v11, %v1003_v9 }
 0x121   : > { %1907 = vst [vmem:[%s2544_s8 + $0x90] sm:$0xff] %v2192_v12  ;;  %1908 = vst [vmem:[%s2544_s8 + $0x98] sm:$0xff] %v2193_v13 }
 0x123   : > { %v816_v14 = vpop.f32.mrb[20].mxu0  ;;  %v1009_v15 = vpop.f32.mrb[20].mxu1 }
 0x124   : > { %v818_v16 = vpop.f32.mrb[21].mxu0  ;;  %v1011_v17 = vpop.f32.mrb[21].mxu1 }
 0x125   : > { %v2194_v18 = vpack.c.bf16 %v818_v16, %v816_v14  ;;  %v2195_v19 = vpack.c.bf16 %v1011_v17, %v1009_v15  ;;  %v820_v20 = vpop.f32.mrb[22].mxu0  ;;  %v1013_v21 = vpop.f32.mrb[22].mxu1 }
 0x126   : > { %v822_v2 = vpop.f32.mrb[23].mxu0  ;;  %v1015_v22 = vpop.f32.mrb[23].mxu1 }
 0x127   : > { %1909 = vst [vmem:[%s2544_s8 + $0xa0] sm:$0xff] %v2194_v18  ;;  %1910 = vst [vmem:[%s2544_s8 + $0xa8] sm:$0xff] %v2195_v19  ;;  %v2196_v23 = vpack.c.bf16 %v822_v2, %v820_v20  ;;  %v2197_v24 = vpack.c.bf16 %v1015_v22, %v1013_v21 }
 0x129   : > { %1911 = vst [vmem:[%s2544_s8 + $0xb0] sm:$0xff] %v2196_v23  ;;  %1912 = vst [vmem:[%s2544_s8 + $0xb8] sm:$0xff] %v2197_v24 }
 0x12b   : > { %v826_v25 = vpop.f32.mrb[24].mxu0  ;;  %v1019_v26 = vpop.f32.mrb[24].mxu1 }
 0x12c   : > { %v828_v27 = vpop.f32.mrb[25].mxu0  ;;  %v1021_v28 = vpop.f32.mrb[25].mxu1 }
 0x12d   : > { %v2198_v29 = vpack.c.bf16 %v828_v27, %v826_v25  ;;  %v2199_v30 = vpack.c.bf16 %v1021_v28, %v1019_v26  ;;  %v830_v31 = vpop.f32.mrb[26].mxu0  ;;  %v1023_v32 = vpop.f32.mrb[26].mxu1 }
 0x12e   : > { %v832_v33 = vpop.f32.mrb[27].mxu0  ;;  %v1025_v34 = vpop.f32.mrb[27].mxu1 }
 0x12f   : > { %1913 = vst [vmem:[%s2544_s8 + $0xc0] sm:$0xff] %v2198_v29  ;;  %1914 = vst [vmem:[%s2544_s8 + $0xc8] sm:$0xff] %v2199_v30  ;;  %v2200_v35 = vpack.c.bf16 %v832_v33, %v830_v31  ;;  %v2201_v36 = vpack.c.bf16 %v1025_v34, %v1023_v32 }
 0x131   : > { %1915 = vst [vmem:[%s2544_s8 + $0xd0] sm:$0xff] %v2200_v35  ;;  %1916 = vst [vmem:[%s2544_s8 + $0xd8] sm:$0xff] %v2201_v36 }
 0x133   : > { %v836_v37 = vpop.f32.mrb[28].mxu0  ;;  %v1029_v38 = vpop.f32.mrb[28].mxu1 }
 0x134   : > { %v838_v39 = vpop.f32.mrb[29].mxu0  ;;  %v1031_v40 = vpop.f32.mrb[29].mxu1 }
 0x135   : > { %v2202_v41 = vpack.c.bf16 %v838_v39, %v836_v37  ;;  %v2203_v42 = vpack.c.bf16 %v1031_v40, %v1029_v38  ;;  %v840_v43 = vpop.f32.mrb[30].mxu0  ;;  %v1033_v44 = vpop.f32.mrb[30].mxu1 }
 0x136   : > { %v842_v45 = vpop.f32.mrb[31].mxu0  ;;  %v1035_v46 = vpop.f32.mrb[31].mxu1 }
 0x137   : > { %1917 = vst [vmem:[%s2544_s8 + $0xe0] sm:$0xff] %v2202_v41  ;;  %1918 = vst [vmem:[%s2544_s8 + $0xe8] sm:$0xff] %v2203_v42  ;;  %v2204_v47 = vpack.c.bf16 %v842_v45, %v840_v43  ;;  %v2205_v48 = vpack.c.bf16 %v1035_v46, %v1033_v44 }
 0x139   : > { %1919 = vst [vmem:[%s2544_s8 + $0xf0] sm:$0xff] %v2204_v47  ;;  %1920 = vst [vmem:[%s2544_s8 + $0xf8] sm:$0xff] %v2205_v48 }
 0x13b   : > { %v846_v49 = vpop.f32.mrb[32].mxu0  ;;  %v1039_v50 = vpop.f32.mrb[32].mxu1 }
 0x13c   : > { %v848_v51 = vpop.f32.mrb[33].mxu0  ;;  %v1041_v52 = vpop.f32.mrb[33].mxu1 }
 0x13d   : > { %v2206_v53 = vpack.c.bf16 %v848_v51, %v846_v49  ;;  %v2207_v54 = vpack.c.bf16 %v1041_v52, %v1039_v50  ;;  %v850_v55 = vpop.f32.mrb[34].mxu0  ;;  %v1043_v56 = vpop.f32.mrb[34].mxu1 }
 0x13e   : > { %v852_v57 = vpop.f32.mrb[35].mxu0  ;;  %v1045_v58 = vpop.f32.mrb[35].mxu1 }
 0x13f   : > { %1921 = vst [vmem:[%s2544_s8 + $0x100] sm:$0xff] %v2206_v53  ;;  %1922 = vst [vmem:[%s2544_s8 + $0x108] sm:$0xff] %v2207_v54  ;;  %v2208_v59 = vpack.c.bf16 %v852_v57, %v850_v55  ;;  %v2209_v60 = vpack.c.bf16 %v1045_v58, %v1043_v56 }
 0x141   : > { %1923 = vst [vmem:[%s2544_s8 + $0x110] sm:$0xff] %v2208_v59  ;;  %1924 = vst [vmem:[%s2544_s8 + $0x118] sm:$0xff] %v2209_v60 }
 0x143   : > { %v856_v61 = vpop.f32.mrb[36].mxu0  ;;  %v1049_v62 = vpop.f32.mrb[36].mxu1 }
 0x144   : > { %v858_v63 = vpop.f32.mrb[37].mxu0  ;;  %v1051_v0 = vpop.f32.mrb[37].mxu1 }
 0x145   : > { %v2210_v1 = vpack.c.bf16 %v858_v63, %v856_v61  ;;  %v2211_v3 = vpack.c.bf16 %v1051_v0, %v1049_v62  ;;  %v860_v4 = vpop.f32.mrb[38].mxu0  ;;  %v1053_v5 = vpop.f32.mrb[38].mxu1 }
 0x146   : > { %v862_v6 = vpop.f32.mrb[39].mxu0  ;;  %v1055_v7 = vpop.f32.mrb[39].mxu1 }
 0x147   : > { %1925 = vst [vmem:[%s2544_s8 + $0x120] sm:$0xff] %v2210_v1  ;;  %1926 = vst [vmem:[%s2544_s8 + $0x128] sm:$0xff] %v2211_v3  ;;  %v2212_v8 = vpack.c.bf16 %v862_v6, %v860_v4  ;;  %v2213_v9 = vpack.c.bf16 %v1055_v7, %v1053_v5 }
 0x149   : > { %1927 = vst [vmem:[%s2544_s8 + $0x130] sm:$0xff] %v2212_v8  ;;  %1928 = vst [vmem:[%s2544_s8 + $0x138] sm:$0xff] %v2213_v9 }
 0x14b   : > { %v866_v10 = vpop.f32.mrb[40].mxu0  ;;  %v1059_v11 = vpop.f32.mrb[40].mxu1 }
 0x14c   : > { %v868_v12 = vpop.f32.mrb[41].mxu0  ;;  %v1061_v13 = vpop.f32.mrb[41].mxu1 }
 0x14d   : > { %v2214_v14 = vpack.c.bf16 %v868_v12, %v866_v10  ;;  %v2215_v15 = vpack.c.bf16 %v1061_v13, %v1059_v11  ;;  %v870_v16 = vpop.f32.mrb[42].mxu0  ;;  %v1063_v17 = vpop.f32.mrb[42].mxu1 }
 0x14e   : > { %v872_v18 = vpop.f32.mrb[43].mxu0  ;;  %v1065_v19 = vpop.f32.mrb[43].mxu1 }
 0x14f   : > { %1929 = vst [vmem:[%s2544_s8 + $0x140] sm:$0xff] %v2214_v14  ;;  %1930 = vst [vmem:[%s2544_s8 + $0x148] sm:$0xff] %v2215_v15  ;;  %v2216_v20 = vpack.c.bf16 %v872_v18, %v870_v16  ;;  %v2217_v21 = vpack.c.bf16 %v1065_v19, %v1063_v17 }
 0x151   : > { %1931 = vst [vmem:[%s2544_s8 + $0x150] sm:$0xff] %v2216_v20  ;;  %1932 = vst [vmem:[%s2544_s8 + $0x158] sm:$0xff] %v2217_v21 }
 0x153   : > { %v876_v2 = vpop.f32.mrb[44].mxu0  ;;  %v1069_v22 = vpop.f32.mrb[44].mxu1 }
 0x154   : > { %v878_v23 = vpop.f32.mrb[45].mxu0  ;;  %v1071_v24 = vpop.f32.mrb[45].mxu1 }
 0x155   : > { %v2218_v25 = vpack.c.bf16 %v878_v23, %v876_v2  ;;  %v2219_v26 = vpack.c.bf16 %v1071_v24, %v1069_v22  ;;  %v880_v27 = vpop.f32.mrb[46].mxu0  ;;  %v1073_v28 = vpop.f32.mrb[46].mxu1 }
 0x156   : > { %v882_v29 = vpop.f32.mrb[47].mxu0  ;;  %v1075_v30 = vpop.f32.mrb[47].mxu1 }
 0x157   : > { %1933 = vst [vmem:[%s2544_s8 + $0x160] sm:$0xff] %v2218_v25  ;;  %1934 = vst [vmem:[%s2544_s8 + $0x168] sm:$0xff] %v2219_v26  ;;  %v2220_v31 = vpack.c.bf16 %v882_v29, %v880_v27  ;;  %v2221_v32 = vpack.c.bf16 %v1075_v30, %v1073_v28 }
 0x159   : > { %1935 = vst [vmem:[%s2544_s8 + $0x170] sm:$0xff] %v2220_v31  ;;  %1936 = vst [vmem:[%s2544_s8 + $0x178] sm:$0xff] %v2221_v32 }
 0x15b   : > { %v886_v33 = vpop.f32.mrb[48].mxu0  ;;  %v1079_v34 = vpop.f32.mrb[48].mxu1 }
 0x15c   : > { %v888_v35 = vpop.f32.mrb[49].mxu0  ;;  %v1081_v36 = vpop.f32.mrb[49].mxu1 }
 0x15d   : > { %v2222_v37 = vpack.c.bf16 %v888_v35, %v886_v33  ;;  %v2223_v38 = vpack.c.bf16 %v1081_v36, %v1079_v34  ;;  %v890_v39 = vpop.f32.mrb[50].mxu0  ;;  %v1083_v40 = vpop.f32.mrb[50].mxu1 }
 0x15e   : > { %v892_v41 = vpop.f32.mrb[51].mxu0  ;;  %v1085_v42 = vpop.f32.mrb[51].mxu1 }
 0x15f   : > { %1937 = vst [vmem:[%s2544_s8 + $0x180] sm:$0xff] %v2222_v37  ;;  %1938 = vst [vmem:[%s2544_s8 + $0x188] sm:$0xff] %v2223_v38  ;;  %v2224_v43 = vpack.c.bf16 %v892_v41, %v890_v39  ;;  %v2225_v44 = vpack.c.bf16 %v1085_v42, %v1083_v40 }
 0x161   : > { %1939 = vst [vmem:[%s2544_s8 + $0x190] sm:$0xff] %v2224_v43  ;;  %1940 = vst [vmem:[%s2544_s8 + $0x198] sm:$0xff] %v2225_v44 }
 0x163   : > { %v896_v45 = vpop.f32.mrb[52].mxu0  ;;  %v1089_v46 = vpop.f32.mrb[52].mxu1 }
 0x164   : > { %v898_v47 = vpop.f32.mrb[53].mxu0  ;;  %v1091_v48 = vpop.f32.mrb[53].mxu1 }
 0x165   : > { %v2226_v49 = vpack.c.bf16 %v898_v47, %v896_v45  ;;  %v2227_v50 = vpack.c.bf16 %v1091_v48, %v1089_v46  ;;  %v900_v51 = vpop.f32.mrb[54].mxu0  ;;  %v1093_v52 = vpop.f32.mrb[54].mxu1 }
 0x166   : > { %v902_v53 = vpop.f32.mrb[55].mxu0  ;;  %v1095_v54 = vpop.f32.mrb[55].mxu1 }
 0x167   : > { %1941 = vst [vmem:[%s2544_s8 + $0x1a0] sm:$0xff] %v2226_v49  ;;  %1942 = vst [vmem:[%s2544_s8 + $0x1a8] sm:$0xff] %v2227_v50  ;;  %v2228_v55 = vpack.c.bf16 %v902_v53, %v900_v51  ;;  %v2229_v56 = vpack.c.bf16 %v1095_v54, %v1093_v52 }
 0x169   : > { %1943 = vst [vmem:[%s2544_s8 + $0x1b0] sm:$0xff] %v2228_v55  ;;  %1944 = vst [vmem:[%s2544_s8 + $0x1b8] sm:$0xff] %v2229_v56 }
 0x16b   : > { %v906_v57 = vpop.f32.mrb[56].mxu0  ;;  %v1099_v58 = vpop.f32.mrb[56].mxu1 }
 0x16c   : > { %v908_v59 = vpop.f32.mrb[57].mxu0  ;;  %v1101_v60 = vpop.f32.mrb[57].mxu1 }
 0x16d   : > { %v2230_v61 = vpack.c.bf16 %v908_v59, %v906_v57  ;;  %v2231_v62 = vpack.c.bf16 %v1101_v60, %v1099_v58  ;;  %v910_v63 = vpop.f32.mrb[58].mxu0  ;;  %v1103_v0 = vpop.f32.mrb[58].mxu1 }
 0x16e   : > { %v912_v1 = vpop.f32.mrb[59].mxu0  ;;  %v1105_v3 = vpop.f32.mrb[59].mxu1 }
 0x16f   : > { %1945 = vst [vmem:[%s2544_s8 + $0x1c0] sm:$0xff] %v2230_v61  ;;  %1946 = vst [vmem:[%s2544_s8 + $0x1c8] sm:$0xff] %v2231_v62  ;;  %v2232_v4 = vpack.c.bf16 %v912_v1, %v910_v63  ;;  %v2233_v5 = vpack.c.bf16 %v1105_v3, %v1103_v0 }
 0x171   : > { %1947 = vst [vmem:[%s2544_s8 + $0x1d0] sm:$0xff] %v2232_v4  ;;  %1948 = vst [vmem:[%s2544_s8 + $0x1d8] sm:$0xff] %v2233_v5 }
 0x173   : > { %v916_v6 = vpop.f32.mrb[60].mxu0  ;;  %v1109_v7 = vpop.f32.mrb[60].mxu1 }
 0x174   : > { %v918_v8 = vpop.f32.mrb[61].mxu0  ;;  %v1111_v9 = vpop.f32.mrb[61].mxu1 }
 0x175   : > { %v2234_v10 = vpack.c.bf16 %v918_v8, %v916_v6  ;;  %v2235_v11 = vpack.c.bf16 %v1111_v9, %v1109_v7  ;;  %v920_v12 = vpop.f32.mrb[62].mxu0  ;;  %v1113_v13 = vpop.f32.mrb[62].mxu1 }
 0x176   : > { %v922_v14 = vpop.f32.mrb[63].mxu0  ;;  %v1115_v15 = vpop.f32.mrb[63].mxu1 }
 0x177   : > { %1949 = vst [vmem:[%s2544_s8 + $0x1e0] sm:$0xff] %v2234_v10  ;;  %1950 = vst [vmem:[%s2544_s8 + $0x1e8] sm:$0xff] %v2235_v11  ;;  %v2236_v16 = vpack.c.bf16 %v922_v14, %v920_v12  ;;  %v2237_v17 = vpack.c.bf16 %v1115_v15, %v1113_v13 }
 0x179   : > { %1951 = vst [vmem:[%s2544_s8 + $0x1f0] sm:$0xff] %v2236_v16  ;;  %1952 = vst [vmem:[%s2544_s8 + $0x1f8] sm:$0xff] %v2237_v17 }
 0x17a PF: > { %s12_s11 = sadd.s32 1, %s2333_s11   ;;  %s2622_s9 = smov %s2329_s10 }
 0x17b   : > { %p9_p5 = scmp.ge.s32.totalorder %s12_s11, 5   ;;  %s2623_s10 = smov %s2625_s12 }
 0x17d   :  { %11 = sbr.rel (!%p9_p5) target bundleno = 2 (0x2), region = 69 }

// kernel: rgcn_forward.9
= control target key start
LH: loop header
LB: loop body
LE: loop exit
PB: predicated region body
PF: predicated region fallthrough
CT: control target
= control target key end

     0   :  { %s2747_s21 = smov 0   ;;  %s2749_s22 = smov 0   ;;  %s3211_s0 = inlined_call_operand.vmem [shape: f32[768,128], index: 0, kind: input, shape index: {}]   ;;  %s3212_s1 = inlined_call_operand.vmem [shape: bf16[128,512], index: 1, kind: input, shape index: {}]   ;;  %s3213_s2 = inlined_call_operand.vmem [shape: f32[1,128], index: 2, kind: input, shape index: {}]   ;;  %s3214_s3 = inlined_call_operand.vmem [shape: f32[1,128], index: 3, kind: input, shape index: {}]   ;;  %s3215_s4 = inlined_call_operand.vmem [shape: f32[1,128], index: 4, kind: input, shape index: {}]   ;;  %s3216_s5 = inlined_call_operand.vmem [shape: f32[1,128], index: 5, kind: input, shape index: {}]   ;;  %s3217_s6 = inlined_call_operand.vmem [shape: bf16[768,512], index: 6, kind: output, shape index: {}]  }
   0x1   :  { %s2751_s23 = smov 0  }
   0x2 LB: > { %s35_s24 = sadd.s32 1, %s2705_s22  ;;  %p2441_p0 = scmp.ge.s32.totalorder %s2709_s23, 1  ;;  %s2709_s23 = sphi %s2751_s23, %s16_s23   ;;  %s2705_s22 = sphi %s2749_s22, %s3219_s22   ;;  %s2701_s21 = sphi %s2747_s21, %s3218_s21  }
   0x3   : > { %p37_p1 = scmp.ge.s32.totalorder %s35_s24, 3  ;;  %p290_p2 = scmp.lt.s32.totalorder %s2709_s23, 4 }
   0x5   : > { %s3221_s24 = smov (%p37_p1, %s35_s24), 0  ;;  %p291_p3 = pnand %p2441_p0, %p290_p2 }
   0x6   : > { %v2639_v0 = vld [vmem:[%s3212_s1 + $0x4] ss:$16 sps:$4 sm:$0xff] (!%p291_p3)   ;;  %v2641_v1 = vld [vmem:[%s3212_s1 + $0xc] ss:$16 sps:$4 sm:$0xff] (!%p291_p3)   ;;  %v2711_v2 = vmov (!%p291_p3), 0   ;;  %s2442_s11 = sshll.u32 (!%p291_p3), %s2701_s21, 5 }
   0x7   : > { %294 = sbr.rel (%p291_p3) target bundleno = 378 (0x17a), region = 44  ;;  %1084 = vmatprep.mubr.bf16.mxu0 (!%p291_p3), %v2711_v2  ;;  %1277 = vmatprep.mubr.bf16.mxu1 (!%p291_p3), %v2711_v2  ;;  %v2643_v3 = vld [vmem:[%s3212_s1] ss:$16 sps:$4 sm:$0xff] (!%p291_p3)   ;;  %v2644_v4 = vld [vmem:[%s3212_s1 + $0x8] ss:$16 sps:$4 sm:$0xff] (!%p291_p3)   ;;  %p351_p4 = scmp.lt.s32.totalorder (!%p291_p3), %s2442_s11, 95 }
   0x8   : > { %1052 = vmatprep.subr.bf16.mxu0 (!%p291_p3), %v2639_v0  ;;  %1245 = vmatprep.subr.bf16.mxu1 (!%p291_p3), %v2641_v1  ;;  %v2645_v5 = vld [vmem:[%s3212_s1 + $0x24] ss:$16 sps:$4 sm:$0xff] (!%p291_p3)   ;;  %v2647_v6 = vld [vmem:[%s3212_s1 + $0x2c] ss:$16 sps:$4 sm:$0xff] (!%p291_p3)   ;;  %v2649_v7 = vld [vmem:[%s3212_s1 + $0x20] ss:$16 sps:$4 sm:$0xff] (!%p291_p3)  }
   0x9   : > { %1053 = vmatpush1.bf16.msra.mxu0 (!%p291_p3), %v2643_v3  ;;  %1246 = vmatpush1.bf16.msra.mxu1 (!%p291_p3), %v2644_v4  ;;  %v2650_v8 = vld [vmem:[%s3212_s1 + $0x28] ss:$16 sps:$4 sm:$0xff] (!%p291_p3)   ;;  %v2651_v9 = vld [vmem:[%s3212_s1 + $0x44] ss:$16 sps:$4 sm:$0xff] (!%p291_p3)   ;;  %v2653_v10 = vld [vmem:[%s3212_s1 + $0x4c] ss:$16 sps:$4 sm:$0xff] (!%p291_p3)  }
   0xa   : > { %1054 = vmatprep.subr.bf16.mxu0 (!%p291_p3), %v2645_v5  ;;  %1247 = vmatprep.subr.bf16.mxu1 (!%p291_p3), %v2647_v6  ;;  %v2655_v11 = vld [vmem:[%s3212_s1 + $0x40] ss:$16 sps:$4 sm:$0xff] (!%p291_p3)   ;;  %v2656_v12 = vld [vmem:[%s3212_s1 + $0x48] ss:$16 sps:$4 sm:$0xff] (!%p291_p3)   ;;  %v2657_v13 = vld [vmem:[%s3212_s1 + $0x64] ss:$16 sps:$4 sm:$0xff] (!%p291_p3)  }
   0xb   : > { %v2659_v14 = vld [vmem:[%s3212_s1 + $0x6c] ss:$16 sps:$4 sm:$0xff] (!%p291_p3)   ;;  %v2661_v15 = vld [vmem:[%s3212_s1 + $0x60] ss:$16 sps:$4 sm:$0xff] (!%p291_p3)   ;;  %v2662_v16 = vld [vmem:[%s3212_s1 + $0x68] ss:$16 sps:$4 sm:$0xff] (!%p291_p3)  }
   0xc   : > { %v2663_v17 = vld [vmem:[%s3212_s1 + $0x84] ss:$16 sps:$4 sm:$0xff] (!%p291_p3)   ;;  %v2665_v18 = vld [vmem:[%s3212_s1 + $0x8c] ss:$16 sps:$4 sm:$0xff] (!%p291_p3)   ;;  %v2667_v19 = vld [vmem:[%s3212_s1 + $0x80] ss:$16 sps:$4 sm:$0xff] (!%p291_p3)  }
   0xd   : > { %1055 = vmatpush1.bf16.msra.mxu0 (!%p291_p3), %v2649_v7  ;;  %1248 = vmatpush1.bf16.msra.mxu1 (!%p291_p3), %v2650_v8  ;;  %v2668_v20 = vld [vmem:[%s3212_s1 + $0x88] ss:$16 sps:$4 sm:$0xff] (!%p291_p3)   ;;  %v2669_v21 = vld [vmem:[%s3212_s1 + $0xa4] ss:$16 sps:$4 sm:$0xff] (!%p291_p3)   ;;  %v2671_v22 = vld [vmem:[%s3212_s1 + $0xac] ss:$16 sps:$4 sm:$0xff] (!%p291_p3)  }
   0xe   : > { %1056 = vmatprep.subr.bf16.mxu0 %v2651_v9  ;;  %1249 = vmatprep.subr.bf16.mxu1 %v2653_v10  ;;  %s3223_s11 = smov (!%p351_p4, %s2442_s11), 95  ;;  %v2673_v23 = vld [vmem:[%s3212_s1 + $0xa0] ss:$16 sps:$4 sm:$0xff]   ;;  %v2674_v24 = vld [vmem:[%s3212_s1 + $0xa8] ss:$16 sps:$4 sm:$0xff]  }
   0xf   : > { %s2443_s25 = sshll.u32 %s3223_s11, 3  ;;  %v2675_v25 = vld [vmem:[%s3212_s1 + $0xc4] ss:$16 sps:$4 sm:$0xff]   ;;  %v2677_v26 = vld [vmem:[%s3212_s1 + $0xcc] ss:$16 sps:$4 sm:$0xff]  }
  0x10   : > { %s2842_s8 = scalar_lea.vmem %s3211_s0, %s2443_s25  ;;  %v2679_v29 = vld [vmem:[%s3212_s1 + $0xc0] ss:$16 sps:$4 sm:$0xff]   ;;  %v2680_v30 = vld [vmem:[%s3212_s1 + $0xc8] ss:$16 sps:$4 sm:$0xff]   ;;  %v2681_v33 = vld [vmem:[%s3212_s1 + $0xe4] ss:$16 sps:$4 sm:$0xff]  }
  0x11   : > { %1057 = vmatpush1.bf16.msra.mxu0 %v2655_v11  ;;  %1250 = vmatpush1.bf16.msra.mxu1 %v2656_v12  ;;  %v528_v27 = vld [vmem:[%s2842_s8] sm:$0xff]  ;;  %v529_v28 = vld [vmem:[%s2842_s8 + $0x8] sm:$0xff]  ;;  %v530_v36 = vld [vmem:[%s2842_s8 + $0x10] sm:$0xff] }
  0x12   : > { %1058 = vmatprep.subr.bf16.mxu0 %v2657_v13  ;;  %1251 = vmatprep.subr.bf16.mxu1 %v2659_v14  ;;  %v2867_v31 = vld [vmem:[%s3213_s2] ss:$0 sm:$0xff]  ;;  %v531_v37 = vld [vmem:[%s2842_s8 + $0x18] sm:$0xff]  ;;  %v533_v42 = vld [vmem:[%s2842_s8 + $0x28] sm:$0xff] }
  0x13   : > { %v2872_v32 = vld [vmem:[%s3214_s3] ss:$0 sm:$0xff]  ;;  %v567_v34 = vsub.f32 %v528_v27, %v2867_v31  ;;  %v568_v35 = vsub.f32 %v529_v28, %v2867_v31  ;;  %v569_v39 = vsub.f32 %v530_v36, %v2867_v31  ;;  %v570_v40 = vsub.f32 %v531_v37, %v2867_v31  ;;  %v2683_v43 = vld [vmem:[%s3212_s1 + $0xec] ss:$16 sps:$4 sm:$0xff]   ;;  %v534_v46 = vld [vmem:[%s2842_s8 + $0x30] sm:$0xff] }
  0x14   : > { %v2884_v38 = vld [vmem:[%s3215_s4] ss:$0 sm:$0xff]  ;;  %v535_v47 = vld [vmem:[%s2842_s8 + $0x38] sm:$0xff]  ;;  %v572_v50 = vsub.f32 %v533_v42, %v2867_v31  ;;  %v573_v57 = vsub.f32 %v534_v46, %v2867_v31  ;;  %v537_v8 = vld [vmem:[%s2842_s8 + $0x48] sm:$0xff] }
  0x15   : > { %1059 = vmatpush1.bf16.msra.mxu0 %v2661_v15  ;;  %1252 = vmatpush1.bf16.msra.mxu1 %v2662_v16  ;;  %v532_v41 = vld [vmem:[%s2842_s8 + $0x20] sm:$0xff]  ;;  %v606_v44 = vmul.f32 %v2872_v32, %v567_v34  ;;  %v607_v45 = vmul.f32 %v2872_v32, %v568_v35  ;;  %v608_v53 = vmul.f32 %v2872_v32, %v569_v39  ;;  %v2686_v56 = vld [vmem:[%s3212_s1 + $0xe8] ss:$16 sps:$4 sm:$0xff]   ;;  %v538_v14 = vld [vmem:[%s2842_s8 + $0x50] sm:$0xff] }
  0x16   : > { %1060 = vmatprep.subr.bf16.mxu0 %v2663_v17  ;;  %1253 = vmatprep.subr.bf16.mxu1 %v2665_v18  ;;  %v2900_v48 = vld [vmem:[%s3216_s5] ss:$0 sm:$0xff]  ;;  %v571_v49 = vsub.f32 %v532_v41, %v2867_v31  ;;  %v609_v54 = vmul.f32 %v2872_v32, %v570_v40  ;;  %v574_v58 = vsub.f32 %v535_v47, %v2867_v31  ;;  %v539_v17 = vld [vmem:[%s2842_s8 + $0x58] sm:$0xff]  ;;  %v546_v28 = vld [vmem:[%s2842_s8 + $0x90] sm:$0xff] }
  0x17   : > { %v645_v51 = vmul.f32 %v2884_v38, %v606_v44  ;;  %v646_v52 = vmul.f32 %v2884_v38, %v607_v45  ;;  %v2685_v55 = vld [vmem:[%s3212_s1 + $0xe0] ss:$16 sps:$4 sm:$0xff]   ;;  %v611_v62 = vmul.f32 %v2872_v32, %v572_v50  ;;  %v647_v0 = vmul.f32 %v2884_v38, %v608_v53  ;;  %v547_v36 = vld [vmem:[%s2842_s8 + $0x98] sm:$0xff]  ;;  %v549_v42 = vld [vmem:[%s2842_s8 + $0xa8] sm:$0xff] }
  0x18   : > { %v610_v61 = vmul.f32 %v2872_v32, %v571_v49  ;;  %v648_v1 = vmul.f32 %v2884_v38, %v609_v54  ;;  %v536_v3 = vld [vmem:[%s2842_s8 + $0x40] sm:$0xff]  ;;  %v612_v4 = vmul.f32 %v2872_v32, %v573_v57  ;;  %v613_v5 = vmul.f32 %v2872_v32, %v574_v58 }
  0x19   : > { %1061 = vmatpush1.bf16.msra.mxu0 %v2667_v19  ;;  %1254 = vmatpush1.bf16.msra.mxu1 %v2668_v20  ;;  %v684_v59 = vadd.f32 %v2900_v48, %v645_v51  ;;  %v685_v60 = vadd.f32 %v2900_v48, %v646_v52  ;;  %v650_v7 = vmul.f32 %v2884_v38, %v611_v62  ;;  %v544_v15 = vld [vmem:[%s2842_s8 + $0x80] sm:$0xff]  ;;  %v551_v52 = vld [vmem:[%s2842_s8 + $0xb8] sm:$0xff] }
  0x1a   : > { %1062 = vmatprep.subr.bf16.mxu0 %v2669_v21  ;;  %1255 = vmatprep.subr.bf16.mxu1 %v2671_v22  ;;  %v649_v6 = vmul.f32 %v2884_v38, %v610_v61  ;;  %v575_v9 = vsub.f32 %v536_v3, %v2867_v31  ;;  %v686_v10 = vadd.f32 %v2900_v48, %v647_v0  ;;  %v545_v21 = vld [vmem:[%s2842_s8 + $0x88] sm:$0xff]  ;;  %v548_v41 = vld [vmem:[%s2842_s8 + $0xa0] sm:$0xff] }
  0x1b   : > { %v844_v63 = vpack.c.bf16 %v685_v60, %v684_v59  ;;  %v687_v11 = vadd.f32 %v2900_v48, %v648_v1  ;;  %v651_v12 = vmul.f32 %v2884_v38, %v612_v4  ;;  %v652_v13 = vmul.f32 %v2884_v38, %v613_v5  ;;  %v552_v57 = vld [vmem:[%s2842_s8 + $0xc0] sm:$0xff]  ;;  %v553_v3 = vld [vmem:[%s2842_s8 + $0xc8] sm:$0xff] }
  0x1c   : > { %v576_v16 = vsub.f32 %v537_v8, %v2867_v31  ;;  %v688_v18 = vadd.f32 %v2900_v48, %v649_v6  ;;  %v689_v19 = vadd.f32 %v2900_v48, %v650_v7  ;;  %v614_v20 = vmul.f32 %v2872_v32, %v575_v9 }
  0x1d   : > { %1063 = vmatpush1.bf16.msra.mxu0 %v2673_v23  ;;  %1256 = vmatpush1.bf16.msra.mxu1 %v2674_v24  ;;  %v845_v22 = vpack.c.bf16 %v687_v11, %v686_v10  ;;  %v577_v23 = vsub.f32 %v538_v14, %v2867_v31  ;;  %v583_v24 = vsub.f32 %v544_v15, %v2867_v31  ;;  %v554_v15 = vld [vmem:[%s2842_s8 + $0xd0] sm:$0xff] }
  0x1e   : > { %1064 = vmatprep.subr.bf16.mxu0 %v2675_v25  ;;  %1257 = vmatprep.subr.bf16.mxu1 %v2677_v26  ;;  %v690_v25 = vadd.f32 %v2900_v48, %v651_v12  ;;  %v691_v26 = vadd.f32 %v2900_v48, %v652_v13  ;;  %v578_v27 = vsub.f32 %v539_v17, %v2867_v31 }
  0x1f   : > { %v653_v34 = vmul.f32 %v2884_v38, %v614_v20  ;;  %v622_v35 = vmul.f32 %v2872_v32, %v583_v24  ;;  %v2955_v37 = vmul.f32 %v2872_v32, %v577_v23  ;;  %v585_v40 = vsub.f32 %v546_v28, %v2867_v31  ;;  %v556_v20 = vld [vmem:[%s2842_s8 + $0xe0] sm:$0xff] }
  0x20   : > { %v2964_v44 = vpack.c.bf16 %v691_v26, %v690_v25  ;;  %v2967_v45 = vmul.f32 %v2872_v32, %v578_v27  ;;  %v586_v50 = vsub.f32 %v547_v36, %v2867_v31  ;;  %v587_v54 = vsub.f32 %v548_v41, %v2867_v31  ;;  %v558_v26 = vld [vmem:[%s2842_s8 + $0xf0] sm:$0xff] }
  0x21   : > { %1065 = vmatpush1.bf16.msra.mxu0 %v2679_v29  ;;  %1258 = vmatpush1.bf16.msra.mxu1 %v2680_v30  ;;  %v615_v29 = vmul.f32 %v2872_v32, %v576_v16  ;;  %v584_v30 = vsub.f32 %v545_v21, %v2867_v31  ;;  %v661_v46 = vmul.f32 %v2884_v38, %v622_v35  ;;  %v555_v16 = vld [vmem:[%s2842_s8 + $0xd8] sm:$0xff]  ;;  %v557_v21 = vld [vmem:[%s2842_s8 + $0xe8] sm:$0xff] }
  0x22   : > { %1066 = vmatprep.subr.bf16.mxu0 %v2681_v33  ;;  %1259 = vmatprep.subr.bf16.mxu1 %v2683_v43  ;;  %v846_v33 = vpack.c.bf16 %v689_v19, %v688_v18  ;;  %v550_v43 = vld [vmem:[%s2842_s8 + $0xb0] sm:$0xff]  ;;  %v624_v51 = vmul.f32 %v2872_v32, %v585_v40  ;;  %v2983_v58 = vadd.f32 %v2900_v48, %v653_v34 }
  0x23   : > { %v623_v39 = vmul.f32 %v2872_v32, %v584_v30  ;;  %v2971_v47 = vmul.f32 %v2884_v38, %v615_v29  ;;  %v700_v53 = vadd.f32 %v2900_v48, %v661_v46  ;;  %v625_v60 = vmul.f32 %v2872_v32, %v586_v50 }
  0x24   : > { %v663_v61 = vmul.f32 %v2884_v38, %v624_v51  ;;  %v626_v62 = vmul.f32 %v2872_v32, %v587_v54  ;;  %v590_v0 = vsub.f32 %v551_v52, %v2867_v31  ;;  %v591_v7 = vsub.f32 %v552_v57, %v2867_v31  ;;  %v541_v57 = vld [vmem:[%s2842_s8 + $0x68] sm:$0xff] }
  0x25   : > { %1067 = vmatpush1.bf16.msra.mxu0 %v2685_v55  ;;  %1260 = vmatpush1.bf16.msra.mxu1 %v2686_v56  ;;  %v662_v49 = vmul.f32 %v2884_v38, %v623_v39  ;;  %v588_v55 = vsub.f32 %v549_v42, %v2867_v31  ;;  %v589_v56 = vsub.f32 %v550_v43, %v2867_v31 }
  0x26   : > { %v664_v5 = vmul.f32 %v2884_v38, %v625_v60  ;;  %v702_v6 = vadd.f32 %v2900_v48, %v663_v61  ;;  %v665_v8 = vmul.f32 %v2884_v38, %v626_v62  ;;  %v629_v10 = vmul.f32 %v2872_v32, %v590_v0 }
  0x27   : > { %v701_v59 = vadd.f32 %v2900_v48, %v662_v49  ;;  %v628_v1 = vmul.f32 %v2872_v32, %v589_v56  ;;  %v592_v13 = vsub.f32 %v553_v3, %v2867_v31  ;;  %v630_v14 = vmul.f32 %v2872_v32, %v591_v7 }
  0x28   : > { %1085 = vmatmul.mubr.bf16.vlgmr.msra.gmra.mrb[0].mxu0 %v844_v63  ;;  %1278 = vmatmul.mubr.bf16.vlgmr.msra.gmra.mrb[0].mxu1 %v844_v63  ;;  %v627_v63 = vmul.f32 %v2872_v32, %v588_v55  ;;  %v703_v12 = vadd.f32 %v2900_v48, %v664_v5  ;;  %v704_v17 = vadd.f32 %v2900_v48, %v665_v8 }
  0x29   : > { %1094 = vmatprep.mubr.bf16.mxu0 %v2711_v2  ;;  %1287 = vmatprep.mubr.bf16.mxu1 %v2711_v2  ;;  %v2993_v4 = vpack.c.bf16 %v701_v59, %v700_v53  ;;  %v667_v11 = vmul.f32 %v2884_v38, %v628_v1  ;;  %v668_v19 = vmul.f32 %v2884_v38, %v629_v10  ;;  %v540_v53 = vld [vmem:[%s2842_s8 + $0x60] sm:$0xff] }
  0x2a   : > { %v666_v9 = vmul.f32 %v2884_v38, %v627_v63  ;;  %v631_v24 = vmul.f32 %v2872_v32, %v592_v13  ;;  %v669_v25 = vmul.f32 %v2884_v38, %v630_v14  ;;  %v593_v29 = vsub.f32 %v554_v15, %v2867_v31 }
  0x2b   : > { %v706_v23 = vadd.f32 %v2900_v48, %v667_v11  ;;  %v707_v28 = vadd.f32 %v2900_v48, %v668_v19  ;;  %v594_v30 = vsub.f32 %v555_v16, %v2867_v31  ;;  %v595_v36 = vsub.f32 %v556_v20, %v2867_v31 }
  0x2c   : > { %v705_v18 = vadd.f32 %v2900_v48, %v666_v9  ;;  %v670_v34 = vmul.f32 %v2884_v38, %v631_v24  ;;  %v708_v35 = vadd.f32 %v2900_v48, %v669_v25  ;;  %v596_v39 = vsub.f32 %v557_v21, %v2867_v31 }
  0x2d   : > { %v3030_v40 = vpack.c.bf16 %v707_v28, %v706_v23  ;;  %v632_v41 = vmul.f32 %v2872_v32, %v593_v29  ;;  %v633_v42 = vmul.f32 %v2872_v32, %v594_v30  ;;  %v597_v43 = vsub.f32 %v558_v26, %v2867_v31 }
  0x2e   : > { %v3020_v27 = vpack.c.bf16 %v705_v18, %v704_v17  ;;  %v709_v46 = vadd.f32 %v2900_v48, %v670_v34  ;;  %v634_v49 = vmul.f32 %v2872_v32, %v595_v36  ;;  %v635_v50 = vmul.f32 %v2872_v32, %v596_v39  ;;  %v542_v17 = vld [vmem:[%s2842_s8 + $0x70] sm:$0xff] }
  0x2f   : > { %v693_v52 = vadd.f32 %v2900_v48, %v2971_v47  ;;  %v671_v54 = vmul.f32 %v2884_v38, %v632_v41  ;;  %v672_v55 = vmul.f32 %v2884_v38, %v633_v42  ;;  %v636_v56 = vmul.f32 %v2872_v32, %v597_v43 }
  0x30   : > { %1095 = vmatmul.mubr.bf16.gmra.mrb[4].mxu0 %v845_v22  ;;  %1288 = vmatmul.mubr.bf16.gmra.mrb[4].mxu1 %v845_v22  ;;  %v3014_v22 = vpack.c.bf16 %v703_v12, %v702_v6  ;;  %v3048_v59 = vpack.c.bf16 %v709_v46, %v708_v35  ;;  %v673_v60 = vmul.f32 %v2884_v38, %v634_v49 }
  0x31   : > { %1104 = vmatprep.mubr.bf16.mxu0 %v2711_v2  ;;  %1297 = vmatprep.mubr.bf16.mxu1 %v2711_v2  ;;  %v674_v61 = vmul.f32 %v2884_v38, %v635_v50  ;;  %v710_v47 = vadd.f32 %v2900_v48, %v671_v54  ;;  %v711_v62 = vadd.f32 %v2900_v48, %v672_v55 }
  0x32   : > { %v579_v0 = vsub.f32 %v540_v53, %v2867_v31  ;;  %v675_v3 = vmul.f32 %v2884_v38, %v636_v56  ;;  %v655_v5 = vmul.f32 %v2884_v38, %v2955_v37  ;;  %v580_v6 = vsub.f32 %v541_v57, %v2867_v31 }
  0x33   : > { %v713_v1 = vadd.f32 %v2900_v48, %v674_v61  ;;  %v3064_v7 = vpack.c.bf16 %v711_v62, %v710_v47  ;;  %v848_v9 = vpack.c.bf16 %v693_v52, %v2983_v58  ;;  %v656_v10 = vmul.f32 %v2884_v38, %v2967_v45  ;;  %v543_v45 = vld [vmem:[%s2842_s8 + $0x78] sm:$0xff] }
  0x34   : > { %v714_v12 = vadd.f32 %v2900_v48, %v675_v3  ;;  %v618_v37 = vmul.f32 %v2872_v32, %v579_v0  ;;  %v694_v15 = vadd.f32 %v2900_v48, %v655_v5  ;;  %v619_v58 = vmul.f32 %v2872_v32, %v580_v6 }
  0x35   : > { %v695_v16 = vadd.f32 %v2900_v48, %v656_v10  ;;  %v581_v18 = vsub.f32 %v542_v17, %v2867_v31  ;;  %v582_v23 = vsub.f32 %v543_v45, %v2867_v31 }
  0x36   : > { %v657_v20 = vmul.f32 %v2884_v38, %v618_v37  ;;  %v658_v21 = vmul.f32 %v2884_v38, %v619_v58 }
  0x37   : > { %v849_v19 = vpack.c.bf16 %v695_v16, %v694_v15  ;;  %v620_v24 = vmul.f32 %v2872_v32, %v581_v18  ;;  %v621_v28 = vmul.f32 %v2872_v32, %v582_v23 }
  0x38   : > { %1105 = vmatmul.mubr.bf16.gmra.mrb[8].mxu0 %v846_v33  ;;  %1298 = vmatmul.mubr.bf16.gmra.mrb[8].mxu1 %v846_v33  ;;  %v559_v33 = vld [vmem:[%s2842_s8 + $0xf8] sm:$0xff]  ;;  %v696_v25 = vadd.f32 %v2900_v48, %v657_v20  ;;  %v697_v26 = vadd.f32 %v2900_v48, %v658_v21  ;;  %s2549_s8 = sshll.u32 %s3223_s11, 4 }
  0x39   : > { %1114 = vmatprep.mubr.bf16.mxu0 %v2711_v2  ;;  %1307 = vmatprep.mubr.bf16.mxu1 %v2711_v2  ;;  %v598_v51 = vsub.f32 %v559_v33, %v2867_v31  ;;  %v659_v30 = vmul.f32 %v2884_v38, %v620_v24  ;;  %v660_v33 = vmul.f32 %v2884_v38, %v621_v28  ;;  %s3136_s21 = scalar_lea.vmem %s3217_s6, %s2549_s8 }
  0x3a   : > { %v850_v29 = vpack.c.bf16 %v697_v26, %v696_v25 }
  0x3b   : > { %v637_v63 = vmul.f32 %v2872_v32, %v598_v51  ;;  %v698_v31 = vadd.f32 %v2900_v48, %v659_v30  ;;  %v699_v34 = vadd.f32 %v2900_v48, %v660_v33 }
  0x3d   : > { %v676_v8 = vmul.f32 %v2884_v38, %v637_v63  ;;  %v851_v32 = vpack.c.bf16 %v699_v34, %v698_v31 }
  0x3f   : > { %v715_v13 = vadd.f32 %v2900_v48, %v676_v8 }
  0x40   : > { %1115 = vmatmul.mubr.bf16.gmra.mrb[12].mxu0 %v2964_v44  ;;  %1308 = vmatmul.mubr.bf16.gmra.mrb[12].mxu1 %v2964_v44  ;;  %v712_v44 = vadd.f32 %v2900_v48, %v673_v60 }
  0x41   : > { %1124 = vmatprep.mubr.bf16.mxu0 %v2711_v2  ;;  %1317 = vmatprep.mubr.bf16.mxu1 %v2711_v2  ;;  %v3075_v14 = vpack.c.bf16 %v715_v13, %v714_v12 }
  0x42   : > { %v3070_v11 = vpack.c.bf16 %v713_v1, %v712_v44 }
  0x48   : > { %1125 = vmatmul.mubr.bf16.gmra.mrb[16].mxu0 %v848_v9  ;;  %1318 = vmatmul.mubr.bf16.gmra.mrb[16].mxu1 %v848_v9 }
  0x49   : > { %1134 = vmatprep.mubr.bf16.mxu0 %v2711_v2  ;;  %1327 = vmatprep.mubr.bf16.mxu1 %v2711_v2 }
  0x50   : > { %1135 = vmatmul.mubr.bf16.gmra.mrb[20].mxu0 %v849_v19  ;;  %1328 = vmatmul.mubr.bf16.gmra.mrb[20].mxu1 %v849_v19 }
  0x51   : > { %1144 = vmatprep.mubr.bf16.mxu0 %v2711_v2  ;;  %1337 = vmatprep.mubr.bf16.mxu1 %v2711_v2 }
  0x58   : > { %1145 = vmatmul.mubr.bf16.gmra.mrb[24].mxu0 %v850_v29  ;;  %1338 = vmatmul.mubr.bf16.gmra.mrb[24].mxu1 %v850_v29 }
  0x59   : > { %1154 = vmatprep.mubr.bf16.mxu0 %v2711_v2  ;;  %1347 = vmatprep.mubr.bf16.mxu1 %v2711_v2 }
  0x60   : > { %1155 = vmatmul.mubr.bf16.gmra.mrb[28].mxu0 %v851_v32  ;;  %1348 = vmatmul.mubr.bf16.gmra.mrb[28].mxu1 %v851_v32 }
  0x61   : > { %1164 = vmatprep.mubr.bf16.mxu0 %v2711_v2  ;;  %1357 = vmatprep.mubr.bf16.mxu1 %v2711_v2 }
  0x68   : > { %1165 = vmatmul.mubr.bf16.gmra.mrb[32].mxu0 %v2993_v4  ;;  %1358 = vmatmul.mubr.bf16.gmra.mrb[32].mxu1 %v2993_v4 }
  0x69   : > { %1174 = vmatprep.mubr.bf16.mxu0 %v2711_v2  ;;  %1367 = vmatprep.mubr.bf16.mxu1 %v2711_v2 }
  0x70   : > { %1175 = vmatmul.mubr.bf16.gmra.mrb[36].mxu0 %v3014_v22  ;;  %1368 = vmatmul.mubr.bf16.gmra.mrb[36].mxu1 %v3014_v22 }
  0x71   : > { %1184 = vmatprep.mubr.bf16.mxu0 %v2711_v2  ;;  %1377 = vmatprep.mubr.bf16.mxu1 %v2711_v2 }
  0x78   : > { %1185 = vmatmul.mubr.bf16.gmra.mrb[40].mxu0 %v3020_v27  ;;  %1378 = vmatmul.mubr.bf16.gmra.mrb[40].mxu1 %v3020_v27 }
  0x79   : > { %1194 = vmatprep.mubr.bf16.mxu0 %v2711_v2  ;;  %1387 = vmatprep.mubr.bf16.mxu1 %v2711_v2 }
  0x80   : > { %1195 = vmatmul.mubr.bf16.gmra.mrb[44].mxu0 %v3030_v40  ;;  %1388 = vmatmul.mubr.bf16.gmra.mrb[44].mxu1 %v3030_v40 }
  0x81   : > { %1204 = vmatprep.mubr.bf16.mxu0 %v2711_v2  ;;  %1397 = vmatprep.mubr.bf16.mxu1 %v2711_v2 }
  0x88   : > { %1205 = vmatmul.mubr.bf16.gmra.mrb[48].mxu0 %v3048_v59  ;;  %1398 = vmatmul.mubr.bf16.gmra.mrb[48].mxu1 %v3048_v59 }
  0x89   : > { %1214 = vmatprep.mubr.bf16.mxu0 %v2711_v2  ;;  %1407 = vmatprep.mubr.bf16.mxu1 %v2711_v2 }
  0x90   : > { %1215 = vmatmul.mubr.bf16.gmra.mrb[52].mxu0 %v3064_v7  ;;  %1408 = vmatmul.mubr.bf16.gmra.mrb[52].mxu1 %v3064_v7 }
  0x91   : > { %1224 = vmatprep.mubr.bf16.mxu0 %v2711_v2  ;;  %1417 = vmatprep.mubr.bf16.mxu1 %v2711_v2 }
  0x98   : > { %1225 = vmatmul.mubr.bf16.gmra.mrb[56].mxu0 %v3070_v11  ;;  %1418 = vmatmul.mubr.bf16.gmra.mrb[56].mxu1 %v3070_v11 }
  0x99   : > { %1234 = vmatprep.mubr.bf16.mxu0 %v2711_v2  ;;  %1427 = vmatprep.mubr.bf16.mxu1 %v2711_v2 }
  0xa0   : > { %1235 = vmatmul.mubr.bf16.gmra.mrb[60].mxu0 %v3075_v14  ;;  %1428 = vmatmul.mubr.bf16.gmra.mrb[60].mxu1 %v3075_v14 }
  0xfb   : > { %v1086_v38 = vpop.f32.mrb[0].mxu0  ;;  %v1279_v48 = vpop.f32.mrb[0].mxu1 }
  0xfc   : > { %v1088_v4 = vpop.f32.mrb[1].mxu0  ;;  %v1281_v22 = vpop.f32.mrb[1].mxu1 }
  0xfd   : > { %v2550_v27 = vpack.c.bf16 %v1088_v4, %v1086_v38  ;;  %v2551_v2 = vpack.c.bf16 %v1281_v22, %v1279_v48  ;;  %v1090_v35 = vpop.f32.mrb[2].mxu0  ;;  %v1283_v36 = vpop.f32.mrb[2].mxu1 }
  0xfe   : > { %v1092_v39 = vpop.f32.mrb[3].mxu0  ;;  %v1285_v40 = vpop.f32.mrb[3].mxu1 }
  0xff   : > { %2209 = vst [vmem:[%s3136_s21] sm:$0xff] %v2550_v27  ;;  %2210 = vst [vmem:[%s3136_s21 + $0x8] sm:$0xff] %v2551_v2  ;;  %v2552_v41 = vpack.c.bf16 %v1092_v39, %v1090_v35  ;;  %v2553_v42 = vpack.c.bf16 %v1285_v40, %v1283_v36 }
 0x101   : > { %2211 = vst [vmem:[%s3136_s21 + $0x10] sm:$0xff] %v2552_v41  ;;  %2212 = vst [vmem:[%s3136_s21 + $0x18] sm:$0xff] %v2553_v42 }
 0x103   : > { %v1096_v43 = vpop.f32.mrb[4].mxu0  ;;  %v1289_v46 = vpop.f32.mrb[4].mxu1 }
 0x104   : > { %v1098_v49 = vpop.f32.mrb[5].mxu0  ;;  %v1291_v50 = vpop.f32.mrb[5].mxu1 }
 0x105   : > { %v2554_v51 = vpack.c.bf16 %v1098_v49, %v1096_v43  ;;  %v2555_v52 = vpack.c.bf16 %v1291_v50, %v1289_v46  ;;  %v1100_v53 = vpop.f32.mrb[6].mxu0  ;;  %v1293_v54 = vpop.f32.mrb[6].mxu1 }
 0x106   : > { %v1102_v55 = vpop.f32.mrb[7].mxu0  ;;  %v1295_v56 = vpop.f32.mrb[7].mxu1 }
 0x107   : > { %2213 = vst [vmem:[%s3136_s21 + $0x20] sm:$0xff] %v2554_v51  ;;  %2214 = vst [vmem:[%s3136_s21 + $0x28] sm:$0xff] %v2555_v52  ;;  %v2556_v57 = vpack.c.bf16 %v1102_v55, %v1100_v53  ;;  %v2557_v59 = vpack.c.bf16 %v1295_v56, %v1293_v54 }
 0x109   : > { %2215 = vst [vmem:[%s3136_s21 + $0x30] sm:$0xff] %v2556_v57  ;;  %2216 = vst [vmem:[%s3136_s21 + $0x38] sm:$0xff] %v2557_v59 }
 0x10b   : > { %v1106_v60 = vpop.f32.mrb[8].mxu0  ;;  %v1299_v61 = vpop.f32.mrb[8].mxu1 }
 0x10c   : > { %v1108_v47 = vpop.f32.mrb[9].mxu0  ;;  %v1301_v62 = vpop.f32.mrb[9].mxu1 }
 0x10d   : > { %v2558_v63 = vpack.c.bf16 %v1108_v47, %v1106_v60  ;;  %v2559_v0 = vpack.c.bf16 %v1301_v62, %v1299_v61  ;;  %v1110_v44 = vpop.f32.mrb[10].mxu0  ;;  %v1303_v1 = vpop.f32.mrb[10].mxu1 }
 0x10e   : > { %v1112_v3 = vpop.f32.mrb[11].mxu0  ;;  %v1305_v5 = vpop.f32.mrb[11].mxu1 }
 0x10f   : > { %2217 = vst [vmem:[%s3136_s21 + $0x40] sm:$0xff] %v2558_v63  ;;  %2218 = vst [vmem:[%s3136_s21 + $0x48] sm:$0xff] %v2559_v0  ;;  %v2560_v6 = vpack.c.bf16 %v1112_v3, %v1110_v44  ;;  %v2561_v7 = vpack.c.bf16 %v1305_v5, %v1303_v1 }
 0x111   : > { %2219 = vst [vmem:[%s3136_s21 + $0x50] sm:$0xff] %v2560_v6  ;;  %2220 = vst [vmem:[%s3136_s21 + $0x58] sm:$0xff] %v2561_v7 }
 0x113   : > { %v1116_v8 = vpop.f32.mrb[12].mxu0  ;;  %v1309_v9 = vpop.f32.mrb[12].mxu1 }
 0x114   : > { %v1118_v10 = vpop.f32.mrb[13].mxu0  ;;  %v1311_v11 = vpop.f32.mrb[13].mxu1 }
 0x115   : > { %v2562_v12 = vpack.c.bf16 %v1118_v10, %v1116_v8  ;;  %v2563_v13 = vpack.c.bf16 %v1311_v11, %v1309_v9  ;;  %v1120_v37 = vpop.f32.mrb[14].mxu0  ;;  %v1313_v14 = vpop.f32.mrb[14].mxu1 }
 0x116   : > { %v1122_v15 = vpop.f32.mrb[15].mxu0  ;;  %v1315_v16 = vpop.f32.mrb[15].mxu1 }
 0x117   : > { %2221 = vst [vmem:[%s3136_s21 + $0x60] sm:$0xff] %v2562_v12  ;;  %2222 = vst [vmem:[%s3136_s21 + $0x68] sm:$0xff] %v2563_v13  ;;  %v2564_v58 = vpack.c.bf16 %v1122_v15, %v1120_v37  ;;  %v2565_v17 = vpack.c.bf16 %v1315_v16, %v1313_v14 }
 0x119   : > { %2223 = vst [vmem:[%s3136_s21 + $0x70] sm:$0xff] %v2564_v58  ;;  %2224 = vst [vmem:[%s3136_s21 + $0x78] sm:$0xff] %v2565_v17 }
 0x11b   : > { %v1126_v45 = vpop.f32.mrb[16].mxu0  ;;  %v1319_v18 = vpop.f32.mrb[16].mxu1 }
 0x11c   : > { %v1128_v19 = vpop.f32.mrb[17].mxu0  ;;  %v1321_v20 = vpop.f32.mrb[17].mxu1 }
 0x11d   : > { %v2566_v21 = vpack.c.bf16 %v1128_v19, %v1126_v45  ;;  %v2567_v23 = vpack.c.bf16 %v1321_v20, %v1319_v18  ;;  %v1130_v24 = vpop.f32.mrb[18].mxu0  ;;  %v1323_v25 = vpop.f32.mrb[18].mxu1 }
 0x11e   : > { %v1132_v26 = vpop.f32.mrb[19].mxu0  ;;  %v1325_v28 = vpop.f32.mrb[19].mxu1 }
 0x11f   : > { %2225 = vst [vmem:[%s3136_s21 + $0x80] sm:$0xff] %v2566_v21  ;;  %2226 = vst [vmem:[%s3136_s21 + $0x88] sm:$0xff] %v2567_v23  ;;  %v2568_v29 = vpack.c.bf16 %v1132_v26, %v1130_v24  ;;  %v2569_v30 = vpack.c.bf16 %v1325_v28, %v1323_v25 }
 0x121   : > { %2227 = vst [vmem:[%s3136_s21 + $0x90] sm:$0xff] %v2568_v29  ;;  %2228 = vst [vmem:[%s3136_s21 + $0x98] sm:$0xff] %v2569_v30 }
 0x123   : > { %v1136_v33 = vpop.f32.mrb[20].mxu0  ;;  %v1329_v31 = vpop.f32.mrb[20].mxu1 }
 0x124   : > { %v1138_v34 = vpop.f32.mrb[21].mxu0  ;;  %v1331_v32 = vpop.f32.mrb[21].mxu1 }
 0x125   : > { %v2570_v38 = vpack.c.bf16 %v1138_v34, %v1136_v33  ;;  %v2571_v48 = vpack.c.bf16 %v1331_v32, %v1329_v31  ;;  %v1140_v4 = vpop.f32.mrb[22].mxu0  ;;  %v1333_v22 = vpop.f32.mrb[22].mxu1 }
 0x126   : > { %v1142_v27 = vpop.f32.mrb[23].mxu0  ;;  %v1335_v2 = vpop.f32.mrb[23].mxu1 }
 0x127   : > { %2229 = vst [vmem:[%s3136_s21 + $0xa0] sm:$0xff] %v2570_v38  ;;  %2230 = vst [vmem:[%s3136_s21 + $0xa8] sm:$0xff] %v2571_v48  ;;  %v2572_v35 = vpack.c.bf16 %v1142_v27, %v1140_v4  ;;  %v2573_v36 = vpack.c.bf16 %v1335_v2, %v1333_v22 }
 0x129   : > { %2231 = vst [vmem:[%s3136_s21 + $0xb0] sm:$0xff] %v2572_v35  ;;  %2232 = vst [vmem:[%s3136_s21 + $0xb8] sm:$0xff] %v2573_v36 }
 0x12b   : > { %v1146_v39 = vpop.f32.mrb[24].mxu0  ;;  %v1339_v40 = vpop.f32.mrb[24].mxu1 }
 0x12c   : > { %v1148_v41 = vpop.f32.mrb[25].mxu0  ;;  %v1341_v42 = vpop.f32.mrb[25].mxu1 }
 0x12d   : > { %v2574_v43 = vpack.c.bf16 %v1148_v41, %v1146_v39  ;;  %v2575_v46 = vpack.c.bf16 %v1341_v42, %v1339_v40  ;;  %v1150_v49 = vpop.f32.mrb[26].mxu0  ;;  %v1343_v50 = vpop.f32.mrb[26].mxu1 }
 0x12e   : > { %v1152_v51 = vpop.f32.mrb[27].mxu0  ;;  %v1345_v52 = vpop.f32.mrb[27].mxu1 }
 0x12f   : > { %2233 = vst [vmem:[%s3136_s21 + $0xc0] sm:$0xff] %v2574_v43  ;;  %2234 = vst [vmem:[%s3136_s21 + $0xc8] sm:$0xff] %v2575_v46  ;;  %v2576_v53 = vpack.c.bf16 %v1152_v51, %v1150_v49  ;;  %v2577_v54 = vpack.c.bf16 %v1345_v52, %v1343_v50 }
 0x131   : > { %2235 = vst [vmem:[%s3136_s21 + $0xd0] sm:$0xff] %v2576_v53  ;;  %2236 = vst [vmem:[%s3136_s21 + $0xd8] sm:$0xff] %v2577_v54 }
 0x133   : > { %v1156_v55 = vpop.f32.mrb[28].mxu0  ;;  %v1349_v56 = vpop.f32.mrb[28].mxu1 }
 0x134   : > { %v1158_v57 = vpop.f32.mrb[29].mxu0  ;;  %v1351_v59 = vpop.f32.mrb[29].mxu1 }
 0x135   : > { %v2578_v60 = vpack.c.bf16 %v1158_v57, %v1156_v55  ;;  %v2579_v61 = vpack.c.bf16 %v1351_v59, %v1349_v56  ;;  %v1160_v47 = vpop.f32.mrb[30].mxu0  ;;  %v1353_v62 = vpop.f32.mrb[30].mxu1 }
 0x136   : > { %v1162_v63 = vpop.f32.mrb[31].mxu0  ;;  %v1355_v0 = vpop.f32.mrb[31].mxu1 }
 0x137   : > { %2237 = vst [vmem:[%s3136_s21 + $0xe0] sm:$0xff] %v2578_v60  ;;  %2238 = vst [vmem:[%s3136_s21 + $0xe8] sm:$0xff] %v2579_v61  ;;  %v2580_v44 = vpack.c.bf16 %v1162_v63, %v1160_v47  ;;  %v2581_v1 = vpack.c.bf16 %v1355_v0, %v1353_v62 }
 0x139   : > { %2239 = vst [vmem:[%s3136_s21 + $0xf0] sm:$0xff] %v2580_v44  ;;  %2240 = vst [vmem:[%s3136_s21 + $0xf8] sm:$0xff] %v2581_v1 }
 0x13b   : > { %v1166_v3 = vpop.f32.mrb[32].mxu0  ;;  %v1359_v5 = vpop.f32.mrb[32].mxu1 }
 0x13c   : > { %v1168_v6 = vpop.f32.mrb[33].mxu0  ;;  %v1361_v7 = vpop.f32.mrb[33].mxu1 }
 0x13d   : > { %v2582_v8 = vpack.c.bf16 %v1168_v6, %v1166_v3  ;;  %v2583_v9 = vpack.c.bf16 %v1361_v7, %v1359_v5  ;;  %v1170_v10 = vpop.f32.mrb[34].mxu0  ;;  %v1363_v11 = vpop.f32.mrb[34].mxu1 }
 0x13e   : > { %v1172_v12 = vpop.f32.mrb[35].mxu0  ;;  %v1365_v13 = vpop.f32.mrb[35].mxu1 }
 0x13f   : > { %2241 = vst [vmem:[%s3136_s21 + $0x100] sm:$0xff] %v2582_v8  ;;  %2242 = vst [vmem:[%s3136_s21 + $0x108] sm:$0xff] %v2583_v9  ;;  %v2584_v37 = vpack.c.bf16 %v1172_v12, %v1170_v10  ;;  %v2585_v14 = vpack.c.bf16 %v1365_v13, %v1363_v11 }
 0x141   : > { %2243 = vst [vmem:[%s3136_s21 + $0x110] sm:$0xff] %v2584_v37  ;;  %2244 = vst [vmem:[%s3136_s21 + $0x118] sm:$0xff] %v2585_v14 }
 0x143   : > { %v1176_v15 = vpop.f32.mrb[36].mxu0  ;;  %v1369_v16 = vpop.f32.mrb[36].mxu1 }
 0x144   : > { %v1178_v58 = vpop.f32.mrb[37].mxu0  ;;  %v1371_v17 = vpop.f32.mrb[37].mxu1 }
 0x145   : > { %v2586_v45 = vpack.c.bf16 %v1178_v58, %v1176_v15  ;;  %v2587_v18 = vpack.c.bf16 %v1371_v17, %v1369_v16  ;;  %v1180_v19 = vpop.f32.mrb[38].mxu0  ;;  %v1373_v20 = vpop.f32.mrb[38].mxu1 }
 0x146   : > { %v1182_v21 = vpop.f32.mrb[39].mxu0  ;;  %v1375_v23 = vpop.f32.mrb[39].mxu1 }
 0x147   : > { %2245 = vst [vmem:[%s3136_s21 + $0x120] sm:$0xff] %v2586_v45  ;;  %2246 = vst [vmem:[%s3136_s21 + $0x128] sm:$0xff] %v2587_v18  ;;  %v2588_v24 = vpack.c.bf16 %v1182_v21, %v1180_v19  ;;  %v2589_v25 = vpack.c.bf16 %v1375_v23, %v1373_v20 }
 0x149   : > { %2247 = vst [vmem:[%s3136_s21 + $0x130] sm:$0xff] %v2588_v24  ;;  %2248 = vst [vmem:[%s3136_s21 + $0x138] sm:$0xff] %v2589_v25 }
 0x14b   : > { %v1186_v26 = vpop.f32.mrb[40].mxu0  ;;  %v1379_v28 = vpop.f32.mrb[40].mxu1 }
 0x14c   : > { %v1188_v29 = vpop.f32.mrb[41].mxu0  ;;  %v1381_v30 = vpop.f32.mrb[41].mxu1 }
 0x14d   : > { %v2590_v33 = vpack.c.bf16 %v1188_v29, %v1186_v26  ;;  %v2591_v31 = vpack.c.bf16 %v1381_v30, %v1379_v28  ;;  %v1190_v34 = vpop.f32.mrb[42].mxu0  ;;  %v1383_v32 = vpop.f32.mrb[42].mxu1 }
 0x14e   : > { %v1192_v38 = vpop.f32.mrb[43].mxu0  ;;  %v1385_v48 = vpop.f32.mrb[43].mxu1 }
 0x14f   : > { %2249 = vst [vmem:[%s3136_s21 + $0x140] sm:$0xff] %v2590_v33  ;;  %2250 = vst [vmem:[%s3136_s21 + $0x148] sm:$0xff] %v2591_v31  ;;  %v2592_v4 = vpack.c.bf16 %v1192_v38, %v1190_v34  ;;  %v2593_v22 = vpack.c.bf16 %v1385_v48, %v1383_v32 }
 0x151   : > { %2251 = vst [vmem:[%s3136_s21 + $0x150] sm:$0xff] %v2592_v4  ;;  %2252 = vst [vmem:[%s3136_s21 + $0x158] sm:$0xff] %v2593_v22 }
 0x153   : > { %v1196_v27 = vpop.f32.mrb[44].mxu0  ;;  %v1389_v2 = vpop.f32.mrb[44].mxu1 }
 0x154   : > { %v1198_v35 = vpop.f32.mrb[45].mxu0  ;;  %v1391_v36 = vpop.f32.mrb[45].mxu1 }
 0x155   : > { %v2594_v39 = vpack.c.bf16 %v1198_v35, %v1196_v27  ;;  %v2595_v40 = vpack.c.bf16 %v1391_v36, %v1389_v2  ;;  %v1200_v41 = vpop.f32.mrb[46].mxu0  ;;  %v1393_v42 = vpop.f32.mrb[46].mxu1 }
 0x156   : > { %v1202_v43 = vpop.f32.mrb[47].mxu0  ;;  %v1395_v46 = vpop.f32.mrb[47].mxu1 }
 0x157   : > { %2253 = vst [vmem:[%s3136_s21 + $0x160] sm:$0xff] %v2594_v39  ;;  %2254 = vst [vmem:[%s3136_s21 + $0x168] sm:$0xff] %v2595_v40  ;;  %v2596_v49 = vpack.c.bf16 %v1202_v43, %v1200_v41  ;;  %v2597_v50 = vpack.c.bf16 %v1395_v46, %v1393_v42 }
 0x159   : > { %2255 = vst [vmem:[%s3136_s21 + $0x170] sm:$0xff] %v2596_v49  ;;  %2256 = vst [vmem:[%s3136_s21 + $0x178] sm:$0xff] %v2597_v50 }
 0x15b   : > { %v1206_v51 = vpop.f32.mrb[48].mxu0  ;;  %v1399_v52 = vpop.f32.mrb[48].mxu1 }
 0x15c   : > { %v1208_v53 = vpop.f32.mrb[49].mxu0  ;;  %v1401_v54 = vpop.f32.mrb[49].mxu1 }
 0x15d   : > { %v2598_v55 = vpack.c.bf16 %v1208_v53, %v1206_v51  ;;  %v2599_v56 = vpack.c.bf16 %v1401_v54, %v1399_v52  ;;  %v1210_v57 = vpop.f32.mrb[50].mxu0  ;;  %v1403_v59 = vpop.f32.mrb[50].mxu1 }
 0x15e   : > { %v1212_v60 = vpop.f32.mrb[51].mxu0  ;;  %v1405_v61 = vpop.f32.mrb[51].mxu1 }
 0x15f   : > { %2257 = vst [vmem:[%s3136_s21 + $0x180] sm:$0xff] %v2598_v55  ;;  %2258 = vst [vmem:[%s3136_s21 + $0x188] sm:$0xff] %v2599_v56  ;;  %v2600_v47 = vpack.c.bf16 %v1212_v60, %v1210_v57  ;;  %v2601_v62 = vpack.c.bf16 %v1405_v61, %v1403_v59 }
 0x161   : > { %2259 = vst [vmem:[%s3136_s21 + $0x190] sm:$0xff] %v2600_v47  ;;  %2260 = vst [vmem:[%s3136_s21 + $0x198] sm:$0xff] %v2601_v62 }
 0x163   : > { %v1216_v63 = vpop.f32.mrb[52].mxu0  ;;  %v1409_v0 = vpop.f32.mrb[52].mxu1 }
 0x164   : > { %v1218_v44 = vpop.f32.mrb[53].mxu0  ;;  %v1411_v1 = vpop.f32.mrb[53].mxu1 }
 0x165   : > { %v2602_v3 = vpack.c.bf16 %v1218_v44, %v1216_v63  ;;  %v2603_v5 = vpack.c.bf16 %v1411_v1, %v1409_v0  ;;  %v1220_v6 = vpop.f32.mrb[54].mxu0  ;;  %v1413_v7 = vpop.f32.mrb[54].mxu1 }
 0x166   : > { %v1222_v8 = vpop.f32.mrb[55].mxu0  ;;  %v1415_v9 = vpop.f32.mrb[55].mxu1 }
 0x167   : > { %2261 = vst [vmem:[%s3136_s21 + $0x1a0] sm:$0xff] %v2602_v3  ;;  %2262 = vst [vmem:[%s3136_s21 + $0x1a8] sm:$0xff] %v2603_v5  ;;  %v2604_v10 = vpack.c.bf16 %v1222_v8, %v1220_v6  ;;  %v2605_v11 = vpack.c.bf16 %v1415_v9, %v1413_v7 }
 0x169   : > { %2263 = vst [vmem:[%s3136_s21 + $0x1b0] sm:$0xff] %v2604_v10  ;;  %2264 = vst [vmem:[%s3136_s21 + $0x1b8] sm:$0xff] %v2605_v11 }
 0x16b   : > { %v1226_v12 = vpop.f32.mrb[56].mxu0  ;;  %v1419_v13 = vpop.f32.mrb[56].mxu1 }
 0x16c   : > { %v1228_v37 = vpop.f32.mrb[57].mxu0  ;;  %v1421_v14 = vpop.f32.mrb[57].mxu1 }
 0x16d   : > { %v2606_v15 = vpack.c.bf16 %v1228_v37, %v1226_v12  ;;  %v2607_v16 = vpack.c.bf16 %v1421_v14, %v1419_v13  ;;  %v1230_v58 = vpop.f32.mrb[58].mxu0  ;;  %v1423_v17 = vpop.f32.mrb[58].mxu1 }
 0x16e   : > { %v1232_v45 = vpop.f32.mrb[59].mxu0  ;;  %v1425_v18 = vpop.f32.mrb[59].mxu1 }
 0x16f   : > { %2265 = vst [vmem:[%s3136_s21 + $0x1c0] sm:$0xff] %v2606_v15  ;;  %2266 = vst [vmem:[%s3136_s21 + $0x1c8] sm:$0xff] %v2607_v16  ;;  %v2608_v19 = vpack.c.bf16 %v1232_v45, %v1230_v58  ;;  %v2609_v20 = vpack.c.bf16 %v1425_v18, %v1423_v17 }
 0x171   : > { %2267 = vst [vmem:[%s3136_s21 + $0x1d0] sm:$0xff] %v2608_v19  ;;  %2268 = vst [vmem:[%s3136_s21 + $0x1d8] sm:$0xff] %v2609_v20 }
 0x173   : > { %v1236_v21 = vpop.f32.mrb[60].mxu0  ;;  %v1429_v23 = vpop.f32.mrb[60].mxu1 }
 0x174   : > { %v1238_v24 = vpop.f32.mrb[61].mxu0  ;;  %v1431_v25 = vpop.f32.mrb[61].mxu1 }
 0x175   : > { %v2610_v26 = vpack.c.bf16 %v1238_v24, %v1236_v21  ;;  %v2611_v28 = vpack.c.bf16 %v1431_v25, %v1429_v23  ;;  %v1240_v29 = vpop.f32.mrb[62].mxu0  ;;  %v1433_v30 = vpop.f32.mrb[62].mxu1 }
 0x176   : > { %v1242_v33 = vpop.f32.mrb[63].mxu0  ;;  %v1435_v31 = vpop.f32.mrb[63].mxu1 }
 0x177   : > { %2269 = vst [vmem:[%s3136_s21 + $0x1e0] sm:$0xff] %v2610_v26  ;;  %2270 = vst [vmem:[%s3136_s21 + $0x1e8] sm:$0xff] %v2611_v28  ;;  %v2612_v34 = vpack.c.bf16 %v1242_v33, %v1240_v29  ;;  %v2613_v32 = vpack.c.bf16 %v1435_v31, %v1433_v30 }
 0x179   : > { %2271 = vst [vmem:[%s3136_s21 + $0x1f0] sm:$0xff] %v2612_v34  ;;  %2272 = vst [vmem:[%s3136_s21 + $0x1f8] sm:$0xff] %v2613_v32 }
 0x17a PF: > { %s16_s23 = sadd.s32 1, %s2709_s23   ;;  %s3218_s21 = smov %s2705_s22 }
 0x17b   : > { %p13_p5 = scmp.ge.s32.totalorder %s16_s23, 5   ;;  %s3219_s22 = smov %s3221_s24 }
 0x17d   :  { %15 = sbr.rel (!%p13_p5) target bundleno = 2 (0x2), region = 97 }

// kernel: rgcn_forward.13
= control target key start
LH: loop header
LB: loop body
LE: loop exit
PB: predicated region body
PF: predicated region fallthrough
CT: control target
= control target key end

     0   :  { %s597_s18 = smov 0   ;;  %s837_s0 = inlined_call_operand.vmem [shape: f32[768,128], index: 0, kind: input, shape index: {}]   ;;  %s838_s1 = inlined_call_operand.vmem [shape: f32[1,128], index: 1, kind: input, shape index: {}]   ;;  %s839_s2 = inlined_call_operand.vmem [shape: f32[1,128], index: 2, kind: input, shape index: {}]   ;;  %s840_s3 = inlined_call_operand.vmem [shape: f32[1,128], index: 3, kind: input, shape index: {}]   ;;  %s841_s4 = inlined_call_operand.vmem [shape: f32[1,128], index: 4, kind: input, shape index: {}]   ;;  %s842_s5 = inlined_call_operand.vmem [shape: f32[768,128], index: 5, kind: output, shape index: {}]  }
   0x1 LB: > { %s536_s19 = sadd.s32 4294967295, %s565_s18   ;;  %p540_p0 = scmp.ge.s32.totalorder %s565_s18, 1  ;;  %s565_s18 = sphi %s597_s18, %s15_s18  }
   0x2   : > { %p188_p1 = scmp.lt.s32.totalorder %s565_s18, 4 }
   0x4   : > { %p189_p2 = pnand %p540_p0, %p188_p1 }
   0x5   : > { %s541_s20 = sshll.u32 (!%p189_p2), %s536_s19, 5  ;;  %v611_v0 = vld [vmem:[%s838_s1] ss:$0 sm:$0xff] (!%p189_p2) }
   0x6   : > { %192 = sbr.rel (%p189_p2) target bundleno = 62 (0x3e), region = 40  ;;  %p217_p3 = scmp.lt.s32.totalorder (!%p189_p2), %s541_s20, 95  ;;  %v623_v1 = vld [vmem:[%s839_s2] ss:$0 sm:$0xff] (!%p189_p2) }
   0x7   : > { %v637_v11 = vld [vmem:[%s840_s3] ss:$0 sm:$0xff] (!%p189_p2) }
   0x8   : > { %v651_v21 = vld [vmem:[%s841_s4] ss:$0 sm:$0xff] (!%p189_p2) }
   0xd   : > { %s844_s20 = smov (!%p217_p3, %s541_s20), 95 }
   0xe   : > { %s542_s21 = sshll.u32 %s844_s20, 3 }
   0xf   : > { %s618_s26 = scalar_lea.vmem %s837_s0, %s542_s21  ;;  %s674_s10 = scalar_lea.vmem %s842_s5, %s542_s21 }
  0x10   : > { %v228_v2 = vld [vmem:[%s618_s26] sm:$0xff]  ;;  %v229_v3 = vld [vmem:[%s618_s26 + $0x8] sm:$0xff]  ;;  %v230_v4 = vld [vmem:[%s618_s26 + $0x10] sm:$0xff] }
  0x11   : > { %v267_v5 = vsub.f32 %v228_v2, %v611_v0  ;;  %v268_v6 = vsub.f32 %v229_v3, %v611_v0  ;;  %v269_v7 = vsub.f32 %v230_v4, %v611_v0  ;;  %v231_v8 = vld [vmem:[%s618_s26 + $0x18] sm:$0xff]  ;;  %v232_v9 = vld [vmem:[%s618_s26 + $0x20] sm:$0xff]  ;;  %v233_v10 = vld [vmem:[%s618_s26 + $0x28] sm:$0xff] }
  0x12   : > { %v270_v12 = vsub.f32 %v231_v8, %v611_v0  ;;  %v271_v13 = vsub.f32 %v232_v9, %v611_v0  ;;  %v272_v14 = vsub.f32 %v233_v10, %v611_v0  ;;  %v234_v15 = vld [vmem:[%s618_s26 + $0x30] sm:$0xff]  ;;  %v235_v16 = vld [vmem:[%s618_s26 + $0x38] sm:$0xff]  ;;  %v236_v42 = vld [vmem:[%s618_s26 + $0x40] sm:$0xff] }
  0x13   : > { %v306_v17 = vmul.f32 %v623_v1, %v267_v5  ;;  %v307_v18 = vmul.f32 %v623_v1, %v268_v6  ;;  %v308_v19 = vmul.f32 %v623_v1, %v269_v7  ;;  %v273_v20 = vsub.f32 %v234_v15, %v611_v0  ;;  %v237_v43 = vld [vmem:[%s618_s26 + $0x48] sm:$0xff]  ;;  %v238_v44 = vld [vmem:[%s618_s26 + $0x50] sm:$0xff]  ;;  %v239_v49 = vld [vmem:[%s618_s26 + $0x58] sm:$0xff] }
  0x14   : > { %v309_v22 = vmul.f32 %v623_v1, %v270_v12  ;;  %v310_v23 = vmul.f32 %v623_v1, %v271_v13  ;;  %v311_v24 = vmul.f32 %v623_v1, %v272_v14  ;;  %v274_v25 = vsub.f32 %v235_v16, %v611_v0  ;;  %v240_v50 = vld [vmem:[%s618_s26 + $0x60] sm:$0xff]  ;;  %v241_v51 = vld [vmem:[%s618_s26 + $0x68] sm:$0xff]  ;;  %v242_v56 = vld [vmem:[%s618_s26 + $0x70] sm:$0xff] }
  0x15   : > { %v345_v26 = vmul.f32 %v637_v11, %v306_v17  ;;  %v346_v27 = vmul.f32 %v637_v11, %v307_v18  ;;  %v347_v28 = vmul.f32 %v637_v11, %v308_v19  ;;  %v312_v29 = vmul.f32 %v623_v1, %v273_v20  ;;  %v243_v61 = vld [vmem:[%s618_s26 + $0x78] sm:$0xff] }
  0x16   : > { %v348_v30 = vmul.f32 %v637_v11, %v309_v22  ;;  %v349_v31 = vmul.f32 %v637_v11, %v310_v23  ;;  %v350_v32 = vmul.f32 %v637_v11, %v311_v24  ;;  %v313_v33 = vmul.f32 %v623_v1, %v274_v25 }
  0x17   : > { %v384_v34 = vadd.f32 %v651_v21, %v345_v26  ;;  %v385_v35 = vadd.f32 %v651_v21, %v346_v27  ;;  %v386_v36 = vadd.f32 %v651_v21, %v347_v28  ;;  %v351_v37 = vmul.f32 %v637_v11, %v312_v29 }
  0x18   : > { %v387_v38 = vadd.f32 %v651_v21, %v348_v30  ;;  %v388_v39 = vadd.f32 %v651_v21, %v349_v31  ;;  %v389_v40 = vadd.f32 %v651_v21, %v350_v32  ;;  %v352_v41 = vmul.f32 %v637_v11, %v313_v33  ;;  %v244_v30 = vld [vmem:[%s618_s26 + $0x80] sm:$0xff]  ;;  %v245_v31 = vld [vmem:[%s618_s26 + $0x88] sm:$0xff]  ;;  %v246_v32 = vld [vmem:[%s618_s26 + $0x90] sm:$0xff] }
  0x19   : > { %v416_v45 = vmax.f32 %v384_v34, 0.0  ;;  %v417_v46 = vmax.f32 %v385_v35, 0.0  ;;  %v418_v47 = vmax.f32 %v386_v36, 0.0  ;;  %v390_v48 = vadd.f32 %v651_v21, %v351_v37  ;;  %v247_v37 = vld [vmem:[%s618_s26 + $0x98] sm:$0xff] }
  0x1a   : > { %v419_v52 = vmax.f32 %v387_v38, 0.0  ;;  %v420_v53 = vmax.f32 %v388_v39, 0.0  ;;  %v421_v54 = vmax.f32 %v389_v40, 0.0  ;;  %v391_v55 = vadd.f32 %v651_v21, %v352_v41  ;;  %v248_v38 = vld [vmem:[%s618_s26 + $0xa0] sm:$0xff]  ;;  %v249_v39 = vld [vmem:[%s618_s26 + $0xa8] sm:$0xff] }
  0x1b   : > { %448 = vst [vmem:[%s674_s10] sm:$0xff] %v416_v45  ;;  %449 = vst [vmem:[%s674_s10 + $0x8] sm:$0xff] %v417_v46  ;;  %v422_v57 = vmax.f32 %v390_v48, 0.0  ;;  %v275_v58 = vsub.f32 %v236_v42, %v611_v0  ;;  %v276_v59 = vsub.f32 %v237_v43, %v611_v0  ;;  %v277_v60 = vsub.f32 %v238_v44, %v611_v0  ;;  %v250_v44 = vld [vmem:[%s618_s26 + $0xb0] sm:$0xff] }
  0x1c   : > { %450 = vst [vmem:[%s674_s10 + $0x10] sm:$0xff] %v418_v47  ;;  %451 = vst [vmem:[%s674_s10 + $0x18] sm:$0xff] %v419_v52  ;;  %v423_v62 = vmax.f32 %v391_v55, 0.0  ;;  %v278_v63 = vsub.f32 %v239_v49, %v611_v0  ;;  %v279_v2 = vsub.f32 %v240_v50, %v611_v0  ;;  %v280_v3 = vsub.f32 %v241_v51, %v611_v0  ;;  %v251_v49 = vld [vmem:[%s618_s26 + $0xb8] sm:$0xff] }
  0x1d   : > { %452 = vst [vmem:[%s674_s10 + $0x20] sm:$0xff] %v420_v53  ;;  %453 = vst [vmem:[%s674_s10 + $0x28] sm:$0xff] %v421_v54  ;;  %v314_v4 = vmul.f32 %v623_v1, %v275_v58  ;;  %v315_v5 = vmul.f32 %v623_v1, %v276_v59  ;;  %v316_v6 = vmul.f32 %v623_v1, %v277_v60 }
  0x1e   : > { %454 = vst [vmem:[%s674_s10 + $0x30] sm:$0xff] %v422_v57  ;;  %v281_v7 = vsub.f32 %v242_v56, %v611_v0  ;;  %455 = vst [vmem:[%s674_s10 + $0x38] sm:$0xff] %v423_v62  ;;  %v317_v8 = vmul.f32 %v623_v1, %v278_v63  ;;  %v318_v9 = vmul.f32 %v623_v1, %v279_v2 }
  0x1f   : > { %v319_v10 = vmul.f32 %v623_v1, %v280_v3  ;;  %v282_v12 = vsub.f32 %v243_v61, %v611_v0  ;;  %v353_v13 = vmul.f32 %v637_v11, %v314_v4  ;;  %v354_v14 = vmul.f32 %v637_v11, %v315_v5 }
  0x20   : > { %v355_v15 = vmul.f32 %v637_v11, %v316_v6  ;;  %v320_v16 = vmul.f32 %v623_v1, %v281_v7  ;;  %v356_v17 = vmul.f32 %v637_v11, %v317_v8  ;;  %v357_v18 = vmul.f32 %v637_v11, %v318_v9 }
  0x21   : > { %v358_v19 = vmul.f32 %v637_v11, %v319_v10  ;;  %v321_v20 = vmul.f32 %v623_v1, %v282_v12  ;;  %v392_v22 = vadd.f32 %v651_v21, %v353_v13  ;;  %v393_v23 = vadd.f32 %v651_v21, %v354_v14 }
  0x22   : > { %v394_v24 = vadd.f32 %v651_v21, %v355_v15  ;;  %v359_v25 = vmul.f32 %v637_v11, %v320_v16  ;;  %v395_v26 = vadd.f32 %v651_v21, %v356_v17  ;;  %v396_v27 = vadd.f32 %v651_v21, %v357_v18  ;;  %v252_v17 = vld [vmem:[%s618_s26 + $0xc0] sm:$0xff]  ;;  %v253_v18 = vld [vmem:[%s618_s26 + $0xc8] sm:$0xff] }
  0x23   : > { %v397_v28 = vadd.f32 %v651_v21, %v358_v19  ;;  %v360_v29 = vmul.f32 %v637_v11, %v321_v20  ;;  %v424_v33 = vmax.f32 %v392_v22, 0.0  ;;  %v425_v34 = vmax.f32 %v393_v23, 0.0  ;;  %v254_v19 = vld [vmem:[%s618_s26 + $0xd0] sm:$0xff] }
  0x24   : > { %v426_v35 = vmax.f32 %v394_v24, 0.0  ;;  %v398_v36 = vadd.f32 %v651_v21, %v359_v25  ;;  %v427_v40 = vmax.f32 %v395_v26, 0.0  ;;  %v428_v41 = vmax.f32 %v396_v27, 0.0  ;;  %v255_v25 = vld [vmem:[%s618_s26 + $0xd8] sm:$0xff]  ;;  %v256_v26 = vld [vmem:[%s618_s26 + $0xe0] sm:$0xff]  ;;  %v257_v27 = vld [vmem:[%s618_s26 + $0xe8] sm:$0xff] }
  0x25   : > { %v429_v42 = vmax.f32 %v397_v28, 0.0  ;;  %v399_v43 = vadd.f32 %v651_v21, %v360_v29  ;;  %456 = vst [vmem:[%s674_s10 + $0x40] sm:$0xff] %v424_v33  ;;  %457 = vst [vmem:[%s674_s10 + $0x48] sm:$0xff] %v425_v34  ;;  %v283_v46 = vsub.f32 %v244_v30, %v611_v0  ;;  %v284_v47 = vsub.f32 %v245_v31, %v611_v0 }
  0x26   : > { %458 = vst [vmem:[%s674_s10 + $0x50] sm:$0xff] %v426_v35  ;;  %v430_v45 = vmax.f32 %v398_v36, 0.0  ;;  %v285_v48 = vsub.f32 %v246_v32, %v611_v0  ;;  %459 = vst [vmem:[%s674_s10 + $0x58] sm:$0xff] %v427_v40  ;;  %v286_v51 = vsub.f32 %v247_v37, %v611_v0  ;;  %v287_v52 = vsub.f32 %v248_v38, %v611_v0  ;;  %v258_v32 = vld [vmem:[%s618_s26 + $0xf0] sm:$0xff]  ;;  %v259_v37 = vld [vmem:[%s618_s26 + $0xf8] sm:$0xff] }
  0x27   : > { %460 = vst [vmem:[%s674_s10 + $0x60] sm:$0xff] %v428_v41  ;;  %461 = vst [vmem:[%s674_s10 + $0x68] sm:$0xff] %v429_v42  ;;  %v431_v50 = vmax.f32 %v399_v43, 0.0  ;;  %v288_v53 = vsub.f32 %v249_v39, %v611_v0  ;;  %v322_v54 = vmul.f32 %v623_v1, %v283_v46  ;;  %v323_v55 = vmul.f32 %v623_v1, %v284_v47 }
  0x28   : > { %462 = vst [vmem:[%s674_s10 + $0x70] sm:$0xff] %v430_v45  ;;  %v324_v56 = vmul.f32 %v623_v1, %v285_v48  ;;  %v289_v57 = vsub.f32 %v250_v44, %v611_v0  ;;  %v325_v58 = vmul.f32 %v623_v1, %v286_v51  ;;  %v326_v59 = vmul.f32 %v623_v1, %v287_v52 }
  0x29   : > { %463 = vst [vmem:[%s674_s10 + $0x78] sm:$0xff] %v431_v50  ;;  %v327_v60 = vmul.f32 %v623_v1, %v288_v53  ;;  %v290_v61 = vsub.f32 %v251_v49, %v611_v0  ;;  %v361_v62 = vmul.f32 %v637_v11, %v322_v54  ;;  %v362_v63 = vmul.f32 %v637_v11, %v323_v55 }
  0x2a   : > { %v363_v2 = vmul.f32 %v637_v11, %v324_v56  ;;  %v328_v3 = vmul.f32 %v623_v1, %v289_v57  ;;  %v364_v4 = vmul.f32 %v637_v11, %v325_v58  ;;  %v365_v5 = vmul.f32 %v637_v11, %v326_v59 }
  0x2b   : > { %v366_v6 = vmul.f32 %v637_v11, %v327_v60  ;;  %v329_v7 = vmul.f32 %v623_v1, %v290_v61  ;;  %v400_v8 = vadd.f32 %v651_v21, %v361_v62  ;;  %v401_v9 = vadd.f32 %v651_v21, %v362_v63 }
  0x2c   : > { %v402_v10 = vadd.f32 %v651_v21, %v363_v2  ;;  %v367_v12 = vmul.f32 %v637_v11, %v328_v3  ;;  %v403_v13 = vadd.f32 %v651_v21, %v364_v4  ;;  %v404_v14 = vadd.f32 %v651_v21, %v365_v5 }
  0x2d   : > { %v405_v15 = vadd.f32 %v651_v21, %v366_v6  ;;  %v368_v16 = vmul.f32 %v637_v11, %v329_v7  ;;  %v432_v20 = vmax.f32 %v400_v8, 0.0  ;;  %v433_v22 = vmax.f32 %v401_v9, 0.0 }
  0x2e   : > { %v434_v23 = vmax.f32 %v402_v10, 0.0  ;;  %v406_v24 = vadd.f32 %v651_v21, %v367_v12  ;;  %v435_v28 = vmax.f32 %v403_v13, 0.0  ;;  %v436_v29 = vmax.f32 %v404_v14, 0.0 }
  0x2f   : > { %v437_v30 = vmax.f32 %v405_v15, 0.0  ;;  %v407_v31 = vadd.f32 %v651_v21, %v368_v16  ;;  %464 = vst [vmem:[%s674_s10 + $0x80] sm:$0xff] %v432_v20  ;;  %465 = vst [vmem:[%s674_s10 + $0x88] sm:$0xff] %v433_v22  ;;  %v291_v34 = vsub.f32 %v252_v17, %v611_v0  ;;  %v292_v35 = vsub.f32 %v253_v18, %v611_v0 }
  0x30   : > { %466 = vst [vmem:[%s674_s10 + $0x90] sm:$0xff] %v434_v23  ;;  %v438_v33 = vmax.f32 %v406_v24, 0.0  ;;  %v293_v36 = vsub.f32 %v254_v19, %v611_v0  ;;  %467 = vst [vmem:[%s674_s10 + $0x98] sm:$0xff] %v435_v28  ;;  %v294_v39 = vsub.f32 %v255_v25, %v611_v0  ;;  %v295_v40 = vsub.f32 %v256_v26, %v611_v0 }
  0x31   : > { %468 = vst [vmem:[%s674_s10 + $0xa0] sm:$0xff] %v436_v29  ;;  %469 = vst [vmem:[%s674_s10 + $0xa8] sm:$0xff] %v437_v30  ;;  %v439_v38 = vmax.f32 %v407_v31, 0.0  ;;  %v296_v41 = vsub.f32 %v257_v27, %v611_v0  ;;  %v330_v42 = vmul.f32 %v623_v1, %v291_v34  ;;  %v331_v43 = vmul.f32 %v623_v1, %v292_v35 }
  0x32   : > { %470 = vst [vmem:[%s674_s10 + $0xb0] sm:$0xff] %v438_v33  ;;  %v332_v44 = vmul.f32 %v623_v1, %v293_v36  ;;  %v297_v45 = vsub.f32 %v258_v32, %v611_v0  ;;  %v333_v46 = vmul.f32 %v623_v1, %v294_v39  ;;  %v334_v47 = vmul.f32 %v623_v1, %v295_v40 }
  0x33   : > { %471 = vst [vmem:[%s674_s10 + $0xb8] sm:$0xff] %v439_v38  ;;  %v335_v48 = vmul.f32 %v623_v1, %v296_v41  ;;  %v298_v49 = vsub.f32 %v259_v37, %v611_v0  ;;  %v369_v50 = vmul.f32 %v637_v11, %v330_v42  ;;  %v370_v51 = vmul.f32 %v637_v11, %v331_v43 }
  0x34   : > { %v371_v52 = vmul.f32 %v637_v11, %v332_v44  ;;  %v336_v53 = vmul.f32 %v623_v1, %v297_v45  ;;  %v372_v54 = vmul.f32 %v637_v11, %v333_v46  ;;  %v373_v55 = vmul.f32 %v637_v11, %v334_v47 }
  0x35   : > { %v374_v56 = vmul.f32 %v637_v11, %v335_v48  ;;  %v337_v57 = vmul.f32 %v623_v1, %v298_v49  ;;  %v408_v58 = vadd.f32 %v651_v21, %v369_v50  ;;  %v409_v0 = vadd.f32 %v651_v21, %v370_v51 }
  0x36   : > { %v410_v59 = vadd.f32 %v651_v21, %v371_v52  ;;  %v375_v60 = vmul.f32 %v637_v11, %v336_v53  ;;  %v411_v61 = vadd.f32 %v651_v21, %v372_v54  ;;  %v412_v62 = vadd.f32 %v651_v21, %v373_v55 }
  0x37   : > { %v413_v63 = vadd.f32 %v651_v21, %v374_v56  ;;  %v376_v1 = vmul.f32 %v637_v11, %v337_v57  ;;  %v440_v2 = vmax.f32 %v408_v58, 0.0  ;;  %v441_v3 = vmax.f32 %v409_v0, 0.0 }
  0x38   : > { %v442_v4 = vmax.f32 %v410_v59, 0.0  ;;  %v414_v5 = vadd.f32 %v651_v21, %v375_v60  ;;  %v443_v6 = vmax.f32 %v411_v61, 0.0  ;;  %v444_v7 = vmax.f32 %v412_v62, 0.0 }
  0x39   : > { %v445_v8 = vmax.f32 %v413_v63, 0.0  ;;  %v415_v9 = vadd.f32 %v651_v21, %v376_v1  ;;  %472 = vst [vmem:[%s674_s10 + $0xc0] sm:$0xff] %v440_v2  ;;  %473 = vst [vmem:[%s674_s10 + $0xc8] sm:$0xff] %v441_v3 }
  0x3a   : > { %474 = vst [vmem:[%s674_s10 + $0xd0] sm:$0xff] %v442_v4  ;;  %v446_v10 = vmax.f32 %v414_v5, 0.0  ;;  %475 = vst [vmem:[%s674_s10 + $0xd8] sm:$0xff] %v443_v6 }
  0x3b   : > { %476 = vst [vmem:[%s674_s10 + $0xe0] sm:$0xff] %v444_v7  ;;  %477 = vst [vmem:[%s674_s10 + $0xe8] sm:$0xff] %v445_v8  ;;  %v447_v11 = vmax.f32 %v415_v9, 0.0 }
  0x3c   : > { %478 = vst [vmem:[%s674_s10 + $0xf0] sm:$0xff] %v446_v10 }
  0x3d   : > { %479 = vst [vmem:[%s674_s10 + $0xf8] sm:$0xff] %v447_v11 }
  0x3e PF: > { %s15_s18 = sadd.s32 1, %s565_s18  }
  0x3f   : > { %p12_p4 = scmp.ge.s32.totalorder %s15_s18, 5  }
  0x41   :  { %14 = sbr.rel (!%p12_p4) target bundleno = 1 (0x1), region = 70 }

// kernel: rgcn_forward.11
= control target key start
LH: loop header
LB: loop body
LE: loop exit
PB: predicated region body
PF: predicated region fallthrough
CT: control target
= control target key end

     0   :  { %s2779_s21 = smov 0   ;;  %s2781_s22 = smov 0   ;;  %s3243_s0 = inlined_call_operand.vmem [shape: f32[768,128], index: 0, kind: input, shape index: {}]   ;;  %s3244_s1 = inlined_call_operand.vmem [shape: bf16[128,512], index: 1, kind: input, shape index: {}]   ;;  %s3245_s2 = inlined_call_operand.vmem [shape: f32[1,128], index: 2, kind: input, shape index: {}]   ;;  %s3246_s3 = inlined_call_operand.vmem [shape: f32[1,128], index: 3, kind: input, shape index: {}]   ;;  %s3247_s4 = inlined_call_operand.vmem [shape: f32[1,128], index: 4, kind: input, shape index: {}]   ;;  %s3248_s5 = inlined_call_operand.vmem [shape: f32[1,128], index: 5, kind: input, shape index: {}]   ;;  %s3249_s6 = inlined_call_operand.vmem [shape: bf16[768,512], index: 6, kind: output, shape index: {}]  }
   0x1   :  { %s2783_s23 = smov 0  }
   0x2 LB: > { %s35_s24 = sadd.s32 1, %s2737_s22  ;;  %p2473_p0 = scmp.ge.s32.totalorder %s2741_s23, 1  ;;  %s2741_s23 = sphi %s2783_s23, %s16_s23   ;;  %s2737_s22 = sphi %s2781_s22, %s3251_s22   ;;  %s2733_s21 = sphi %s2779_s21, %s3250_s21  }
   0x3   : > { %p37_p1 = scmp.ge.s32.totalorder %s35_s24, 3  ;;  %p290_p2 = scmp.lt.s32.totalorder %s2741_s23, 4 }
   0x5   : > { %s3253_s24 = smov (%p37_p1, %s35_s24), 0  ;;  %p291_p3 = pnand %p2473_p0, %p290_p2 }
   0x6   : > { %v2671_v0 = vld [vmem:[%s3244_s1 + $0x4] ss:$16 sps:$4 sm:$0xff] (!%p291_p3)   ;;  %v2673_v1 = vld [vmem:[%s3244_s1 + $0xc] ss:$16 sps:$4 sm:$0xff] (!%p291_p3)   ;;  %v2743_v2 = vmov (!%p291_p3), 0   ;;  %s2474_s11 = sshll.u32 (!%p291_p3), %s2733_s21, 5 }
   0x7   : > { %294 = sbr.rel (%p291_p3) target bundleno = 378 (0x17a), region = 44  ;;  %1116 = vmatprep.mubr.bf16.mxu0 (!%p291_p3), %v2743_v2  ;;  %1309 = vmatprep.mubr.bf16.mxu1 (!%p291_p3), %v2743_v2  ;;  %v2675_v3 = vld [vmem:[%s3244_s1] ss:$16 sps:$4 sm:$0xff] (!%p291_p3)   ;;  %v2676_v4 = vld [vmem:[%s3244_s1 + $0x8] ss:$16 sps:$4 sm:$0xff] (!%p291_p3)   ;;  %p351_p4 = scmp.lt.s32.totalorder (!%p291_p3), %s2474_s11, 95 }
   0x8   : > { %1084 = vmatprep.subr.bf16.mxu0 (!%p291_p3), %v2671_v0  ;;  %1277 = vmatprep.subr.bf16.mxu1 (!%p291_p3), %v2673_v1  ;;  %v2677_v5 = vld [vmem:[%s3244_s1 + $0x24] ss:$16 sps:$4 sm:$0xff] (!%p291_p3)   ;;  %v2679_v6 = vld [vmem:[%s3244_s1 + $0x2c] ss:$16 sps:$4 sm:$0xff] (!%p291_p3)   ;;  %v2681_v7 = vld [vmem:[%s3244_s1 + $0x20] ss:$16 sps:$4 sm:$0xff] (!%p291_p3)  }
   0x9   : > { %1085 = vmatpush1.bf16.msra.mxu0 (!%p291_p3), %v2675_v3  ;;  %1278 = vmatpush1.bf16.msra.mxu1 (!%p291_p3), %v2676_v4  ;;  %v2682_v8 = vld [vmem:[%s3244_s1 + $0x28] ss:$16 sps:$4 sm:$0xff] (!%p291_p3)   ;;  %v2683_v9 = vld [vmem:[%s3244_s1 + $0x44] ss:$16 sps:$4 sm:$0xff] (!%p291_p3)   ;;  %v2685_v10 = vld [vmem:[%s3244_s1 + $0x4c] ss:$16 sps:$4 sm:$0xff] (!%p291_p3)  }
   0xa   : > { %1086 = vmatprep.subr.bf16.mxu0 (!%p291_p3), %v2677_v5  ;;  %1279 = vmatprep.subr.bf16.mxu1 (!%p291_p3), %v2679_v6  ;;  %v2687_v11 = vld [vmem:[%s3244_s1 + $0x40] ss:$16 sps:$4 sm:$0xff] (!%p291_p3)   ;;  %v2688_v12 = vld [vmem:[%s3244_s1 + $0x48] ss:$16 sps:$4 sm:$0xff] (!%p291_p3)   ;;  %v2689_v13 = vld [vmem:[%s3244_s1 + $0x64] ss:$16 sps:$4 sm:$0xff] (!%p291_p3)  }
   0xb   : > { %v2691_v14 = vld [vmem:[%s3244_s1 + $0x6c] ss:$16 sps:$4 sm:$0xff] (!%p291_p3)   ;;  %v2693_v15 = vld [vmem:[%s3244_s1 + $0x60] ss:$16 sps:$4 sm:$0xff] (!%p291_p3)   ;;  %v2694_v16 = vld [vmem:[%s3244_s1 + $0x68] ss:$16 sps:$4 sm:$0xff] (!%p291_p3)  }
   0xc   : > { %v2695_v17 = vld [vmem:[%s3244_s1 + $0x84] ss:$16 sps:$4 sm:$0xff] (!%p291_p3)   ;;  %v2697_v18 = vld [vmem:[%s3244_s1 + $0x8c] ss:$16 sps:$4 sm:$0xff] (!%p291_p3)   ;;  %v2699_v19 = vld [vmem:[%s3244_s1 + $0x80] ss:$16 sps:$4 sm:$0xff] (!%p291_p3)  }
   0xd   : > { %1087 = vmatpush1.bf16.msra.mxu0 (!%p291_p3), %v2681_v7  ;;  %1280 = vmatpush1.bf16.msra.mxu1 (!%p291_p3), %v2682_v8  ;;  %v2700_v20 = vld [vmem:[%s3244_s1 + $0x88] ss:$16 sps:$4 sm:$0xff] (!%p291_p3)   ;;  %v2701_v21 = vld [vmem:[%s3244_s1 + $0xa4] ss:$16 sps:$4 sm:$0xff] (!%p291_p3)   ;;  %v2703_v22 = vld [vmem:[%s3244_s1 + $0xac] ss:$16 sps:$4 sm:$0xff] (!%p291_p3)  }
   0xe   : > { %1088 = vmatprep.subr.bf16.mxu0 %v2683_v9  ;;  %1281 = vmatprep.subr.bf16.mxu1 %v2685_v10  ;;  %s3255_s11 = smov (!%p351_p4, %s2474_s11), 95  ;;  %v2705_v23 = vld [vmem:[%s3244_s1 + $0xa0] ss:$16 sps:$4 sm:$0xff]   ;;  %v2706_v24 = vld [vmem:[%s3244_s1 + $0xa8] ss:$16 sps:$4 sm:$0xff]  }
   0xf   : > { %s2475_s25 = sshll.u32 %s3255_s11, 3  ;;  %v2707_v25 = vld [vmem:[%s3244_s1 + $0xc4] ss:$16 sps:$4 sm:$0xff]   ;;  %v2709_v26 = vld [vmem:[%s3244_s1 + $0xcc] ss:$16 sps:$4 sm:$0xff]  }
  0x10   : > { %s2874_s8 = scalar_lea.vmem %s3243_s0, %s2475_s25  ;;  %v2711_v29 = vld [vmem:[%s3244_s1 + $0xc0] ss:$16 sps:$4 sm:$0xff]   ;;  %v2712_v30 = vld [vmem:[%s3244_s1 + $0xc8] ss:$16 sps:$4 sm:$0xff]   ;;  %v2713_v43 = vld [vmem:[%s3244_s1 + $0xe4] ss:$16 sps:$4 sm:$0xff]  }
  0x11   : > { %1089 = vmatpush1.bf16.msra.mxu0 %v2687_v11  ;;  %1282 = vmatpush1.bf16.msra.mxu1 %v2688_v12  ;;  %v528_v27 = vld [vmem:[%s2874_s8] sm:$0xff]  ;;  %v529_v28 = vld [vmem:[%s2874_s8 + $0x8] sm:$0xff]  ;;  %v530_v36 = vld [vmem:[%s2874_s8 + $0x10] sm:$0xff] }
  0x12   : > { %1090 = vmatprep.subr.bf16.mxu0 %v2689_v13  ;;  %1283 = vmatprep.subr.bf16.mxu1 %v2691_v14  ;;  %v2899_v31 = vld [vmem:[%s3245_s2] ss:$0 sm:$0xff]  ;;  %v531_v37 = vld [vmem:[%s2874_s8 + $0x18] sm:$0xff]  ;;  %v533_v41 = vld [vmem:[%s2874_s8 + $0x28] sm:$0xff] }
  0x13   : > { %v2904_v32 = vld [vmem:[%s3246_s3] ss:$0 sm:$0xff]  ;;  %v567_v33 = vsub.f32 %v528_v27, %v2899_v31  ;;  %v568_v34 = vsub.f32 %v529_v28, %v2899_v31  ;;  %v569_v38 = vsub.f32 %v530_v36, %v2899_v31  ;;  %v570_v39 = vsub.f32 %v531_v37, %v2899_v31  ;;  %v534_v42 = vld [vmem:[%s2874_s8 + $0x30] sm:$0xff]  ;;  %v2715_v44 = vld [vmem:[%s3244_s1 + $0xec] ss:$16 sps:$4 sm:$0xff]  }
  0x14   : > { %v2911_v35 = vld [vmem:[%s3247_s4] ss:$0 sm:$0xff]  ;;  %v535_v48 = vld [vmem:[%s2874_s8 + $0x38] sm:$0xff]  ;;  %v572_v52 = vsub.f32 %v533_v41, %v2899_v31  ;;  %v573_v53 = vsub.f32 %v534_v42, %v2899_v31  ;;  %v537_v11 = vld [vmem:[%s2874_s8 + $0x48] sm:$0xff] }
  0x15   : > { %1091 = vmatpush1.bf16.msra.mxu0 %v2693_v15  ;;  %1284 = vmatpush1.bf16.msra.mxu1 %v2694_v16  ;;  %v532_v40 = vld [vmem:[%s2874_s8 + $0x20] sm:$0xff]  ;;  %v606_v45 = vmul.f32 %v2904_v32, %v567_v33  ;;  %v607_v46 = vmul.f32 %v2904_v32, %v568_v34  ;;  %v608_v50 = vmul.f32 %v2904_v32, %v569_v38  ;;  %v2718_v59 = vld [vmem:[%s3244_s1 + $0xe8] ss:$16 sps:$4 sm:$0xff]   ;;  %v538_v12 = vld [vmem:[%s2874_s8 + $0x50] sm:$0xff] }
  0x16   : > { %1092 = vmatprep.subr.bf16.mxu0 %v2695_v17  ;;  %1285 = vmatprep.subr.bf16.mxu1 %v2697_v18  ;;  %v571_v47 = vsub.f32 %v532_v40, %v2899_v31  ;;  %v2933_v49 = vld [vmem:[%s3248_s5] ss:$0 sm:$0xff]  ;;  %v609_v51 = vmul.f32 %v2904_v32, %v570_v39  ;;  %v574_v57 = vsub.f32 %v535_v48, %v2899_v31  ;;  %v539_v17 = vld [vmem:[%s2874_s8 + $0x58] sm:$0xff]  ;;  %v541_v34 = vld [vmem:[%s2874_s8 + $0x68] sm:$0xff] }
  0x17   : > { %v645_v54 = vmul.f32 %v2911_v35, %v606_v45  ;;  %v646_v55 = vmul.f32 %v2911_v35, %v607_v46  ;;  %v2717_v58 = vld [vmem:[%s3244_s1 + $0xe0] ss:$16 sps:$4 sm:$0xff]   ;;  %v647_v60 = vmul.f32 %v2911_v35, %v608_v50  ;;  %v611_v62 = vmul.f32 %v2904_v32, %v572_v52  ;;  %v545_v50 = vld [vmem:[%s2874_s8 + $0x88] sm:$0xff] }
  0x18   : > { %v610_v56 = vmul.f32 %v2904_v32, %v571_v47  ;;  %v648_v61 = vmul.f32 %v2911_v35, %v609_v51  ;;  %v612_v5 = vmul.f32 %v2904_v32, %v573_v53  ;;  %v536_v6 = vld [vmem:[%s2874_s8 + $0x40] sm:$0xff]  ;;  %v613_v10 = vmul.f32 %v2904_v32, %v574_v57  ;;  %v2988_v46 = vld [vmem:[%s2874_s8 + $0x70] sm:$0xff]  ;;  %v2995_v53 = vld [vmem:[%s2874_s8 + $0x78] sm:$0xff] }
  0x19   : > { %1093 = vmatpush1.bf16.msra.mxu0 %v2699_v19  ;;  %1286 = vmatpush1.bf16.msra.mxu1 %v2700_v20  ;;  %v684_v63 = vadd.f32 %v2933_v49, %v645_v54  ;;  %v685_v0 = vadd.f32 %v2933_v49, %v646_v55  ;;  %v686_v1 = vadd.f32 %v2933_v49, %v647_v60  ;;  %v544_v42 = vld [vmem:[%s2874_s8 + $0x80] sm:$0xff]  ;;  %v546_v55 = vld [vmem:[%s2874_s8 + $0x90] sm:$0xff] }
  0x1a   : > { %1094 = vmatprep.subr.bf16.mxu0 %v2701_v21  ;;  %1287 = vmatprep.subr.bf16.mxu1 %v2703_v22  ;;  %v687_v3 = vadd.f32 %v2933_v49, %v648_v61  ;;  %v649_v4 = vmul.f32 %v2911_v35, %v610_v56  ;;  %v650_v9 = vmul.f32 %v2911_v35, %v611_v62 }
  0x1b   : > { %v716_v7 = vmax.f32 %v684_v63, 0.0  ;;  %v717_v8 = vmax.f32 %v685_v0, 0.0  ;;  %v651_v14 = vmul.f32 %v2911_v35, %v612_v5  ;;  %v652_v15 = vmul.f32 %v2911_v35, %v613_v10  ;;  %v548_v0 = vld [vmem:[%s2874_s8 + $0xa0] sm:$0xff] }
  0x1c   : > { %v575_v16 = vsub.f32 %v536_v6, %v2899_v31  ;;  %v718_v18 = vmax.f32 %v686_v1, 0.0  ;;  %v688_v19 = vadd.f32 %v2933_v49, %v649_v4  ;;  %v576_v20 = vsub.f32 %v537_v11, %v2899_v31  ;;  %v549_v6 = vld [vmem:[%s2874_s8 + $0xa8] sm:$0xff]  ;;  %v550_v11 = vld [vmem:[%s2874_s8 + $0xb0] sm:$0xff] }
  0x1d   : > { %1095 = vmatpush1.bf16.msra.mxu0 %v2705_v23  ;;  %1288 = vmatpush1.bf16.msra.mxu1 %v2706_v24  ;;  %v876_v13 = vpack.c.bf16 %v717_v8, %v716_v7  ;;  %v719_v21 = vmax.f32 %v687_v3, 0.0  ;;  %v689_v22 = vadd.f32 %v2933_v49, %v650_v9  ;;  %v577_v24 = vsub.f32 %v538_v12, %v2899_v31 }
  0x1e   : > { %1096 = vmatprep.subr.bf16.mxu0 %v2707_v25  ;;  %1289 = vmatprep.subr.bf16.mxu1 %v2709_v26  ;;  %v614_v23 = vmul.f32 %v2904_v32, %v575_v16  ;;  %v615_v25 = vmul.f32 %v2904_v32, %v576_v20  ;;  %v578_v26 = vsub.f32 %v539_v17, %v2899_v31  ;;  %v720_v37 = vmax.f32 %v688_v19, 0.0  ;;  %v551_v20 = vld [vmem:[%s2874_s8 + $0xb8] sm:$0xff] }
  0x1f   : > { %v690_v27 = vadd.f32 %v2933_v49, %v651_v14  ;;  %v691_v28 = vadd.f32 %v2933_v49, %v652_v15  ;;  %v877_v36 = vpack.c.bf16 %v719_v21, %v718_v18  ;;  %v721_v38 = vmax.f32 %v689_v22, 0.0 }
  0x20   : > { %v654_v33 = vmul.f32 %v2911_v35, %v615_v25  ;;  %v616_v39 = vmul.f32 %v2904_v32, %v577_v24  ;;  %v617_v40 = vmul.f32 %v2904_v32, %v578_v26  ;;  %v580_v45 = vsub.f32 %v541_v34, %v2899_v31 }
  0x21   : > { %1097 = vmatpush1.bf16.msra.mxu0 %v2711_v29  ;;  %1290 = vmatpush1.bf16.msra.mxu1 %v2712_v30  ;;  %v540_v29 = vld [vmem:[%s2874_s8 + $0x60] sm:$0xff]  ;;  %v653_v30 = vmul.f32 %v2911_v35, %v614_v23  ;;  %v878_v51 = vpack.c.bf16 %v721_v38, %v720_v37  ;;  %v583_v54 = vsub.f32 %v544_v42, %v2899_v31 }
  0x22   : > { %1098 = vmatprep.subr.bf16.mxu0 %v2713_v43  ;;  %1291 = vmatprep.subr.bf16.mxu1 %v2715_v44  ;;  %v579_v41 = vsub.f32 %v540_v29, %v2899_v31  ;;  %v722_v43 = vmax.f32 %v690_v27, 0.0  ;;  %v723_v44 = vmax.f32 %v691_v28, 0.0  ;;  %v693_v48 = vadd.f32 %v2933_v49, %v654_v33  ;;  %v552_v29 = vld [vmem:[%s2874_s8 + $0xc0] sm:$0xff] }
  0x23   : > { %v692_v47 = vadd.f32 %v2933_v49, %v653_v30  ;;  %v655_v52 = vmul.f32 %v2911_v35, %v616_v39  ;;  %v656_v56 = vmul.f32 %v2911_v35, %v617_v40  ;;  %v3009_v61 = vmul.f32 %v2904_v32, %v580_v45  ;;  %v553_v40 = vld [vmem:[%s2874_s8 + $0xc8] sm:$0xff]  ;;  %v554_v45 = vld [vmem:[%s2874_s8 + $0xd0] sm:$0xff] }
  0x24   : > { %v618_v57 = vmul.f32 %v2904_v32, %v579_v41  ;;  %v3006_v60 = vpack.c.bf16 %v723_v44, %v722_v43  ;;  %v584_v62 = vsub.f32 %v545_v50, %v2899_v31  ;;  %v622_v63 = vmul.f32 %v2904_v32, %v583_v54 }
  0x25   : > { %1099 = vmatpush1.bf16.msra.mxu0 %v2717_v58  ;;  %1292 = vmatpush1.bf16.msra.mxu1 %v2718_v59  ;;  %v581_v58 = vsub.f32 %v2988_v46, %v2899_v31  ;;  %v547_v59 = vld [vmem:[%s2874_s8 + $0x98] sm:$0xff]  ;;  %v724_v1 = vmax.f32 %v692_v47, 0.0  ;;  %v725_v3 = vmax.f32 %v693_v48, 0.0  ;;  %v582_v4 = vsub.f32 %v2995_v53, %v2899_v31 }
  0x26   : > { %v585_v5 = vsub.f32 %v546_v55, %v2899_v31  ;;  %v3019_v7 = vadd.f32 %v2933_v49, %v655_v52  ;;  %v623_v8 = vmul.f32 %v2904_v32, %v584_v62  ;;  %v661_v9 = vmul.f32 %v2911_v35, %v622_v63  ;;  %v555_v52 = vld [vmem:[%s2874_s8 + $0xd8] sm:$0xff] }
  0x27   : > { %v586_v10 = vsub.f32 %v547_v59, %v2899_v31  ;;  %v3026_v12 = vadd.f32 %v2933_v49, %v656_v56  ;;  %v587_v15 = vsub.f32 %v548_v0, %v2899_v31  ;;  %v588_v19 = vsub.f32 %v549_v6, %v2899_v31  ;;  %v556_v59 = vld [vmem:[%s2874_s8 + $0xe0] sm:$0xff] }
  0x28   : > { %1117 = vmatmul.mubr.bf16.vlgmr.msra.gmra.mrb[0].mxu0 %v876_v13  ;;  %1310 = vmatmul.mubr.bf16.vlgmr.msra.gmra.mrb[0].mxu1 %v876_v13  ;;  %v3029_v13 = vmul.f32 %v2911_v35, %v618_v57  ;;  %v624_v14 = vmul.f32 %v2904_v32, %v585_v5  ;;  %v662_v16 = vmul.f32 %v2911_v35, %v623_v8 }
  0x29   : > { %1126 = vmatprep.mubr.bf16.mxu0 %v2743_v2  ;;  %1319 = vmatprep.mubr.bf16.mxu1 %v2743_v2  ;;  %v700_v17 = vadd.f32 %v2933_v49, %v661_v9  ;;  %v625_v18 = vmul.f32 %v2904_v32, %v586_v10  ;;  %v3038_v21 = vpack.c.bf16 %v725_v3, %v724_v1  ;;  %v557_v9 = vld [vmem:[%s2874_s8 + $0xe8] sm:$0xff]  ;;  %v558_v10 = vld [vmem:[%s2874_s8 + $0xf0] sm:$0xff] }
  0x2a   : > { %v663_v22 = vmul.f32 %v2911_v35, %v624_v14  ;;  %v626_v23 = vmul.f32 %v2904_v32, %v587_v15  ;;  %v589_v24 = vsub.f32 %v550_v11, %v2899_v31  ;;  %v701_v25 = vadd.f32 %v2933_v49, %v662_v16 }
  0x2b   : > { %v732_v26 = vmax.f32 %v700_v17, 0.0  ;;  %v664_v27 = vmul.f32 %v2911_v35, %v625_v18  ;;  %v627_v28 = vmul.f32 %v2904_v32, %v588_v19  ;;  %v590_v34 = vsub.f32 %v551_v20, %v2899_v31 }
  0x2c   : > { %v702_v30 = vadd.f32 %v2933_v49, %v663_v22  ;;  %v665_v33 = vmul.f32 %v2911_v35, %v626_v23  ;;  %v628_v39 = vmul.f32 %v2904_v32, %v589_v24  ;;  %v591_v44 = vsub.f32 %v552_v29, %v2899_v31  ;;  %v559_v22 = vld [vmem:[%s2874_s8 + $0xf8] sm:$0xff]  ;;  %s2581_s8 = sshll.u32 %s3255_s11, 4 }
  0x2d   : > { %v703_v37 = vadd.f32 %v2933_v49, %v664_v27  ;;  %v666_v38 = vmul.f32 %v2911_v35, %v627_v28  ;;  %v629_v43 = vmul.f32 %v2904_v32, %v590_v34  ;;  %v592_v56 = vsub.f32 %v553_v40, %v2899_v31  ;;  %s3168_s21 = scalar_lea.vmem %s3249_s6, %s2581_s8 }
  0x2e   : > { %v734_v41 = vmax.f32 %v702_v30, 0.0  ;;  %v704_v42 = vadd.f32 %v2933_v49, %v665_v33  ;;  %v630_v57 = vmul.f32 %v2904_v32, %v591_v44  ;;  %v593_v1 = vsub.f32 %v554_v45, %v2899_v31 }
  0x2f   : > { %v735_v48 = vmax.f32 %v703_v37, 0.0  ;;  %v705_v50 = vadd.f32 %v2933_v49, %v666_v38  ;;  %v668_v55 = vmul.f32 %v2911_v35, %v629_v43  ;;  %v631_v5 = vmul.f32 %v2904_v32, %v592_v56 }
  0x30   : > { %1127 = vmatmul.mubr.bf16.gmra.mrb[4].mxu0 %v877_v36  ;;  %1320 = vmatmul.mubr.bf16.gmra.mrb[4].mxu1 %v877_v36  ;;  %v733_v36 = vmax.f32 %v701_v25, 0.0  ;;  %v736_v54 = vmax.f32 %v704_v42, 0.0  ;;  %v669_v6 = vmul.f32 %v2911_v35, %v630_v57  ;;  %v594_v8 = vsub.f32 %v555_v52, %v2899_v31 }
  0x31   : > { %1136 = vmatprep.mubr.bf16.mxu0 %v2743_v2  ;;  %1329 = vmatprep.mubr.bf16.mxu1 %v2743_v2  ;;  %v3069_v62 = vpack.c.bf16 %v735_v48, %v734_v41  ;;  %v737_v63 = vmax.f32 %v705_v50, 0.0  ;;  %v707_v3 = vadd.f32 %v2933_v49, %v668_v55  ;;  %v632_v15 = vmul.f32 %v2904_v32, %v593_v1 }
  0x32   : > { %v3060_v47 = vpack.c.bf16 %v733_v36, %v732_v26  ;;  %v595_v16 = vsub.f32 %v556_v59, %v2899_v31  ;;  %v670_v18 = vmul.f32 %v2911_v35, %v631_v5  ;;  %v708_v19 = vadd.f32 %v2933_v49, %v669_v6 }
  0x33   : > { %v3081_v11 = vpack.c.bf16 %v737_v63, %v736_v54  ;;  %v739_v17 = vmax.f32 %v707_v3, 0.0  ;;  %v633_v20 = vmul.f32 %v2904_v32, %v594_v8  ;;  %v596_v23 = vsub.f32 %v557_v9, %v2899_v31 }
  0x34   : > { %v634_v24 = vmul.f32 %v2904_v32, %v595_v16  ;;  %v597_v25 = vsub.f32 %v558_v10, %v2899_v31  ;;  %v709_v27 = vadd.f32 %v2933_v49, %v670_v18  ;;  %v740_v28 = vmax.f32 %v708_v19, 0.0 }
  0x35   : > { %v672_v29 = vmul.f32 %v2911_v35, %v633_v20  ;;  %v635_v33 = vmul.f32 %v2904_v32, %v596_v23  ;;  %v598_v36 = vsub.f32 %v559_v22, %v2899_v31  ;;  %v658_v37 = vmul.f32 %v2911_v35, %v3009_v61 }
  0x36   : > { %v673_v34 = vmul.f32 %v2911_v35, %v634_v24  ;;  %v741_v38 = vmax.f32 %v709_v27, 0.0  ;;  %v636_v40 = vmul.f32 %v2904_v32, %v597_v25  ;;  %v726_v45 = vmax.f32 %v3019_v7, 0.0 }
  0x37   : > { %v674_v42 = vmul.f32 %v2911_v35, %v635_v33  ;;  %v637_v44 = vmul.f32 %v2904_v32, %v598_v36  ;;  %v727_v61 = vmax.f32 %v3026_v12, 0.0  ;;  %v620_v12 = vmul.f32 %v2904_v32, %v581_v58 }
  0x38   : > { %1137 = vmatmul.mubr.bf16.gmra.mrb[8].mxu0 %v878_v51  ;;  %1330 = vmatmul.mubr.bf16.gmra.mrb[8].mxu1 %v878_v51  ;;  %v667_v51 = vmul.f32 %v2911_v35, %v628_v39  ;;  %v711_v39 = vadd.f32 %v2933_v49, %v672_v29  ;;  %v712_v43 = vadd.f32 %v2933_v49, %v673_v34 }
  0x39   : > { %1146 = vmatprep.mubr.bf16.mxu0 %v2743_v2  ;;  %1339 = vmatprep.mubr.bf16.mxu1 %v2743_v2  ;;  %v888_v48 = vpack.c.bf16 %v741_v38, %v740_v28  ;;  %v713_v52 = vadd.f32 %v2933_v49, %v674_v42  ;;  %v676_v55 = vmul.f32 %v2911_v35, %v637_v44 }
  0x3a   : > { %v706_v0 = vadd.f32 %v2933_v49, %v667_v51  ;;  %v743_v50 = vmax.f32 %v711_v39, 0.0  ;;  %v675_v51 = vmul.f32 %v2911_v35, %v636_v40  ;;  %v744_v54 = vmax.f32 %v712_v43, 0.0 }
  0x3b   : > { %v745_v57 = vmax.f32 %v713_v52, 0.0  ;;  %v715_v59 = vadd.f32 %v2933_v49, %v676_v55  ;;  %v621_v63 = vmul.f32 %v2904_v32, %v582_v4  ;;  %v881_v1 = vpack.c.bf16 %v727_v61, %v726_v45 }
  0x3c   : > { %v738_v14 = vmax.f32 %v706_v0, 0.0  ;;  %v714_v56 = vadd.f32 %v2933_v49, %v675_v51  ;;  %v697_v3 = vadd.f32 %v2933_v49, %v658_v37  ;;  %v659_v46 = vmul.f32 %v2911_v35, %v620_v12 }
  0x3d   : > { %v890_v5 = vpack.c.bf16 %v745_v57, %v744_v54  ;;  %v747_v6 = vmax.f32 %v715_v59, 0.0  ;;  %v660_v58 = vmul.f32 %v2911_v35, %v621_v63 }
  0x3e   : > { %v3095_v26 = vpack.c.bf16 %v739_v17, %v738_v14  ;;  %v746_v0 = vmax.f32 %v714_v56, 0.0  ;;  %v729_v9 = vmax.f32 %v697_v3, 0.0  ;;  %v698_v32 = vadd.f32 %v2933_v49, %v659_v46 }
  0x3f   : > { %v699_v53 = vadd.f32 %v2933_v49, %v660_v58 }
  0x40   : > { %1147 = vmatmul.mubr.bf16.gmra.mrb[12].mxu0 %v3006_v60  ;;  %1340 = vmatmul.mubr.bf16.gmra.mrb[12].mxu1 %v3006_v60  ;;  %v671_v60 = vmul.f32 %v2911_v35, %v632_v15  ;;  %v891_v8 = vpack.c.bf16 %v747_v6, %v746_v0  ;;  %v730_v4 = vmax.f32 %v698_v32, 0.0 }
  0x41   : > { %1156 = vmatprep.mubr.bf16.mxu0 %v2743_v2  ;;  %1349 = vmatprep.mubr.bf16.mxu1 %v2743_v2  ;;  %v731_v10 = vmax.f32 %v699_v53, 0.0 }
  0x42   : > { %v710_v30 = vadd.f32 %v2933_v49, %v671_v60 }
  0x43   : > { %v883_v14 = vpack.c.bf16 %v731_v10, %v730_v4 }
  0x44   : > { %v742_v41 = vmax.f32 %v710_v30, 0.0 }
  0x46   : > { %v889_v7 = vpack.c.bf16 %v743_v50, %v742_v41 }
  0x48   : > { %1157 = vmatmul.mubr.bf16.gmra.mrb[16].mxu0 %v3038_v21  ;;  %1350 = vmatmul.mubr.bf16.gmra.mrb[16].mxu1 %v3038_v21  ;;  %v696_v21 = vadd.f32 %v2933_v49, %v3029_v13 }
  0x49   : > { %1166 = vmatprep.mubr.bf16.mxu0 %v2743_v2  ;;  %1359 = vmatprep.mubr.bf16.mxu1 %v2743_v2 }
  0x4a   : > { %v728_v13 = vmax.f32 %v696_v21, 0.0 }
  0x4c   : > { %v882_v31 = vpack.c.bf16 %v729_v9, %v728_v13 }
  0x50   : > { %1167 = vmatmul.mubr.bf16.gmra.mrb[20].mxu0 %v881_v1  ;;  %1360 = vmatmul.mubr.bf16.gmra.mrb[20].mxu1 %v881_v1 }
  0x51   : > { %1176 = vmatprep.mubr.bf16.mxu0 %v2743_v2  ;;  %1369 = vmatprep.mubr.bf16.mxu1 %v2743_v2 }
  0x58   : > { %1177 = vmatmul.mubr.bf16.gmra.mrb[24].mxu0 %v882_v31  ;;  %1370 = vmatmul.mubr.bf16.gmra.mrb[24].mxu1 %v882_v31 }
  0x59   : > { %1186 = vmatprep.mubr.bf16.mxu0 %v2743_v2  ;;  %1379 = vmatprep.mubr.bf16.mxu1 %v2743_v2 }
  0x60   : > { %1187 = vmatmul.mubr.bf16.gmra.mrb[28].mxu0 %v883_v14  ;;  %1380 = vmatmul.mubr.bf16.gmra.mrb[28].mxu1 %v883_v14 }
  0x61   : > { %1196 = vmatprep.mubr.bf16.mxu0 %v2743_v2  ;;  %1389 = vmatprep.mubr.bf16.mxu1 %v2743_v2 }
  0x68   : > { %1197 = vmatmul.mubr.bf16.gmra.mrb[32].mxu0 %v3060_v47  ;;  %1390 = vmatmul.mubr.bf16.gmra.mrb[32].mxu1 %v3060_v47 }
  0x69   : > { %1206 = vmatprep.mubr.bf16.mxu0 %v2743_v2  ;;  %1399 = vmatprep.mubr.bf16.mxu1 %v2743_v2 }
  0x70   : > { %1207 = vmatmul.mubr.bf16.gmra.mrb[36].mxu0 %v3069_v62  ;;  %1400 = vmatmul.mubr.bf16.gmra.mrb[36].mxu1 %v3069_v62 }
  0x71   : > { %1216 = vmatprep.mubr.bf16.mxu0 %v2743_v2  ;;  %1409 = vmatprep.mubr.bf16.mxu1 %v2743_v2 }
  0x78   : > { %1217 = vmatmul.mubr.bf16.gmra.mrb[40].mxu0 %v3081_v11  ;;  %1410 = vmatmul.mubr.bf16.gmra.mrb[40].mxu1 %v3081_v11 }
  0x79   : > { %1226 = vmatprep.mubr.bf16.mxu0 %v2743_v2  ;;  %1419 = vmatprep.mubr.bf16.mxu1 %v2743_v2 }
  0x80   : > { %1227 = vmatmul.mubr.bf16.gmra.mrb[44].mxu0 %v3095_v26  ;;  %1420 = vmatmul.mubr.bf16.gmra.mrb[44].mxu1 %v3095_v26 }
  0x81   : > { %1236 = vmatprep.mubr.bf16.mxu0 %v2743_v2  ;;  %1429 = vmatprep.mubr.bf16.mxu1 %v2743_v2 }
  0x88   : > { %1237 = vmatmul.mubr.bf16.gmra.mrb[48].mxu0 %v888_v48  ;;  %1430 = vmatmul.mubr.bf16.gmra.mrb[48].mxu1 %v888_v48 }
  0x89   : > { %1246 = vmatprep.mubr.bf16.mxu0 %v2743_v2  ;;  %1439 = vmatprep.mubr.bf16.mxu1 %v2743_v2 }
  0x90   : > { %1247 = vmatmul.mubr.bf16.gmra.mrb[52].mxu0 %v889_v7  ;;  %1440 = vmatmul.mubr.bf16.gmra.mrb[52].mxu1 %v889_v7 }
  0x91   : > { %1256 = vmatprep.mubr.bf16.mxu0 %v2743_v2  ;;  %1449 = vmatprep.mubr.bf16.mxu1 %v2743_v2 }
  0x98   : > { %1257 = vmatmul.mubr.bf16.gmra.mrb[56].mxu0 %v890_v5  ;;  %1450 = vmatmul.mubr.bf16.gmra.mrb[56].mxu1 %v890_v5 }
  0x99   : > { %1266 = vmatprep.mubr.bf16.mxu0 %v2743_v2  ;;  %1459 = vmatprep.mubr.bf16.mxu1 %v2743_v2 }
  0xa0   : > { %1267 = vmatmul.mubr.bf16.gmra.mrb[60].mxu0 %v891_v8  ;;  %1460 = vmatmul.mubr.bf16.gmra.mrb[60].mxu1 %v891_v8 }
  0xfb   : > { %v1118_v35 = vpop.f32.mrb[0].mxu0  ;;  %v1311_v49 = vpop.f32.mrb[0].mxu1 }
  0xfc   : > { %v1120_v47 = vpop.f32.mrb[1].mxu0  ;;  %v1313_v62 = vpop.f32.mrb[1].mxu1 }
  0xfd   : > { %v2582_v11 = vpack.c.bf16 %v1120_v47, %v1118_v35  ;;  %v2583_v15 = vpack.c.bf16 %v1313_v62, %v1311_v49  ;;  %v1122_v16 = vpop.f32.mrb[2].mxu0  ;;  %v1315_v2 = vpop.f32.mrb[2].mxu1 }
  0xfe   : > { %v1124_v17 = vpop.f32.mrb[3].mxu0  ;;  %v1317_v18 = vpop.f32.mrb[3].mxu1 }
  0xff   : > { %2241 = vst [vmem:[%s3168_s21] sm:$0xff] %v2582_v11  ;;  %2242 = vst [vmem:[%s3168_s21 + $0x8] sm:$0xff] %v2583_v15  ;;  %v2584_v19 = vpack.c.bf16 %v1124_v17, %v1122_v16  ;;  %v2585_v20 = vpack.c.bf16 %v1317_v18, %v1315_v2 }
 0x101   : > { %2243 = vst [vmem:[%s3168_s21 + $0x10] sm:$0xff] %v2584_v19  ;;  %2244 = vst [vmem:[%s3168_s21 + $0x18] sm:$0xff] %v2585_v20 }
 0x103   : > { %v1128_v22 = vpop.f32.mrb[4].mxu0  ;;  %v1321_v60 = vpop.f32.mrb[4].mxu1 }
 0x104   : > { %v1130_v23 = vpop.f32.mrb[5].mxu0  ;;  %v1323_v24 = vpop.f32.mrb[5].mxu1 }
 0x105   : > { %v2586_v25 = vpack.c.bf16 %v1130_v23, %v1128_v22  ;;  %v2587_v26 = vpack.c.bf16 %v1323_v24, %v1321_v60  ;;  %v1132_v27 = vpop.f32.mrb[6].mxu0  ;;  %v1325_v28 = vpop.f32.mrb[6].mxu1 }
 0x106   : > { %v1134_v29 = vpop.f32.mrb[7].mxu0  ;;  %v1327_v30 = vpop.f32.mrb[7].mxu1 }
 0x107   : > { %2245 = vst [vmem:[%s3168_s21 + $0x20] sm:$0xff] %v2586_v25  ;;  %2246 = vst [vmem:[%s3168_s21 + $0x28] sm:$0xff] %v2587_v26  ;;  %v2588_v33 = vpack.c.bf16 %v1134_v29, %v1132_v27  ;;  %v2589_v34 = vpack.c.bf16 %v1327_v30, %v1325_v28 }
 0x109   : > { %2247 = vst [vmem:[%s3168_s21 + $0x30] sm:$0xff] %v2588_v33  ;;  %2248 = vst [vmem:[%s3168_s21 + $0x38] sm:$0xff] %v2589_v34 }
 0x10b   : > { %v1138_v36 = vpop.f32.mrb[8].mxu0  ;;  %v1331_v37 = vpop.f32.mrb[8].mxu1 }
 0x10c   : > { %v1140_v38 = vpop.f32.mrb[9].mxu0  ;;  %v1333_v39 = vpop.f32.mrb[9].mxu1 }
 0x10d   : > { %v2590_v40 = vpack.c.bf16 %v1140_v38, %v1138_v36  ;;  %v2591_v41 = vpack.c.bf16 %v1333_v39, %v1331_v37  ;;  %v1142_v42 = vpop.f32.mrb[10].mxu0  ;;  %v1335_v43 = vpop.f32.mrb[10].mxu1 }
 0x10e   : > { %v1144_v44 = vpop.f32.mrb[11].mxu0  ;;  %v1337_v45 = vpop.f32.mrb[11].mxu1 }
 0x10f   : > { %2249 = vst [vmem:[%s3168_s21 + $0x40] sm:$0xff] %v2590_v40  ;;  %2250 = vst [vmem:[%s3168_s21 + $0x48] sm:$0xff] %v2591_v41  ;;  %v2592_v48 = vpack.c.bf16 %v1144_v44, %v1142_v42  ;;  %v2593_v50 = vpack.c.bf16 %v1337_v45, %v1335_v43 }
 0x111   : > { %2251 = vst [vmem:[%s3168_s21 + $0x50] sm:$0xff] %v2592_v48  ;;  %2252 = vst [vmem:[%s3168_s21 + $0x58] sm:$0xff] %v2593_v50 }
 0x113   : > { %v1148_v51 = vpop.f32.mrb[12].mxu0  ;;  %v1341_v61 = vpop.f32.mrb[12].mxu1 }
 0x114   : > { %v1150_v52 = vpop.f32.mrb[13].mxu0  ;;  %v1343_v54 = vpop.f32.mrb[13].mxu1 }
 0x115   : > { %v2594_v55 = vpack.c.bf16 %v1150_v52, %v1148_v51  ;;  %v2595_v7 = vpack.c.bf16 %v1343_v54, %v1341_v61  ;;  %v1152_v56 = vpop.f32.mrb[14].mxu0  ;;  %v1345_v57 = vpop.f32.mrb[14].mxu1 }
 0x116   : > { %v1154_v59 = vpop.f32.mrb[15].mxu0  ;;  %v1347_v21 = vpop.f32.mrb[15].mxu1 }
 0x117   : > { %2253 = vst [vmem:[%s3168_s21 + $0x60] sm:$0xff] %v2594_v55  ;;  %2254 = vst [vmem:[%s3168_s21 + $0x68] sm:$0xff] %v2595_v7  ;;  %v2596_v12 = vpack.c.bf16 %v1154_v59, %v1152_v56  ;;  %v2597_v63 = vpack.c.bf16 %v1347_v21, %v1345_v57 }
 0x119   : > { %2255 = vst [vmem:[%s3168_s21 + $0x70] sm:$0xff] %v2596_v12  ;;  %2256 = vst [vmem:[%s3168_s21 + $0x78] sm:$0xff] %v2597_v63 }
 0x11b   : > { %v1158_v0 = vpop.f32.mrb[16].mxu0  ;;  %v1351_v1 = vpop.f32.mrb[16].mxu1 }
 0x11c   : > { %v1160_v3 = vpop.f32.mrb[17].mxu0  ;;  %v1353_v5 = vpop.f32.mrb[17].mxu1 }
 0x11d   : > { %v2598_v6 = vpack.c.bf16 %v1160_v3, %v1158_v0  ;;  %v2599_v8 = vpack.c.bf16 %v1353_v5, %v1351_v1  ;;  %v1162_v13 = vpop.f32.mrb[18].mxu0  ;;  %v1355_v9 = vpop.f32.mrb[18].mxu1 }
 0x11e   : > { %v1164_v46 = vpop.f32.mrb[19].mxu0  ;;  %v1357_v58 = vpop.f32.mrb[19].mxu1 }
 0x11f   : > { %2257 = vst [vmem:[%s3168_s21 + $0x80] sm:$0xff] %v2598_v6  ;;  %2258 = vst [vmem:[%s3168_s21 + $0x88] sm:$0xff] %v2599_v8  ;;  %v2600_v31 = vpack.c.bf16 %v1164_v46, %v1162_v13  ;;  %v2601_v32 = vpack.c.bf16 %v1357_v58, %v1355_v9 }
 0x121   : > { %2259 = vst [vmem:[%s3168_s21 + $0x90] sm:$0xff] %v2600_v31  ;;  %2260 = vst [vmem:[%s3168_s21 + $0x98] sm:$0xff] %v2601_v32 }
 0x123   : > { %v1168_v53 = vpop.f32.mrb[20].mxu0  ;;  %v1361_v4 = vpop.f32.mrb[20].mxu1 }
 0x124   : > { %v1170_v10 = vpop.f32.mrb[21].mxu0  ;;  %v1363_v14 = vpop.f32.mrb[21].mxu1 }
 0x125   : > { %v2602_v35 = vpack.c.bf16 %v1170_v10, %v1168_v53  ;;  %v2603_v49 = vpack.c.bf16 %v1363_v14, %v1361_v4  ;;  %v1172_v47 = vpop.f32.mrb[22].mxu0  ;;  %v1365_v62 = vpop.f32.mrb[22].mxu1 }
 0x126   : > { %v1174_v11 = vpop.f32.mrb[23].mxu0  ;;  %v1367_v15 = vpop.f32.mrb[23].mxu1 }
 0x127   : > { %2261 = vst [vmem:[%s3168_s21 + $0xa0] sm:$0xff] %v2602_v35  ;;  %2262 = vst [vmem:[%s3168_s21 + $0xa8] sm:$0xff] %v2603_v49  ;;  %v2604_v16 = vpack.c.bf16 %v1174_v11, %v1172_v47  ;;  %v2605_v2 = vpack.c.bf16 %v1367_v15, %v1365_v62 }
 0x129   : > { %2263 = vst [vmem:[%s3168_s21 + $0xb0] sm:$0xff] %v2604_v16  ;;  %2264 = vst [vmem:[%s3168_s21 + $0xb8] sm:$0xff] %v2605_v2 }
 0x12b   : > { %v1178_v17 = vpop.f32.mrb[24].mxu0  ;;  %v1371_v18 = vpop.f32.mrb[24].mxu1 }
 0x12c   : > { %v1180_v19 = vpop.f32.mrb[25].mxu0  ;;  %v1373_v20 = vpop.f32.mrb[25].mxu1 }
 0x12d   : > { %v2606_v22 = vpack.c.bf16 %v1180_v19, %v1178_v17  ;;  %v2607_v60 = vpack.c.bf16 %v1373_v20, %v1371_v18  ;;  %v1182_v23 = vpop.f32.mrb[26].mxu0  ;;  %v1375_v24 = vpop.f32.mrb[26].mxu1 }
 0x12e   : > { %v1184_v25 = vpop.f32.mrb[27].mxu0  ;;  %v1377_v26 = vpop.f32.mrb[27].mxu1 }
 0x12f   : > { %2265 = vst [vmem:[%s3168_s21 + $0xc0] sm:$0xff] %v2606_v22  ;;  %2266 = vst [vmem:[%s3168_s21 + $0xc8] sm:$0xff] %v2607_v60  ;;  %v2608_v27 = vpack.c.bf16 %v1184_v25, %v1182_v23  ;;  %v2609_v28 = vpack.c.bf16 %v1377_v26, %v1375_v24 }
 0x131   : > { %2267 = vst [vmem:[%s3168_s21 + $0xd0] sm:$0xff] %v2608_v27  ;;  %2268 = vst [vmem:[%s3168_s21 + $0xd8] sm:$0xff] %v2609_v28 }
 0x133   : > { %v1188_v29 = vpop.f32.mrb[28].mxu0  ;;  %v1381_v30 = vpop.f32.mrb[28].mxu1 }
 0x134   : > { %v1190_v33 = vpop.f32.mrb[29].mxu0  ;;  %v1383_v34 = vpop.f32.mrb[29].mxu1 }
 0x135   : > { %v2610_v36 = vpack.c.bf16 %v1190_v33, %v1188_v29  ;;  %v2611_v37 = vpack.c.bf16 %v1383_v34, %v1381_v30  ;;  %v1192_v38 = vpop.f32.mrb[30].mxu0  ;;  %v1385_v39 = vpop.f32.mrb[30].mxu1 }
 0x136   : > { %v1194_v40 = vpop.f32.mrb[31].mxu0  ;;  %v1387_v41 = vpop.f32.mrb[31].mxu1 }
 0x137   : > { %2269 = vst [vmem:[%s3168_s21 + $0xe0] sm:$0xff] %v2610_v36  ;;  %2270 = vst [vmem:[%s3168_s21 + $0xe8] sm:$0xff] %v2611_v37  ;;  %v2612_v42 = vpack.c.bf16 %v1194_v40, %v1192_v38  ;;  %v2613_v43 = vpack.c.bf16 %v1387_v41, %v1385_v39 }
 0x139   : > { %2271 = vst [vmem:[%s3168_s21 + $0xf0] sm:$0xff] %v2612_v42  ;;  %2272 = vst [vmem:[%s3168_s21 + $0xf8] sm:$0xff] %v2613_v43 }
 0x13b   : > { %v1198_v44 = vpop.f32.mrb[32].mxu0  ;;  %v1391_v45 = vpop.f32.mrb[32].mxu1 }
 0x13c   : > { %v1200_v48 = vpop.f32.mrb[33].mxu0  ;;  %v1393_v50 = vpop.f32.mrb[33].mxu1 }
 0x13d   : > { %v2614_v51 = vpack.c.bf16 %v1200_v48, %v1198_v44  ;;  %v2615_v61 = vpack.c.bf16 %v1393_v50, %v1391_v45  ;;  %v1202_v52 = vpop.f32.mrb[34].mxu0  ;;  %v1395_v54 = vpop.f32.mrb[34].mxu1 }
 0x13e   : > { %v1204_v55 = vpop.f32.mrb[35].mxu0  ;;  %v1397_v7 = vpop.f32.mrb[35].mxu1 }
 0x13f   : > { %2273 = vst [vmem:[%s3168_s21 + $0x100] sm:$0xff] %v2614_v51  ;;  %2274 = vst [vmem:[%s3168_s21 + $0x108] sm:$0xff] %v2615_v61  ;;  %v2616_v56 = vpack.c.bf16 %v1204_v55, %v1202_v52  ;;  %v2617_v57 = vpack.c.bf16 %v1397_v7, %v1395_v54 }
 0x141   : > { %2275 = vst [vmem:[%s3168_s21 + $0x110] sm:$0xff] %v2616_v56  ;;  %2276 = vst [vmem:[%s3168_s21 + $0x118] sm:$0xff] %v2617_v57 }
 0x143   : > { %v1208_v59 = vpop.f32.mrb[36].mxu0  ;;  %v1401_v21 = vpop.f32.mrb[36].mxu1 }
 0x144   : > { %v1210_v12 = vpop.f32.mrb[37].mxu0  ;;  %v1403_v63 = vpop.f32.mrb[37].mxu1 }
 0x145   : > { %v2618_v0 = vpack.c.bf16 %v1210_v12, %v1208_v59  ;;  %v2619_v1 = vpack.c.bf16 %v1403_v63, %v1401_v21  ;;  %v1212_v3 = vpop.f32.mrb[38].mxu0  ;;  %v1405_v5 = vpop.f32.mrb[38].mxu1 }
 0x146   : > { %v1214_v6 = vpop.f32.mrb[39].mxu0  ;;  %v1407_v8 = vpop.f32.mrb[39].mxu1 }
 0x147   : > { %2277 = vst [vmem:[%s3168_s21 + $0x120] sm:$0xff] %v2618_v0  ;;  %2278 = vst [vmem:[%s3168_s21 + $0x128] sm:$0xff] %v2619_v1  ;;  %v2620_v13 = vpack.c.bf16 %v1214_v6, %v1212_v3  ;;  %v2621_v9 = vpack.c.bf16 %v1407_v8, %v1405_v5 }
 0x149   : > { %2279 = vst [vmem:[%s3168_s21 + $0x130] sm:$0xff] %v2620_v13  ;;  %2280 = vst [vmem:[%s3168_s21 + $0x138] sm:$0xff] %v2621_v9 }
 0x14b   : > { %v1218_v46 = vpop.f32.mrb[40].mxu0  ;;  %v1411_v58 = vpop.f32.mrb[40].mxu1 }
 0x14c   : > { %v1220_v31 = vpop.f32.mrb[41].mxu0  ;;  %v1413_v32 = vpop.f32.mrb[41].mxu1 }
 0x14d   : > { %v2622_v53 = vpack.c.bf16 %v1220_v31, %v1218_v46  ;;  %v2623_v4 = vpack.c.bf16 %v1413_v32, %v1411_v58  ;;  %v1222_v10 = vpop.f32.mrb[42].mxu0  ;;  %v1415_v14 = vpop.f32.mrb[42].mxu1 }
 0x14e   : > { %v1224_v35 = vpop.f32.mrb[43].mxu0  ;;  %v1417_v49 = vpop.f32.mrb[43].mxu1 }
 0x14f   : > { %2281 = vst [vmem:[%s3168_s21 + $0x140] sm:$0xff] %v2622_v53  ;;  %2282 = vst [vmem:[%s3168_s21 + $0x148] sm:$0xff] %v2623_v4  ;;  %v2624_v47 = vpack.c.bf16 %v1224_v35, %v1222_v10  ;;  %v2625_v62 = vpack.c.bf16 %v1417_v49, %v1415_v14 }
 0x151   : > { %2283 = vst [vmem:[%s3168_s21 + $0x150] sm:$0xff] %v2624_v47  ;;  %2284 = vst [vmem:[%s3168_s21 + $0x158] sm:$0xff] %v2625_v62 }
 0x153   : > { %v1228_v11 = vpop.f32.mrb[44].mxu0  ;;  %v1421_v15 = vpop.f32.mrb[44].mxu1 }
 0x154   : > { %v1230_v16 = vpop.f32.mrb[45].mxu0  ;;  %v1423_v2 = vpop.f32.mrb[45].mxu1 }
 0x155   : > { %v2626_v17 = vpack.c.bf16 %v1230_v16, %v1228_v11  ;;  %v2627_v18 = vpack.c.bf16 %v1423_v2, %v1421_v15  ;;  %v1232_v19 = vpop.f32.mrb[46].mxu0  ;;  %v1425_v20 = vpop.f32.mrb[46].mxu1 }
 0x156   : > { %v1234_v22 = vpop.f32.mrb[47].mxu0  ;;  %v1427_v60 = vpop.f32.mrb[47].mxu1 }
 0x157   : > { %2285 = vst [vmem:[%s3168_s21 + $0x160] sm:$0xff] %v2626_v17  ;;  %2286 = vst [vmem:[%s3168_s21 + $0x168] sm:$0xff] %v2627_v18  ;;  %v2628_v23 = vpack.c.bf16 %v1234_v22, %v1232_v19  ;;  %v2629_v24 = vpack.c.bf16 %v1427_v60, %v1425_v20 }
 0x159   : > { %2287 = vst [vmem:[%s3168_s21 + $0x170] sm:$0xff] %v2628_v23  ;;  %2288 = vst [vmem:[%s3168_s21 + $0x178] sm:$0xff] %v2629_v24 }
 0x15b   : > { %v1238_v25 = vpop.f32.mrb[48].mxu0  ;;  %v1431_v26 = vpop.f32.mrb[48].mxu1 }
 0x15c   : > { %v1240_v27 = vpop.f32.mrb[49].mxu0  ;;  %v1433_v28 = vpop.f32.mrb[49].mxu1 }
 0x15d   : > { %v2630_v29 = vpack.c.bf16 %v1240_v27, %v1238_v25  ;;  %v2631_v30 = vpack.c.bf16 %v1433_v28, %v1431_v26  ;;  %v1242_v33 = vpop.f32.mrb[50].mxu0  ;;  %v1435_v34 = vpop.f32.mrb[50].mxu1 }
 0x15e   : > { %v1244_v36 = vpop.f32.mrb[51].mxu0  ;;  %v1437_v37 = vpop.f32.mrb[51].mxu1 }
 0x15f   : > { %2289 = vst [vmem:[%s3168_s21 + $0x180] sm:$0xff] %v2630_v29  ;;  %2290 = vst [vmem:[%s3168_s21 + $0x188] sm:$0xff] %v2631_v30  ;;  %v2632_v38 = vpack.c.bf16 %v1244_v36, %v1242_v33  ;;  %v2633_v39 = vpack.c.bf16 %v1437_v37, %v1435_v34 }
 0x161   : > { %2291 = vst [vmem:[%s3168_s21 + $0x190] sm:$0xff] %v2632_v38  ;;  %2292 = vst [vmem:[%s3168_s21 + $0x198] sm:$0xff] %v2633_v39 }
 0x163   : > { %v1248_v40 = vpop.f32.mrb[52].mxu0  ;;  %v1441_v41 = vpop.f32.mrb[52].mxu1 }
 0x164   : > { %v1250_v42 = vpop.f32.mrb[53].mxu0  ;;  %v1443_v43 = vpop.f32.mrb[53].mxu1 }
 0x165   : > { %v2634_v44 = vpack.c.bf16 %v1250_v42, %v1248_v40  ;;  %v2635_v45 = vpack.c.bf16 %v1443_v43, %v1441_v41  ;;  %v1252_v48 = vpop.f32.mrb[54].mxu0  ;;  %v1445_v50 = vpop.f32.mrb[54].mxu1 }
 0x166   : > { %v1254_v51 = vpop.f32.mrb[55].mxu0  ;;  %v1447_v61 = vpop.f32.mrb[55].mxu1 }
 0x167   : > { %2293 = vst [vmem:[%s3168_s21 + $0x1a0] sm:$0xff] %v2634_v44  ;;  %2294 = vst [vmem:[%s3168_s21 + $0x1a8] sm:$0xff] %v2635_v45  ;;  %v2636_v52 = vpack.c.bf16 %v1254_v51, %v1252_v48  ;;  %v2637_v54 = vpack.c.bf16 %v1447_v61, %v1445_v50 }
 0x169   : > { %2295 = vst [vmem:[%s3168_s21 + $0x1b0] sm:$0xff] %v2636_v52  ;;  %2296 = vst [vmem:[%s3168_s21 + $0x1b8] sm:$0xff] %v2637_v54 }
 0x16b   : > { %v1258_v55 = vpop.f32.mrb[56].mxu0  ;;  %v1451_v7 = vpop.f32.mrb[56].mxu1 }
 0x16c   : > { %v1260_v56 = vpop.f32.mrb[57].mxu0  ;;  %v1453_v57 = vpop.f32.mrb[57].mxu1 }
 0x16d   : > { %v2638_v59 = vpack.c.bf16 %v1260_v56, %v1258_v55  ;;  %v2639_v21 = vpack.c.bf16 %v1453_v57, %v1451_v7  ;;  %v1262_v12 = vpop.f32.mrb[58].mxu0  ;;  %v1455_v63 = vpop.f32.mrb[58].mxu1 }
 0x16e   : > { %v1264_v0 = vpop.f32.mrb[59].mxu0  ;;  %v1457_v1 = vpop.f32.mrb[59].mxu1 }
 0x16f   : > { %2297 = vst [vmem:[%s3168_s21 + $0x1c0] sm:$0xff] %v2638_v59  ;;  %2298 = vst [vmem:[%s3168_s21 + $0x1c8] sm:$0xff] %v2639_v21  ;;  %v2640_v3 = vpack.c.bf16 %v1264_v0, %v1262_v12  ;;  %v2641_v5 = vpack.c.bf16 %v1457_v1, %v1455_v63 }
 0x171   : > { %2299 = vst [vmem:[%s3168_s21 + $0x1d0] sm:$0xff] %v2640_v3  ;;  %2300 = vst [vmem:[%s3168_s21 + $0x1d8] sm:$0xff] %v2641_v5 }
 0x173   : > { %v1268_v6 = vpop.f32.mrb[60].mxu0  ;;  %v1461_v8 = vpop.f32.mrb[60].mxu1 }
 0x174   : > { %v1270_v13 = vpop.f32.mrb[61].mxu0  ;;  %v1463_v9 = vpop.f32.mrb[61].mxu1 }
 0x175   : > { %v2642_v46 = vpack.c.bf16 %v1270_v13, %v1268_v6  ;;  %v2643_v58 = vpack.c.bf16 %v1463_v9, %v1461_v8  ;;  %v1272_v31 = vpop.f32.mrb[62].mxu0  ;;  %v1465_v32 = vpop.f32.mrb[62].mxu1 }
 0x176   : > { %v1274_v53 = vpop.f32.mrb[63].mxu0  ;;  %v1467_v4 = vpop.f32.mrb[63].mxu1 }
 0x177   : > { %2301 = vst [vmem:[%s3168_s21 + $0x1e0] sm:$0xff] %v2642_v46  ;;  %2302 = vst [vmem:[%s3168_s21 + $0x1e8] sm:$0xff] %v2643_v58  ;;  %v2644_v10 = vpack.c.bf16 %v1274_v53, %v1272_v31  ;;  %v2645_v14 = vpack.c.bf16 %v1467_v4, %v1465_v32 }
 0x179   : > { %2303 = vst [vmem:[%s3168_s21 + $0x1f0] sm:$0xff] %v2644_v10  ;;  %2304 = vst [vmem:[%s3168_s21 + $0x1f8] sm:$0xff] %v2645_v14 }
 0x17a PF: > { %s16_s23 = sadd.s32 1, %s2741_s23   ;;  %s3250_s21 = smov %s2737_s22 }
 0x17b   : > { %p13_p5 = scmp.ge.s32.totalorder %s16_s23, 5   ;;  %s3251_s22 = smov %s3253_s24 }
 0x17d   :  { %15 = sbr.rel (!%p13_p5) target bundleno = 2 (0x2), region = 97 }

</bundles_post_ra>
